<compile_context>
chip_gen: v7x
topology: tpu7x:2x2x1
jax: 0.10.0
libtpu: 0.0.40
codegen_flags: <defaults>
</compile_context>

<pallas_src>
import jax
import jax.numpy as jnp
from jax.experimental import pallas as pl
from jax.experimental.pallas import tpu as pltpu

LN_EPS = 1e-5


def _patch_embed_ln_kernel(x_ref, gamma_ref, beta_ref, o_ref):
    # x_ref:     (1, C, tn)  channel-major input tile (transpose fused here)
    # gamma_ref: (C, 1)      LayerNorm weight (broadcasts over tokens / lanes)
    # beta_ref:  (C, 1)      LayerNorm bias
    # o_ref:     (1, tn, C)  lane-dense output tile
    x_cn = x_ref[0].astype(jnp.float32)                      # (C, tn)
    inv_c = jnp.float32(1.0) / jnp.float32(x_cn.shape[0])

    # Per-token statistics in channel-major layout: channel-direction sums are
    # VPU vreg adds + one tiny sublane reduce (no lane reductions, no extra
    # XLU transposes).  Two-pass mean / centered variance == nn.LayerNorm.
    mean = jnp.sum(x_cn, axis=0, keepdims=True) * inv_c      # (1, tn)
    d = x_cn - mean                                          # (C, tn)
    var = jnp.sum(d * d, axis=0, keepdims=True) * inv_c      # (1, tn)
    inv = jax.lax.rsqrt(var + LN_EPS)                        # (1, tn)  EUP

    gamma = gamma_ref[...].astype(jnp.float32)               # (C, 1)
    beta = beta_ref[...].astype(jnp.float32)
    y_cn = d * inv * gamma + beta                            # (C, tn)  VPU only

    # Single XLU transpose per tile, done in the output dtype.
    o_ref[...] = y_cn.astype(o_ref.dtype).T[None]


def _tpu_vmem_capacity_bytes():
    try:
        return int(pltpu.get_tpu_info().vmem_capacity_bytes)
    except Exception:
        return 64 * 1024 * 1024          # conservative: v7x per-TensorCore VMEM


def _choose_token_tile(N, C, in_itemsize, out_itemsize, budget_bytes):
    """Token-tile size: multiple of 128 (lane/layout friendly), as large as the
    per-step working set allows (3 pipelined input buffers + 2 output buffers
    + ~3 full-tile f32 temporaries), capped at 4096 tokens."""
    if N <= 128:
        return N

    def step_bytes(t):
        return t * C * (3 * in_itemsize + 2 * out_itemsize + 3 * 4)

    tn = 128
    cap = min(N, 4096)
    while tn * 2 <= cap and step_bytes(tn * 2) <= budget_bytes:
        tn *= 2
    return tn


def _xla_forward(x_bcn, gamma, beta):
    x = jnp.transpose(x_bcn, (0, 2, 1))
    x32 = x.astype(jnp.float32)
    mean = jnp.mean(x32, axis=-1, keepdims=True)
    var = jnp.mean((x32 - mean) ** 2, axis=-1, keepdims=True)
    y = (x32 - mean) * jax.lax.rsqrt(var + LN_EPS) * gamma + beta
    return y.astype(x.dtype)


def patch_embed_forward(x_nchw, gamma=None, beta=None, use_norm=True, use_pallas=None):
    """PatchEmbed.forward.

    x_nchw: (B, C, H, W)   (C == embed_dim for this module variant)
    returns: (B, H*W, C)
    """
    B, C, H, W = x_nchw.shape
    N = H * W

    # Free reshape (no HBM pass): NCHW -> (B, C, N).  The C<->N transpose is
    # fused into the kernel so transpose+LayerNorm is one HBM read + one write.
    x_bcn = x_nchw.reshape(B, C, N)

    if not use_norm:
        # norm_layer is None -> forward is just the flatten/transpose.
        return jnp.transpose(x_bcn, (0, 2, 1))

    in_itemsize = jnp.dtype(x_nchw.dtype).itemsize
    out_itemsize = in_itemsize
    total_bytes = B * N * C * in_itemsize
    if use_pallas is None:
        # Small-shape bail-out: for tiny tensors the pallas_call launch and
        # ~0.35us/grid-step overhead exceed the HBM time; XLA fusion wins.
        use_pallas = total_bytes >= (4 << 20)
    if not use_pallas:
        return _xla_forward(x_bcn, gamma, beta)

    vmem_cap = _tpu_vmem_capacity_bytes()
    # Per-step working-set budget: ~16 MiB on v7x (64 MiB VMEM per TC), up to
    # ~24 MiB on v5e/v6e (128 MiB VMEM).
    budget = min(vmem_cap // 4, 24 << 20)
    tn = _choose_token_tile(N, C, in_itemsize, out_itemsize, budget)
    grid = (B, pl.cdiv(N, tn))
    vmem_limit = min(max(32 << 20, 2 * budget), (vmem_cap * 3) // 4)

    gamma_c1 = gamma.reshape(C, 1)
    beta_c1 = beta.reshape(C, 1)

    def build(input_buffers):
        in0_kwargs = {}
        if input_buffers > 2 and hasattr(pl, "Buffered"):
            # The strided (1, C, tn) input DMA (C rows at stride N) has higher
            # descriptor latency than the contiguous output writes -> 3 buffers.
            in0_kwargs["pipeline_mode"] = pl.Buffered(input_buffers)
        return pl.pallas_call(
            _patch_embed_ln_kernel,
            out_shape=jax.ShapeDtypeStruct((B, N, C), x_nchw.dtype),
            grid_spec=pltpu.PrefetchScalarGridSpec(
                num_scalar_prefetch=0,
                grid=grid,
                in_specs=[
                    # channel-major tile; transpose happens on the XLU in-kernel
                    pl.BlockSpec((1, C, tn), lambda b, j: (b, 0, j), **in0_kwargs),
                    # gamma/beta: tiny; constant-index refetch is fine
                    pl.BlockSpec((C, 1), lambda b, j: (0, 0)),
                    pl.BlockSpec((C, 1), lambda b, j: (0, 0)),
                ],
                out_specs=pl.BlockSpec((1, tn, C), lambda b, j: (b, j, 0)),
            ),
            compiler_params=pltpu.CompilerParams(
                dimension_semantics=("parallel", "parallel"),
                vmem_limit_bytes=vmem_limit,
            ),
        )

    try:
        return build(3)(x_bcn, gamma_c1, beta_c1)
    except Exception:
        # Fallback to the default double-buffered pipeline (known-good config).
        return build(2)(x_bcn, gamma_c1, beta_c1)


def reference_forward(x_nchw, gamma, beta, use_norm=True):
    B, C, H, W = x_nchw.shape
    x = jnp.transpose(x_nchw.reshape(B, C, H * W), (0, 2, 1))
    if not use_norm:
        return x
    x32 = x.astype(jnp.float32)
    mean = jnp.mean(x32, axis=-1, keepdims=True)
    var = jnp.mean((x32 - mean) ** 2, axis=-1, keepdims=True)
    y = (x32 - mean) * jax.lax.rsqrt(var + LN_EPS) * gamma + beta
    return y.astype(x.dtype)


if __name__ == "__main__":
    # Shapes consistent with the module:
    #   img_size=128, patch_size=4 -> patches_resolution=(32, 32), num_patches=1024
    #   embed_dim=128 (multiple of 128 -> lane-dense, unmasked output stores).
    B, embed_dim, Ph, Pw = 2, 128, 32, 32

    key = jax.random.PRNGKey(0)
    kx, kg, kb = jax.random.split(key, 3)
    x = jax.random.normal(kx, (B, embed_dim, Ph, Pw), dtype=jnp.float32)

    # LayerNorm params (perturbed from ones/zeros so the affine path is exercised).
    gamma = 1.0 + 0.1 * jax.random.normal(kg, (embed_dim,), dtype=jnp.float32)
    beta = 0.1 * jax.random.normal(kb, (embed_dim,), dtype=jnp.float32)

    # Force the Pallas path so the kernel is exercised even at this small size
    # (auto-dispatch would route a 1 MiB tensor to the XLA fallback).
    out = jax.block_until_ready(
        patch_embed_forward(x, gamma, beta, use_norm=True, use_pallas=True))

    ref = reference_forward(x, gamma, beta, use_norm=True)
    assert out.shape == (B, Ph * Pw, embed_dim), out.shape
    assert jnp.allclose(out, ref, atol=1e-5, rtol=1e-5), "mismatch vs reference"

    # Auto-dispatch (small-shape bail-out -> XLA path) must agree too.
    out_auto = jax.block_until_ready(
        patch_embed_forward(x, gamma, beta, use_norm=True))
    assert jnp.allclose(out_auto, ref, atol=1e-5, rtol=1e-5)

    # norm_layer=None path (pure flatten/transpose).
    out_nonorm = jax.block_until_ready(
        patch_embed_forward(x, gamma, beta, use_norm=False))
    assert jnp.array_equal(out_nonorm, reference_forward(x, gamma, beta, use_norm=False))

    print("KERNEL_OK")
</pallas_src>

<mosaic_0001>
module attributes {stable_mosaic.version = 11 : i64} {
  func.func @_patch_embed_ln_kernel(%arg0: i32, %arg1: i32, %arg2: memref<1x128x1024xf32, #tpu.memory_space<vmem>>, %arg3: memref<128x1xf32, #tpu.memory_space<vmem>>, %arg4: memref<128x1xf32, #tpu.memory_space<vmem>>, %arg5: memref<1x1024x128xf32, #tpu.memory_space<vmem>>) attributes {dimension_semantics = [#tpu.dimension_semantics<parallel>, #tpu.dimension_semantics<parallel>], iteration_bounds = array<i64: 2, 1>, scalar_prefetch = 0 : i64, scratch_operands = 0 : i64, tpu.core_type = #tpu.core_type<tc>, window_params = [{transform_indices = @transform_0, window_bounds = array<i64: 1, 128, 1024>}, {pipeline_mode = #tpu.pipeline_mode<synchronous>, transform_indices = @transform_1, window_bounds = array<i64: 128, 1>}, {pipeline_mode = #tpu.pipeline_mode<synchronous>, transform_indices = @transform_2, window_bounds = array<i64: 128, 1>}, {transform_indices = @transform_3, window_bounds = array<i64: 1, 1024, 128>}]} {
    %c0 = arith.constant 0 : index
    %c0_0 = arith.constant 0 : index
    %c0_1 = arith.constant 0 : index
    %0 = vector.load %arg2[%c0, %c0_0, %c0_1] : memref<1x128x1024xf32, #tpu.memory_space<vmem>>, vector<1x128x1024xf32>
    %1 = vector.shape_cast %0 : vector<1x128x1024xf32> to vector<128x1024xf32>
    %cst = arith.constant 1.000000e+00 : f32
    %cst_2 = arith.constant 1.280000e+02 : f32
    %2 = arith.divf %cst, %cst_2 : f32
    %cst_3 = arith.constant dense<0.000000e+00> : vector<1024xf32>
    %3 = vector.multi_reduction <add>, %1, %cst_3 [0] : vector<128x1024xf32> to vector<1024xf32>
    %4 = vector.shape_cast %3 : vector<1024xf32> to vector<1x1024xf32>
    %5 = vector.broadcast %2 : f32 to vector<1x1024xf32>
    %6 = arith.mulf %4, %5 : vector<1x1024xf32>
    %7 = vector.broadcast %6 : vector<1x1024xf32> to vector<128x1024xf32>
    %8 = arith.subf %1, %7 : vector<128x1024xf32>
    %9 = arith.mulf %8, %8 : vector<128x1024xf32>
    %cst_4 = arith.constant dense<0.000000e+00> : vector<1024xf32>
    %10 = vector.multi_reduction <add>, %9, %cst_4 [0] : vector<128x1024xf32> to vector<1024xf32>
    %11 = vector.shape_cast %10 : vector<1024xf32> to vector<1x1024xf32>
    %12 = vector.broadcast %2 : f32 to vector<1x1024xf32>
    %13 = arith.mulf %11, %12 : vector<1x1024xf32>
    %cst_5 = arith.constant 9.99999974E-6 : f32
    %14 = vector.broadcast %cst_5 : f32 to vector<1x1024xf32>
    %15 = arith.addf %13, %14 : vector<1x1024xf32>
    %16 = math.rsqrt %15 : vector<1x1024xf32>
    %c0_6 = arith.constant 0 : index
    %c0_7 = arith.constant 0 : index
    %17 = vector.load %arg3[%c0_6, %c0_7] : memref<128x1xf32, #tpu.memory_space<vmem>>, vector<128x1xf32>
    %c0_8 = arith.constant 0 : index
    %c0_9 = arith.constant 0 : index
    %18 = vector.load %arg4[%c0_8, %c0_9] : memref<128x1xf32, #tpu.memory_space<vmem>>, vector<128x1xf32>
    %19 = vector.broadcast %16 : vector<1x1024xf32> to vector<128x1024xf32>
    %20 = arith.mulf %8, %19 : vector<128x1024xf32>
    %21 = vector.broadcast %17 : vector<128x1xf32> to vector<128x1024xf32>
    %22 = arith.mulf %20, %21 : vector<128x1024xf32>
    %23 = vector.broadcast %18 : vector<128x1xf32> to vector<128x1024xf32>
    %24 = arith.addf %22, %23 : vector<128x1024xf32>
    %25 = tpu.transpose %24, [1, 0] : vector<128x1024xf32> -> vector<1024x128xf32>
    %26 = vector.shape_cast %25 : vector<1024x128xf32> to vector<1x1024x128xf32>
    %c0_10 = arith.constant 0 : index
    %c0_11 = arith.constant 0 : index
    %c0_12 = arith.constant 0 : index
    %27 = vector.load %arg5[%c0_10, %c0_11, %c0_12] : memref<1x1024x128xf32, #tpu.memory_space<vmem>>, vector<1x1024x128xf32>
    tpu.vector_store %arg5[%c0_10, %c0_11, %c0_12], %26 {strides = array<i32>} : memref<1x1024x128xf32, #tpu.memory_space<vmem>>, vector<1x1024x128xf32>,
    return
  }
  func.func @transform_0(%arg0: i32, %arg1: i32) -> (i32, i32, i32) {
    %c0_i32 = arith.constant 0 : i32
    %c0_i32_0 = arith.constant 0 : i32
    return %arg0, %c0_i32, %arg1 : i32, i32, i32
  }
  func.func @transform_1(%arg0: i32, %arg1: i32) -> (i32, i32) {
    %c0_i32 = arith.constant 0 : i32
    %c0_i32_0 = arith.constant 0 : i32
    %c0_i32_1 = arith.constant 0 : i32
    return %c0_i32, %c0_i32_0 : i32, i32
  }
  func.func @transform_2(%arg0: i32, %arg1: i32) -> (i32, i32) {
    %c0_i32 = arith.constant 0 : i32
    %c0_i32_0 = arith.constant 0 : i32
    %c0_i32_1 = arith.constant 0 : i32
    return %c0_i32, %c0_i32_0 : i32, i32
  }
  func.func @transform_3(%arg0: i32, %arg1: i32) -> (i32, i32, i32) {
    %c0_i32 = arith.constant 0 : i32
    %c0_i32_0 = arith.constant 0 : i32
    return %arg0, %arg1, %c0_i32 : i32, i32, i32
  }
}

</mosaic_0001>

<bundles_post_ra>
// kernel: tpu_custom_call.1
= control target key start
LH: loop header
LB: loop body
LE: loop exit
PB: predicated region body
PF: predicated region fallthrough
CT: control target
= control target key end

     0   :  { %8 = vsyncpa [#allocation3], 0  ;;  %s4591_s0 = inlined_call_operand.hbm [shape: f32[2,128,1024], index: 0, kind: input, shape index: {}]   ;;  %s4592_s1 = inlined_call_operand.vmem [shape: f32[128,1], index: 1, kind: input, shape index: {}]   ;;  %s4593_s2 = inlined_call_operand.vmem [shape: f32[128,1], index: 2, kind: input, shape index: {}]   ;;  %s4594_s3 = inlined_call_operand.hbm [shape: f32[2,1024,128], index: 3, kind: output, shape index: {}]  }
   0x1   :  { %10 = vsyncpa [#allocation3 + $0x1], 0 }
   0x2   :  { %11 = vsyncpa [#allocation4], 0 }
   0x3   :  { %13 = vsyncpa [#allocation4 + $0x1], 0  ;;  %s2267_s12 = smov 0   ;;  %s2269_s13 = smov 0  }
   0x4   :  { %s2271_s14 = smov 0   ;;  %s2273_s15 = smov 0  }
   0x5   :  { %s2275_s16 = smov 0   ;;  %s2277_s17 = smov 0  }
   0x6 LB: > { %s2024_s18 = sadd.s32 4294967295, %s2238_s17   ;;  %s2025_s19 = sadd.s32 4294967294, %s2238_s17   ;;  %s2238_s17 = sphi %s2277_s17, %s19_s17   ;;  %s2234_s16 = sphi %s2275_s16, %s5140_s16   ;;  %s2230_s15 = sphi %s2273_s15, %s5139_s15   ;;  %s2226_s14 = sphi %s2271_s14, %s5138_s14   ;;  %s2222_s13 = sphi %s2269_s13, %s5137_s13   ;;  %s2218_s12 = sphi %s2267_s12, %s5136_s12  }
   0x7   : > { %s31_s20 = sadd.s32 1, %s2234_s16  ;;  %s40_s21 = sadd.s32 1, %s2226_s14 }
   0x8   : > { %p33_p0 = scmp.ge.s32.totalorder %s31_s20, 2  ;;  %p47_p1 = scmp.ne.s32.totalorder %s2226_s14, %s2222_s13 }
   0x9   : > { %p48_p2 = scmp.eq.s32.totalorder %s2238_s17, 0  ;;  %p53_p3 = scmp.ne.s32.totalorder %s2222_s13, %s2218_s12 }
   0xa   : > { %s5142_s20 = smov (%p33_p0, %s31_s20), 0  ;;  %p54_p5 = scmp.eq.s32.totalorder %s2024_s18, 0 }
   0xb   : > { %p2308_p4 = por %p48_p2, %p47_p1  ;;  %s35_s23 = ssub.s32 %s2234_s16, %s5142_s20 }
   0xc   : > { %p121_p6 = scmp.eq.s32.totalorder %s2024_s18, 1  ;;  %p38_p7 = scmp.eq.s32.totalorder %s35_s23, 0 }
   0xd   : > { %p2314_p8 = por %p54_p5, %p53_p3  ;;  %p127_p10 = scmp.eq.s32.totalorder %s2025_s19, 1 }
   0xe   : > { %p2318_p9 = por %p121_p6, %p47_p1  ;;  %p2053_p13 = scmp.lt.s32.totalorder %s2238_s17, 2 }
   0xf   : > { %s2323_s26 = scalar_select %p38_p7, %s2226_s14, %s40_s21  }
  0x10   : > { %s4776_s25 = scalar_select %p2318_p9, 1, 0 }
  0x11   : > { %p2325_p11 = por %p127_p10, %p53_p3  ;;  %s153_s28 = sand.u32 1, %s2226_s14  }
  0x12   : > { %s2028_s29 = sshll.u32 %s153_s28, 10  ;;  %s2039_s30 = sshll.u32 %s2234_s16, 14 }
  0x13   : > { %s4777_s27 = scalar_select %p2325_p11, 1, 0 }
  0x14   : > { %s2336_s6 = scalar_lea.hbm %s4591_s0, %s2039_s30  ;;  %s157_s7 = scalar_lea.vmem [#allocation2], %s2028_s29 }
  0x15   : > { %s166_s8 = sshll.u32 %s157_s7, 4  ;;  %p2342_p0 = pnand %p2053_p13, %p2308_p4  ;;  %s2338_s8 = int_to_ptr.vmem [resolvable:$true] %s166_s8 }
  0x16   : > { %s2347_s10 = scalar_lea.sflag [#allocation3], %s153_s28  ;;  %s2126_s11 = scalar_lea.hbm %s2336_s6, 16384 }
  0x17   : > { %p2127_p2 = scmp.ne.s32.totalorder %s2336_s6, %s2126_s11  ;;  %p2128_p3 = pneg %p2342_p0 }
  0x18   : > { %s2131_s21 = scalar_lea.hbm %s4591_s0, 32768  ;;  %p2132_p4 = scmp.lt.u32.totalorder %s2336_s6, %s4591_s0 }
  0x19   : > { %p2129_p5 = pnand %p2128_p3, %p2127_p2  ;;  %p2133_p7 = scmp.lt.u32.totalorder %s2131_s21, %s2126_s11 }
  0x1a   : > { %p2135_p13 = scmp.lt.u32.totalorder %s2126_s11, %s2336_s6 }
  0x1b   : > { %p2130_p6 = pneg %p2129_p5  ;;  %p2134_p10 = por %p2133_p7, %p2132_p4 }
  0x1d   : > { %p2136_p12 = por %p2135_p13, %p2134_p10 }
  0x1f   : > { %p2137_p1 = pnand %p2136_p12, %p2130_p6 }
  0x21   : > { %2140 = shalt.err (!%p2137_p1)
}
  0x22   : > { %s2141_s28 = scalar_lea.vmem %s2338_s8, 16384  ;;  %s2240_s29 = smov [#allocation2]  }
  0x23   : > { %p2142_p2 = scmp.ne.s32.totalorder %s2338_s8, %s2141_s28  ;;  %s2146_s30 = sshll.u32 %s2240_s29, 4  ;;  %s2147_s30 = int_to_ptr.vmem [resolvable:$false] %s2146_s30 }
  0x24   : > { %s2148_s4 = scalar_lea.vmem %s2147_s30, 32768  ;;  %p2149_p9 = scmp.lt.s32.totalorder %s2338_s8, %s2147_s30 }
  0x25   : > { %p2144_p5 = pnand %p2142_p2, %p2128_p3  ;;  %p2150_p4 = scmp.lt.s32.totalorder %s2148_s4, %s2141_s28 }
  0x27   : > { %p2145_p11 = pneg %p2144_p5  ;;  %p2151_p7 = por %p2150_p4, %p2149_p9 }
  0x29   : > { %p2152_p10 = pnand %p2151_p7, %p2145_p11 }
  0x2b   : > { %2155 = shalt.err (!%p2152_p10)
}
  0x2c   : > { %s2241_s5 = smov 1024   ;;  %s2242_s7 = smov 64  }
  0x2d   : > { %2048 = dma.hbm_to_vmem [thread:$0]  (!%p2342_p0), %s2336_s6, 16384, %s2338_s8, %s2347_s10, %s2241_s5, %s2241_s5, %s2242_s7  }
  0x2e   : > { %p174_p12 = scmp.lt.s32.totalorder %s2238_s17, 3  ;;  %p4779_p1 = scmp.ge.s32.totalorder %s2238_s17, 1 }
  0x30   : > { %p175_p3 = pnand %p4779_p1, %p174_p12 }
  0x32   : > { %178 = sbr.rel (%p175_p3) target bundleno = 621 (0x26d), region = 32 }
  0x39   : > { %s2379_s11 = sand.u32 1, %s2222_s13  }
  0x3a   : > { %s2032_s18 = sshll.u32 %s2379_s11, 10  ;;  %s181_s19 = scalar_lea.sflag [#allocation3], %s2379_s11 }
  0x3b   : > { %s2385_s21 = scalar_lea.vmem [#allocation2], %s2032_s18 }
  0x3c   : > { %2209 = dma.done.wait (%p2314_p8), %s181_s19, 16384  }
  0x3d   : > { %2211 = vsyncadd (%p2314_p8), %s181_s19, 4294950912  ;;  %v2243_v0 = vmov 0   ;;  %v963_v1 = vld [vmem:[%s4592_s1 + $0x10] sm:$0xff]  ;;  %v961_v2 = vld [vmem:[%s4592_s1] sm:$0xff]  ;;  %p5133_p9 = scmp.ne.s32.totalorder %s4776_s25, 0  ;;  %s2244_s19 = smov [#allocation5]  }
  0x3e   : > { %2109 = vset.pattern.permute.xlu1 %v2243_v0  ;;  %2108 = vset.pattern.permute.xlu0 %v2243_v0  ;;  %v964_v3 = vld [vmem:[%s4592_s1 + $0x18] sm:$0xff]  ;;  %v962_v4 = vld [vmem:[%s4592_s1 + $0x8] sm:$0xff]  ;;  %v965_v6 = vld [vmem:[%s4592_s1 + $0x20] sm:$0xff]  ;;  %s2160_s6 = sshll.u32 %s2244_s19, 4  ;;  %s2161_s6 = int_to_ptr.vmem [resolvable:$false] %s2160_s6 }
  0x3f   : > { %1133 = vperm.xlu1 %2109, %v963_v1   ;;  %1123 = vperm.xlu0 %2108, %v961_v2   ;;  %v966_v5 = vld [vmem:[%s4592_s1 + $0x28] sm:$0xff]  ;;  %v968_v7 = vld [vmem:[%s4592_s1 + $0x38] sm:$0xff]  ;;  %v967_v8 = vld [vmem:[%s4592_s1 + $0x30] sm:$0xff]  ;;  %s2162_s8 = scalar_lea.vmem %s2161_s6, 32768 }
  0x40   : > { %v2416_v9 = vld [vmem:[%s2385_s21 + $0x8] sm:$0xff]  ;;  %v969_v15 = vld [vmem:[%s4592_s1 + $0x40] sm:$0xff]  ;;  %v972_v24 = vld [vmem:[%s4592_s1 + $0x58] sm:$0xff] }
  0x41   : > { %v2419_v10 = vld [vmem:[%s2385_s21 + $0x48] sm:$0xff]  ;;  %v2441_v19 = vld [vmem:[%s2385_s21] sm:$0xff]  ;;  %v971_v25 = vld [vmem:[%s4592_s1 + $0x50] sm:$0xff] }
  0x42   : > { %v2422_v11 = vld [vmem:[%s2385_s21 + $0x88] sm:$0xff]  ;;  %v358_v12 = vadd.f32 %v2419_v10, %v2416_v9  ;;  %v2444_v20 = vld [vmem:[%s2385_s21 + $0x40] sm:$0xff]  ;;  %v2480_v35 = vld [vmem:[%s2385_s21 + $0x18] sm:$0xff] }
  0x43   : > { %1138 = vperm.xlu1 %2109, %v964_v3   ;;  %1128 = vperm.xlu0 %2108, %v962_v4   ;;  %v2427_v13 = vld [vmem:[%s2385_s21 + $0xc8] sm:$0xff]  ;;  %v2447_v21 = vld [vmem:[%s2385_s21 + $0x80] sm:$0xff]  ;;  %v337_v23 = vadd.f32 %v2444_v20, %v2441_v19  ;;  %v2483_v36 = vld [vmem:[%s2385_s21 + $0x58] sm:$0xff] }
  0x44   : > { %v970_v14 = vld [vmem:[%s4592_s1 + $0x48] sm:$0xff]  ;;  %v359_v16 = vadd.f32 %v358_v12, %v2422_v11  ;;  %v2462_v27 = vld [vmem:[%s2385_s21 + $0xc0] sm:$0xff]  ;;  %v2493_v40 = vld [vmem:[%s2385_s21 + $0x98] sm:$0xff]  ;;  %v400_v41 = vadd.f32 %v2483_v36, %v2480_v35 }
  0x45   : > { %v2437_v17 = vld [vmem:[%s2385_s21 + $0x108] sm:$0xff]  ;;  %v338_v29 = vadd.f32 %v337_v23, %v2447_v21  ;;  %v2473_v32 = vld [vmem:[%s2385_s21 + $0x100] sm:$0xff]  ;;  %v2502_v44 = vld [vmem:[%s2385_s21 + $0xd8] sm:$0xff] }
  0x46   : > { %v360_v18 = vadd.f32 %v359_v16, %v2427_v13  ;;  %v2450_v22 = vld [vmem:[%s2385_s21 + $0x148] sm:$0xff]  ;;  %v973_v37 = vld [vmem:[%s4592_s1 + $0x60] sm:$0xff]  ;;  %v401_v47 = vadd.f32 %v400_v41, %v2493_v40  ;;  %v976_v48 = vld [vmem:[%s4592_s1 + $0x78] sm:$0xff] }
  0x47   : > { %1148 = vperm.xlu1 %2109, %v966_v5   ;;  %1143 = vperm.xlu0 %2108, %v965_v6   ;;  %v2465_v28 = vld [vmem:[%s2385_s21 + $0x188] sm:$0xff]  ;;  %v339_v34 = vadd.f32 %v338_v29, %v2462_v27  ;;  %v2490_v39 = vld [vmem:[%s2385_s21 + $0x140] sm:$0xff]  ;;  %v2517_v51 = vld [vmem:[%s2385_s21 + $0x118] sm:$0xff] }
  0x48   : > { %v361_v26 = vadd.f32 %v360_v18, %v2437_v17  ;;  %v974_v30 = vld [vmem:[%s4592_s1 + $0x68] sm:$0xff]  ;;  %v2506_v46 = vld [vmem:[%s2385_s21 + $0x180] sm:$0xff]  ;;  %v975_v52 = vld [vmem:[%s4592_s1 + $0x70] sm:$0xff]  ;;  %v402_v55 = vadd.f32 %v401_v47, %v2502_v44 }
  0x49   : > { %v2476_v33 = vld [vmem:[%s2385_s21 + $0x1c8] sm:$0xff]  ;;  %v340_v43 = vadd.f32 %v339_v34, %v2473_v32  ;;  %v2524_v54 = vld [vmem:[%s2385_s21 + $0x1c0] sm:$0xff]  ;;  %v2528_v56 = vld [vmem:[%s2385_s21 + $0x10] sm:$0xff] }
  0x4a   : > { %v362_v31 = vadd.f32 %v361_v26, %v2450_v22  ;;  %v2498_v42 = vld [vmem:[%s2385_s21 + $0x208] sm:$0xff]  ;;  %v2535_v59 = vld [vmem:[%s2385_s21 + $0x50] sm:$0xff]  ;;  %v2542_v62 = vld [vmem:[%s2385_s21 + $0x200] sm:$0xff]  ;;  %v403_v0 = vadd.f32 %v402_v55, %v2517_v51 }
  0x4b   : > { %1158 = vperm.xlu1 %2109, %v968_v7   ;;  %1153 = vperm.xlu0 %2108, %v967_v8   ;;  %v2513_v49 = vld [vmem:[%s2385_s21 + $0x248] sm:$0xff]  ;;  %v341_v50 = vadd.f32 %v340_v43, %v2490_v39  ;;  %v2538_v60 = vld [vmem:[%s2385_s21 + $0x90] sm:$0xff]  ;;  %v2545_v63 = vld [vmem:[%s2385_s21 + $0x158] sm:$0xff]  ;;  %v379_v1 = vadd.f32 %v2535_v59, %v2528_v56 }
  0x4c   : > { %v363_v38 = vadd.f32 %v362_v31, %v2465_v28  ;;  %v2531_v57 = vld [vmem:[%s2385_s21 + $0x288] sm:$0xff]  ;;  %v2555_v4 = vld [vmem:[%s2385_s21 + $0xd0] sm:$0xff]  ;;  %v977_v6 = vld [vmem:[%s4593_s2] sm:$0xff]  ;;  %v404_v16 = vadd.f32 %v403_v0, %v2545_v63 }
  0x4d   : > { %v342_v58 = vadd.f32 %v341_v50, %v2506_v46  ;;  %v2551_v2 = vld [vmem:[%s2385_s21 + $0x2c8] sm:$0xff]  ;;  %v2565_v8 = vld [vmem:[%s2385_s21 + $0x240] sm:$0xff]  ;;  %v380_v12 = vadd.f32 %v379_v1, %v2538_v60  ;;  %v2574_v18 = vld [vmem:[%s2385_s21 + $0x110] sm:$0xff] }
  0x4e   : > { %v364_v45 = vadd.f32 %v363_v38, %v2476_v33  ;;  %v978_v5 = vld [vmem:[%s4593_s2 + $0x8] sm:$0xff]  ;;  %v2589_v31 = vld [vmem:[%s2385_s21 + $0x150] sm:$0xff]  ;;  %v980_v34 = vld [vmem:[%s4593_s2 + $0x18] sm:$0xff] }
  0x4f   : > { %1168 = vperm.xlu1 %2109, %v970_v14   ;;  %1163 = vperm.xlu0 %2108, %v969_v15   ;;  %v343_v3 = vadd.f32 %v342_v58, %v2524_v54  ;;  %v2569_v14 = vld [vmem:[%s2385_s21 + $0x308] sm:$0xff]  ;;  %v381_v26 = vadd.f32 %v380_v12, %v2555_v4  ;;  %v2599_v41 = vld [vmem:[%s2385_s21 + $0x2c0] sm:$0xff]  ;;  %v2615_v55 = vld [vmem:[%s2385_s21 + $0x190] sm:$0xff] }
  0x50   : > { %v365_v53 = vadd.f32 %v364_v45, %v2498_v42  ;;  %v2585_v29 = vld [vmem:[%s2385_s21 + $0x348] sm:$0xff] }
  0x51   : > { %v344_v15 = vadd.f32 %v343_v3, %v2542_v62  ;;  %v382_v43 = vadd.f32 %v381_v26, %v2574_v18  ;;  %v2603_v45 = vld [vmem:[%s2385_s21 + $0x388] sm:$0xff]  ;;  %v981_v3 = vld [vmem:[%s4593_s2 + $0x20] sm:$0xff]  ;;  %v2640_v26 = vld [vmem:[%s2385_s21 + $0x218] sm:$0xff] }
  0x52   : > { %v366_v61 = vadd.f32 %v365_v53, %v2513_v49  ;;  %v2612_v53 = vld [vmem:[%s2385_s21 + $0x1d8] sm:$0xff]  ;;  %v982_v1 = vld [vmem:[%s4593_s2 + $0x28] sm:$0xff]  ;;  %4781 = vst [vmem:[#allocation9_spill] sm:$0xff] %v2640_v26 }
  0x53   : > { %1178 = vperm.xlu1 %2109, %v972_v24   ;;  %1173 = vperm.xlu0 %2108, %v971_v25   ;;  %v2578_v24 = vld [vmem:[%s2385_s21 + $0x280] sm:$0xff]  ;;  %v2581_v25 = vld [vmem:[%s2385_s21 + $0x198] sm:$0xff]  ;;  %4780 = vst [vmem:[#allocation8_spill] sm:$0xff] %v2612_v53  ;;  %v383_v58 = vadd.f32 %v382_v43, %v2589_v31 }
  0x54   : > { %v367_v7 = vadd.f32 %v366_v61, %v2531_v57  ;;  %v2619_v61 = vld [vmem:[%s2385_s21 + $0x3c8] sm:$0xff] }
  0x56   : > { %v368_v23 = vadd.f32 %v367_v7, %v2551_v2 }
  0x57   : > { %1188 = vperm.xlu1 %2109, %v974_v30   ;;  %1183 = vperm.xlu0 %2108, %v973_v37   ;;  %v345_v30 = vadd.f32 %v344_v15, %v2565_v8  ;;  %v979_v37 = vld [vmem:[%s4593_s2 + $0x10] sm:$0xff]  ;;  %v384_v15 = vadd.f32 %v383_v58, %v2615_v55 }
  0x58   : > { %v369_v38 = vadd.f32 %v368_v23, %v2569_v14  ;;  %v2637_v23 = vld [vmem:[%s2385_s21 + $0x380] sm:$0xff] }
  0x59   : > { %v346_v47 = vadd.f32 %v345_v30, %v2578_v24  ;;  %v2643_v30 = vld [vmem:[%s2385_s21 + $0x1d0] sm:$0xff] }
  0x5a   : > { %v370_v50 = vadd.f32 %v369_v38, %v2585_v29  ;;  %4782 = vst [vmem:[#allocation10_spill] sm:$0xff] %v2643_v30  ;;  %v983_v38 = vld [vmem:[%s4593_s2 + $0x30] sm:$0xff]  ;;  %v385_v58 = vadd.f32 %v384_v15, %v2643_v30  ;;  %v988_v30 = vld [vmem:[%s4593_s2 + $0x58] sm:$0xff] }
  0x5b   : > { %1198 = vperm.xlu1 %2109, %v976_v48   ;;  %1193 = vperm.xlu0 %2108, %v975_v52   ;;  %v405_v48 = vadd.f32 %v404_v16, %v2581_v25  ;;  %v2609_v52 = vld [vmem:[%s2385_s21 + $0x300] sm:$0xff]  ;;  %v347_v0 = vadd.f32 %v346_v47, %v2599_v41 }
  0x5c   : > { %v2653_v47 = vld [vmem:[%s2385_s21 + $0x3c0] sm:$0xff] }
  0x5d   : > { %v348_v7 = vadd.f32 %v347_v0, %v2609_v52  ;;  %v406_v12 = vadd.f32 %v405_v48, %v2612_v53  ;;  %v987_v53 = vld [vmem:[%s4593_s2 + $0x50] sm:$0xff] }
  0x5f   : > { %1336 = vperm.xlu1 %2109, %v978_v5   ;;  %1331 = vperm.xlu0 %2108, %v977_v6   ;;  %v371_v5 = vadd.f32 %v370_v50, %v2603_v45  ;;  %v2630_v6 = vld [vmem:[%s2385_s21 + $0x340] sm:$0xff]  ;;  %v407_v50 = vadd.f32 %v406_v12, %v2640_v26 }
  0x60   : > { %v985_v12 = vld [vmem:[%s4593_s2 + $0x40] sm:$0xff] }
  0x61   : > { %v372_v16 = vadd.f32 %v371_v5, %v2619_v61 }
  0x63   : > { %1346 = vperm.xlu1 %2109, %v980_v34   ;;  %1341 = vperm.xlu0 %2108, %v979_v37   ;;  %v349_v34 = vadd.f32 %v348_v7, %v2630_v6  ;;  %v984_v37 = vld [vmem:[%s4593_s2 + $0x38] sm:$0xff]  ;;  %v373_v43 = vrot.slane %v372_v16, 4  ;;  %v986_v7 = vld [vmem:[%s4593_s2 + $0x48] sm:$0xff] }
  0x65   : > { %v350_v48 = vadd.f32 %v349_v34, %v2637_v23  ;;  %v374_v0 = vadd.f32 %v373_v43, %v372_v16  ;;  %v2677_v43 = vld [vmem:[%s2385_s21 + $0x250] sm:$0xff] }
  0x66   : > { %4785 = vst [vmem:[#allocation13_spill] sm:$0xff] %v2677_v43 }
  0x67   : > { %1356 = vperm.xlu1 %2109, %v982_v1   ;;  %1351 = vperm.xlu0 %2108, %v981_v3   ;;  %v2659_v1 = vld [vmem:[%s2385_s21 + $0x258] sm:$0xff]  ;;  %v2662_v3 = vld [vmem:[%s2385_s21 + $0x210] sm:$0xff]  ;;  %v351_v5 = vadd.f32 %v350_v48, %v2653_v47  ;;  %v375_v34 = vrot.slane %v374_v0, 2 }
  0x68   : > { %4783 = vst [vmem:[#allocation11_spill] sm:$0xff] %v2659_v1  ;;  %v408_v15 = vadd.f32 %v407_v50, %v2659_v1  ;;  %v386_v16 = vadd.f32 %v385_v58, %v2662_v3 }
  0x69   : > { %v352_v26 = vrot.slane %v351_v5, 4 }
  0x6a   : > { %v387_v58 = vadd.f32 %v386_v16, %v2677_v43  ;;  %v2715_v43 = vld [vmem:[%s2385_s21 + $0x2d0] sm:$0xff] }
  0x6b   : > { %1366 = vperm.xlu1 %2109, %v984_v37   ;;  %1361 = vperm.xlu0 %2108, %v983_v38   ;;  %v376_v37 = vadd.f32 %v375_v34, %v374_v0  ;;  %v2674_v38 = vld [vmem:[%s2385_s21 + $0x298] sm:$0xff]  ;;  %v353_v48 = vadd.f32 %v352_v26, %v351_v5  ;;  %v2691_v26 = vld [vmem:[%s2385_s21 + $0x290] sm:$0xff]  ;;  %v990_v5 = vld [vmem:[%s4593_s2 + $0x68] sm:$0xff]  ;;  %4790 = vst [vmem:[#allocation18_spill] sm:$0xff] %v2715_v43 }
  0x6c   : > { %4784 = vst [vmem:[#allocation12_spill] sm:$0xff] %v2674_v38  ;;  %v409_v1 = vadd.f32 %v408_v15, %v2674_v38  ;;  %v2712_v38 = vld [vmem:[%s2385_s21 + $0x318] sm:$0xff] }
  0x6d   : > { %v377_v50 = vrot.slane %v376_v37, 1  ;;  %v354_v34 = vrot.slane %v353_v48, 2  ;;  %4789 = vst [vmem:[#allocation17_spill] sm:$0xff] %v2712_v38 }
  0x6f   : > { %1376 = vperm.xlu1 %2109, %v986_v7   ;;  %1371 = vperm.xlu0 %2108, %v985_v12   ;;  %v378_v0 = vadd.f32 %v377_v50, %v376_v37  ;;  %v2688_v7 = vld [vmem:[%s2385_s21 + $0x2d8] sm:$0xff]  ;;  %v989_v12 = vld [vmem:[%s4593_s2 + $0x60] sm:$0xff]  ;;  %v388_v37 = vadd.f32 %v387_v58, %v2691_v26 }
  0x70   : > { %4786 = vst [vmem:[#allocation14_spill] sm:$0xff] %v2688_v7  ;;  %v410_v16 = vadd.f32 %v409_v1, %v2688_v7  ;;  %v992_v1 = vld [vmem:[%s4593_s2 + $0x78] sm:$0xff] }
  0x71   : > { %v2699_v15 = vmul.f32 0.0078125, %v378_v0  ;;  %v389_v58 = vadd.f32 %v388_v37, %v2715_v43  ;;  %v2738_v7 = vld [vmem:[%s2385_s21 + $0x358] sm:$0xff]  ;;  %v2761_v43 = vld [vmem:[%s2385_s21 + $0x350] sm:$0xff] }
  0x72   : > { %4793 = vst [vmem:[#allocation21_spill] sm:$0xff] %v2738_v7 }
  0x73   : > { %1386 = vperm.xlu1 %2109, %v988_v30   ;;  %1381 = vperm.xlu0 %2108, %v987_v53   ;;  %v2705_v50 = vsub.f32 %v2416_v9, %v2699_v15  ;;  %v2709_v53 = vsub.f32 %v2419_v10, %v2699_v15  ;;  %v355_v30 = vadd.f32 %v354_v34, %v353_v48  ;;  %v991_v9 = vld [vmem:[%s4593_s2 + $0x70] sm:$0xff] }
  0x74   : > { %v2725_v10 = vsub.f32 %v2422_v11, %v2699_v15  ;;  %v411_v48 = vadd.f32 %v410_v16, %v2712_v38  ;;  %v2731_v0 = vsub.f32 %v2427_v13, %v2699_v15  ;;  %v2741_v11 = vld [vmem:[%s2385_s21 + $0x310] sm:$0xff]  ;;  %v2745_v16 = vsub.f32 %v2437_v17, %v2699_v15  ;;  %v2758_v17 = vld [vmem:[%s2385_s21 + $0x398] sm:$0xff] }
  0x75   : > { %4787 = vst [vmem:[#allocation15_spill] sm:$0xff] %v2705_v50  ;;  %4788 = vst [vmem:[#allocation16_spill] sm:$0xff] %v2709_v53  ;;  %v642_v34 = vmul.f32 %v2705_v50, %v2705_v50  ;;  %v390_v50 = vadd.f32 %v389_v58, %v2741_v11 }
  0x76   : > { %4791 = vst [vmem:[#allocation19_spill] sm:$0xff] %v2725_v10  ;;  %4792 = vst [vmem:[#allocation20_spill] sm:$0xff] %v2731_v0  ;;  %v658_v13 = vmul.f32 %v2725_v10, %v2725_v10  ;;  %v412_v37 = vadd.f32 %v411_v48, %v2738_v7  ;;  %v2765_v48 = vsub.f32 %v2465_v28, %v2699_v15 }
  0x77   : > { %1396 = vperm.xlu1 %2109, %v990_v5   ;;  %1391 = vperm.xlu0 %2108, %v989_v12   ;;  %v650_v5 = vmul.f32 %v2709_v53, %v2709_v53  ;;  %v356_v12 = vrot.slane %v355_v30, 1  ;;  %4794 = vst [vmem:[#allocation22_spill] sm:$0xff] %v2745_v16  ;;  %v2753_v53 = vsub.f32 %v2450_v22, %v2699_v15 }
  0x78   : > { %4796 = vst [vmem:[#allocation24_spill] sm:$0xff] %v2765_v48  ;;  %v674_v58 = vmul.f32 %v2745_v16, %v2745_v16  ;;  %v413_v7 = vadd.f32 %v412_v37, %v2758_v17  ;;  %v391_v28 = vadd.f32 %v390_v50, %v2761_v43  ;;  %v2791_v37 = vld [vmem:[%s2385_s21 + $0x390] sm:$0xff]  ;;  %v2838_v16 = vld [vmem:[%s2385_s21 + $0x68] sm:$0xff] }
  0x79   : > { %4795 = vst [vmem:[#allocation23_spill] sm:$0xff] %v2753_v53  ;;  %v357_v38 = vadd.f32 %v356_v12, %v355_v30  ;;  %v682_v30 = vmul.f32 %v2753_v53, %v2753_v53  ;;  %v2779_v12 = vld [vmem:[%s2385_s21 + $0x3d8] sm:$0xff]  ;;  %4799 = vst [vmem:[#allocation27_spill] sm:$0xff] %v2791_v37 }
  0x7a   : > { %v392_v53 = vadd.f32 %v391_v28, %v2791_v37 }
  0x7b   : > { %1406 = vperm.xlu1 %2109, %v992_v1   ;;  %1401 = vperm.xlu0 %2108, %v991_v9   ;;  %v666_v1 = vmul.f32 %v2731_v0, %v2731_v0  ;;  %v790_v9 = vadd.f32 %v650_v5, %v642_v34  ;;  %v2769_v22 = vmul.f32 0.0078125, %v357_v38  ;;  %v2774_v34 = vsub.f32 %v2476_v33, %v2699_v15 }
  0x7c   : > { %v2795_v33 = vsub.f32 %v2498_v42, %v2699_v15 }
  0x7d   : > { %v791_v10 = vadd.f32 %v790_v9, %v658_v13  ;;  %4797 = vst [vmem:[#allocation25_spill] sm:$0xff] %v2774_v34  ;;  %v2784_v13 = vsub.f32 %v2441_v19, %v2769_v22  ;;  %v2788_v38 = vsub.f32 %v2444_v20, %v2769_v22  ;;  %v2801_v50 = vsub.f32 %v2447_v21, %v2769_v22 }
  0x7e   : > { %4800 = vst [vmem:[#allocation28_spill] sm:$0xff] %v2795_v33  ;;  %v414_v19 = vadd.f32 %v413_v7, %v2779_v12  ;;  %v2806_v20 = vsub.f32 %v2513_v49, %v2699_v15  ;;  %v698_v42 = vmul.f32 %v2774_v34, %v2774_v34  ;;  %v2824_v49 = vsub.f32 %v2531_v57, %v2699_v15 }
  0x7f   : > { %v792_v5 = vadd.f32 %v791_v10, %v666_v1  ;;  %4798 = vst [vmem:[#allocation26_spill] sm:$0xff] %v2788_v38  ;;  %v690_v10 = vmul.f32 %v2765_v48, %v2765_v48  ;;  %4801 = vst [vmem:[#allocation29_spill] sm:$0xff] %v2801_v50  ;;  %v641_v21 = vmul.f32 %v2784_v13, %v2784_v13  ;;  %v2835_v48 = vld [vmem:[%s2385_s21 + $0x28] sm:$0xff] }
  0x80   : > { %4802 = vst [vmem:[#allocation30_spill] sm:$0xff] %v2806_v20  ;;  %v649_v7 = vmul.f32 %v2788_v38, %v2788_v38  ;;  %4803 = vst [vmem:[#allocation31_spill] sm:$0xff] %v2824_v49  ;;  %v415_v34 = vrot.slane %v414_v19, 4  ;;  %v2842_v57 = vsub.f32 %v2551_v2, %v2699_v15  ;;  %v2855_v38 = vsub.f32 %v2569_v14, %v2699_v15 }
  0x81   : > { %v793_v1 = vadd.f32 %v792_v5, %v674_v58  ;;  %v2813_v58 = vsub.f32 %v2462_v27, %v2769_v22  ;;  %v2820_v5 = vld [vmem:[%s2385_s21 + $0x3d0] sm:$0xff]  ;;  %v2830_v27 = vsub.f32 %v2473_v32, %v2769_v22  ;;  %v722_v2 = vmul.f32 %v2824_v49, %v2824_v49 }
  0x82   : > { %4804 = vst [vmem:[#allocation32_spill] sm:$0xff] %v2842_v57  ;;  %v393_v32 = vadd.f32 %v392_v53, %v2820_v5  ;;  %4805 = vst [vmem:[#allocation33_spill] sm:$0xff] %v2855_v38  ;;  %v2863_v53 = vsub.f32 %v2506_v46, %v2769_v22  ;;  %v2872_v14 = vsub.f32 %v2585_v29, %v2699_v15 }
  0x83   : > { %v794_v9 = vadd.f32 %v793_v1, %v682_v30  ;;  %v706_v30 = vmul.f32 %v2795_v33, %v2795_v33  ;;  %v657_v1 = vmul.f32 %v2801_v50, %v2801_v50  ;;  %v2849_v33 = vsub.f32 %v2490_v39, %v2769_v22 }
  0x84   : > { %v665_v0 = vmul.f32 %v2813_v58, %v2813_v58  ;;  %v769_v50 = vadd.f32 %v649_v7, %v641_v21  ;;  %v673_v39 = vmul.f32 %v2830_v27, %v2830_v27  ;;  %v416_v21 = vadd.f32 %v415_v34, %v414_v19  ;;  %v2868_v7 = vld [vmem:[%s2385_s21 + $0xa8] sm:$0xff]  ;;  %4806 = vst [vmem:[#allocation34_spill] sm:$0xff] %v2872_v14 }
  0x85   : > { %v795_v28 = vadd.f32 %v794_v9, %v690_v10  ;;  %v714_v10 = vmul.f32 %v2806_v20, %v2806_v20  ;;  %v394_v49 = vrot.slane %v393_v32, 4  ;;  %v2878_v46 = vsub.f32 %v2524_v54, %v2769_v22 }
  0x86   : > { %v2884_v19 = vsub.f32 %v2603_v45, %v2699_v15  ;;  %v738_v29 = vmul.f32 %v2855_v38, %v2855_v38  ;;  %v689_v54 = vmul.f32 %v2863_v53, %v2863_v53  ;;  %v417_v20 = vrot.slane %v416_v21, 2  ;;  %v2938_v38 = vld [vmem:[%s2385_s21 + $0x168] sm:$0xff] }
  0x87   : > { %v796_v9 = vadd.f32 %v795_v28, %v698_v42  ;;  %v442_v42 = vadd.f32 %v2838_v16, %v2835_v48  ;;  %v770_v28 = vadd.f32 %v769_v50, %v657_v1  ;;  %v681_v50 = vmul.f32 %v2849_v33, %v2849_v33 }
  0x88   : > { %v746_v45 = vmul.f32 %v2872_v14, %v2872_v14  ;;  %v2922_v14 = vld [vmem:[%s2385_s21 + $0x128] sm:$0xff] }
  0x89   : > { %v797_v37 = vadd.f32 %v796_v9, %v706_v30  ;;  %v730_v30 = vmul.f32 %v2842_v57, %v2842_v57  ;;  %v771_v34 = vadd.f32 %v770_v28, %v665_v0  ;;  %v2897_v0 = vsub.f32 %v2619_v61, %v2699_v15 }
  0x8a   : > { %v754_v61 = vmul.f32 %v2884_v19, %v2884_v19 }
  0x8b   : > { %v798_v9 = vadd.f32 %v797_v37, %v714_v10  ;;  %v443_v37 = vadd.f32 %v442_v42, %v2868_v7  ;;  %v2891_v10 = vsub.f32 %v2542_v62, %v2769_v22  ;;  %v772_v57 = vadd.f32 %v771_v34, %v673_v39  ;;  %v2902_v42 = vld [vmem:[%s2385_s21 + $0xe8] sm:$0xff] }
  0x8c   : > { %v2906_v62 = vsub.f32 %v2565_v8, %v2769_v22  ;;  %v697_v39 = vmul.f32 %v2878_v46, %v2878_v46  ;;  %v2914_v34 = vsub.f32 %v2578_v24, %v2769_v22  ;;  %v762_v8 = vmul.f32 %v2897_v0, %v2897_v0 }
  0x8d   : > { %v799_v1 = vadd.f32 %v798_v9, %v722_v2  ;;  %v395_v2 = vadd.f32 %v394_v49, %v393_v32  ;;  %v773_v9 = vadd.f32 %v772_v57, %v681_v50  ;;  %v705_v49 = vmul.f32 %v2891_v10, %v2891_v10 }
  0x8e   : > { %4807 = vst [vmem:[#allocation35_spill] sm:$0xff] %v2906_v62  ;;  %4808 = vst [vmem:[#allocation36_spill] sm:$0xff] %v2914_v34  ;;  %v418_v57 = vadd.f32 %v417_v20, %v416_v21  ;;  %v713_v24 = vmul.f32 %v2906_v62, %v2906_v62  ;;  %v721_v20 = vmul.f32 %v2914_v34, %v2914_v34  ;;  %v2987_v34 = vld [vmem:[%s2385_s21 + $0xe0] sm:$0xff] }
  0x8f   : > { %v800_v28 = vadd.f32 %v799_v1, %v730_v30  ;;  %v774_v32 = vadd.f32 %v773_v9, %v689_v54  ;;  %v444_v30 = vadd.f32 %v443_v37, %v2902_v42  ;;  %v396_v50 = vrot.slane %v395_v2, 2  ;;  %4812 = vst [vmem:[#allocation40_spill] sm:$0xff] %v2987_v34 }
  0x91   : > { %v801_v15 = vadd.f32 %v800_v28, %v738_v29  ;;  %v2926_v29 = vsub.f32 %v2599_v41, %v2769_v22  ;;  %v775_v54 = vadd.f32 %v774_v32, %v697_v39  ;;  %v2932_v28 = vsub.f32 %v2609_v52, %v2769_v22 }
  0x92   : > { %v419_v41 = vrot.slane %v418_v57, 1  ;;  %v2942_v39 = vsub.f32 %v2630_v6, %v2769_v22 }
  0x93   : > { %v802_v1 = vadd.f32 %v801_v15, %v746_v45  ;;  %4809 = vst [vmem:[#allocation37_spill] sm:$0xff] %v2926_v29  ;;  %4810 = vst [vmem:[#allocation38_spill] sm:$0xff] %v2932_v28  ;;  %v776_v21 = vadd.f32 %v775_v54, %v705_v49  ;;  %v445_v45 = vadd.f32 %v444_v30, %v2922_v14  ;;  %v2947_v49 = vld [vmem:[%s2385_s21 + $0x20] sm:$0xff] }
  0x94   : > { %v397_v15 = vadd.f32 %v396_v50, %v395_v2  ;;  %4811 = vst [vmem:[#allocation39_spill] sm:$0xff] %v2942_v39  ;;  %v729_v52 = vmul.f32 %v2926_v29, %v2926_v29  ;;  %v2950_v30 = vld [vmem:[%s2385_s21 + $0x60] sm:$0xff]  ;;  %v2954_v2 = vsub.f32 %v2637_v23, %v2769_v22  ;;  %v745_v29 = vmul.f32 %v2942_v39, %v2942_v39 }
  0x95   : > { %v803_v37 = vadd.f32 %v802_v1, %v754_v61  ;;  %v777_v61 = vadd.f32 %v776_v21, %v713_v24  ;;  %v446_v50 = vadd.f32 %v445_v45, %v2938_v38  ;;  %v420_v24 = vadd.f32 %v419_v41, %v418_v57  ;;  %v2971_v45 = vld [vmem:[%s2385_s21 + $0xa0] sm:$0xff] }
  0x96   : > { %v398_v1 = vrot.slane %v397_v15, 1  ;;  %v2964_v21 = vsub.f32 %v2653_v47, %v2769_v22  ;;  %v753_v57 = vmul.f32 %v2954_v2, %v2954_v2 }
  0x97   : > { %v804_v9 = vadd.f32 %v803_v37, %v762_v8  ;;  %v737_v8 = vmul.f32 %v2932_v28, %v2932_v28  ;;  %v778_v6 = vadd.f32 %v777_v61, %v721_v20  ;;  %v2960_v37 = vld [vmem:[%s2385_s21 + $0x1a8] sm:$0xff]  ;;  %v421_v28 = vadd.f32 %v2950_v30, %v2947_v49 }
  0x98   : > { %v399_v61 = vadd.f32 %v398_v1, %v397_v15  ;;  %v447_v47 = vadd.f32 %v446_v50, %v2960_v37  ;;  %v2976_v41 = vmul.f32 0.0078125, %v420_v24 }
  0x99   : > { %v805_v32 = vrot.slane %v804_v9, 4  ;;  %v779_v23 = vadd.f32 %v778_v6, %v729_v52  ;;  %v761_v52 = vmul.f32 %v2964_v21, %v2964_v21  ;;  %v422_v15 = vadd.f32 %v421_v28, %v2971_v45 }
  0x9a   : > { %v2984_v39 = vmul.f32 0.0078125, %v399_v61  ;;  %v2992_v24 = vsub.f32 %v2480_v35, %v2976_v41  ;;  %v3011_v35 = vld [vmem:[%s2385_s21 + $0x120] sm:$0xff] }
  0x9b   : > { %v806_v54 = vadd.f32 %v805_v32, %v804_v9  ;;  %v780_v9 = vadd.f32 %v779_v23, %v737_v8  ;;  %v2979_v32 = vld [vmem:[%s2385_s21 + $0x1e8] sm:$0xff]  ;;  %4817 = vst [vmem:[#allocation45_spill] sm:$0xff] %v3011_v35 }
  0x9c   : > { %v448_v50 = vadd.f32 %v447_v47, %v2979_v32  ;;  %4813 = vst [vmem:[#allocation41_spill] sm:$0xff] %v2992_v24  ;;  %v2999_v23 = vld [vmem:[%s2385_s21 + $0x228] sm:$0xff]  ;;  %v3397_v62 = vsub.f32 %v2820_v5, %v2984_v39 }
  0x9d   : > { %v807_v20 = vrot.slane %v806_v54, 2  ;;  %v781_v6 = vadd.f32 %v780_v9, %v745_v29  ;;  %v2996_v29 = vsub.f32 %v2483_v36, %v2976_v41  ;;  %v3008_v9 = vsub.f32 %v2535_v59, %v2984_v39 }
  0x9e   : > { %v449_v36 = vadd.f32 %v448_v50, %v2999_v23 }
  0x9f   : > { %v808_v22 = vadd.f32 %v807_v20, %v806_v54  ;;  %v782_v8 = vadd.f32 %v781_v6, %v753_v57  ;;  %4814 = vst [vmem:[#allocation42_spill] sm:$0xff] %v2996_v29  ;;  %v423_v20 = vadd.f32 %v422_v15, %v2987_v34  ;;  %v3004_v57 = vsub.f32 %v2528_v56, %v2984_v39  ;;  %v3023_v6 = vld [vmem:[%s2385_s21 + $0x268] sm:$0xff] }
  0xa0   : > { %4816 = vst [vmem:[#allocation44_spill] sm:$0xff] %v3008_v9  ;;  %v652_v56 = vmul.f32 %v2996_v29, %v2996_v29  ;;  %v651_v50 = vmul.f32 %v3008_v9, %v3008_v9 }
  0xa1   : > { %v809_v1 = vrot.slane %v808_v22, 1  ;;  %v783_v28 = vadd.f32 %v782_v8, %v761_v52  ;;  %4815 = vst [vmem:[#allocation43_spill] sm:$0xff] %v3004_v57  ;;  %v644_v52 = vmul.f32 %v2992_v24, %v2992_v24  ;;  %v424_v15 = vadd.f32 %v423_v20, %v3011_v35  ;;  %v3055_v35 = vld [vmem:[%s2385_s21 + $0x1a0] sm:$0xff] }
  0xa2   : > { %v3028_v8 = vsub.f32 %v2538_v60, %v2984_v39  ;;  %v3040_v20 = vsub.f32 %v2502_v44, %v2976_v41  ;;  %v3050_v24 = vsub.f32 %v2555_v4, %v2984_v39  ;;  %4823 = vst [vmem:[#allocation51_spill] sm:$0xff] %v3055_v35 }
  0xa3   : > { %v810_v54 = vadd.f32 %v809_v1, %v808_v22  ;;  %v784_v47 = vrot.slane %v783_v28, 4  ;;  %v3016_v22 = vsub.f32 %v2493_v40, %v2976_v41  ;;  %v643_v40 = vmul.f32 %v3004_v57, %v3004_v57 }
  0xa4   : > { %4819 = vst [vmem:[#allocation47_spill] sm:$0xff] %v3028_v8  ;;  %4821 = vst [vmem:[#allocation49_spill] sm:$0xff] %v3040_v20  ;;  %v668_v4 = vmul.f32 %v3040_v20, %v3040_v20 }
  0xa5   : > { %v938_v61 = vmul.f32 0.0078125, %v810_v54  ;;  %4818 = vst [vmem:[#allocation46_spill] sm:$0xff] %v3016_v22  ;;  %v785_v59 = vadd.f32 %v784_v47, %v783_v28  ;;  %v3035_v54 = vld [vmem:[%s2385_s21 + $0x160] sm:$0xff]  ;;  %v450_v28 = vadd.f32 %v449_v36, %v3023_v6  ;;  %v660_v60 = vmul.f32 %v3016_v22, %v3016_v22  ;;  %v3045_v47 = vld [vmem:[%s2385_s21 + $0x2a8] sm:$0xff]  ;;  %4822 = vst [vmem:[#allocation50_spill] sm:$0xff] %v3050_v24 }
  0xa6   : > { %4820 = vst [vmem:[#allocation48_spill] sm:$0xff] %v3035_v54  ;;  %v425_v9 = vadd.f32 %v424_v15, %v3035_v54  ;;  %v659_v36 = vmul.f32 %v3028_v8, %v3028_v8  ;;  %v811_v44 = vadd.f32 %v651_v50, %v643_v40  ;;  %v3066_v15 = vsub.f32 %v2517_v51, %v2976_v41  ;;  %v3071_v40 = vld [vmem:[%s2385_s21 + $0x2e8] sm:$0xff]  ;;  %v3083_v54 = vld [vmem:[%s2385_s21 + $0x1e0] sm:$0xff] }
  0xa7   : > { %v946_v1 = vadd.f32 1e-05, %v938_v61  ;;  %v786_v29 = vrot.slane %v785_v59, 2  ;;  %v832_v61 = vadd.f32 %v652_v56, %v644_v52  ;;  %v3058_v52 = vld [vmem:[%s2385_s21 + $0x38] sm:$0xff]  ;;  %4827 = vst [vmem:[#allocation55_spill] sm:$0xff] %v3071_v40  ;;  %v667_v51 = vmul.f32 %v3050_v24, %v3050_v24  ;;  %4829 = vst [vmem:[#allocation57_spill] sm:$0xff] %v3083_v54 }
  0xa8   : > { %4824 = vst [vmem:[#allocation52_spill] sm:$0xff] %v3058_v52  ;;  %v3061_v56 = vld [vmem:[%s2385_s21 + $0x78] sm:$0xff]  ;;  %4826 = vst [vmem:[#allocation54_spill] sm:$0xff] %v3066_v15  ;;  %v426_v8 = vadd.f32 %v425_v9, %v3055_v35  ;;  %v812_v20 = vadd.f32 %v811_v44, %v659_v36  ;;  %v3224_v35 = vld [vmem:[%s2385_s21 + $0x320] sm:$0xff] }
  0xa9   : > { %v787_v57 = vadd.f32 %v786_v29, %v785_v59  ;;  %2110 = vrsqrt.f32 %v946_v1  ;;  %4825 = vst [vmem:[#allocation53_spill] sm:$0xff] %v3061_v56  ;;  %v451_v59 = vadd.f32 %v450_v28, %v3045_v47  ;;  %v833_v1 = vadd.f32 %v832_v61, %v660_v60  ;;  %v3086_v60 = vld [vmem:[%s2385_s21 + $0xb8] sm:$0xff]  ;;  %4861 = vst [vmem:[#allocation79_spill] sm:$0xff] %v3224_v35 }
  0xaa   : > { %v484_v22 = vadd.f32 %v3061_v56, %v3058_v52  ;;  %v3078_v28 = vsub.f32 %v2574_v18, %v2984_v39  ;;  %4830 = vst [vmem:[#allocation58_spill] sm:$0xff] %v3086_v60  ;;  %v3091_v61 = vsub.f32 %v2545_v63, %v2976_v41  ;;  %v676_v18 = vmul.f32 %v3066_v15, %v3066_v15  ;;  %v3096_v56 = vld [vmem:[%s2385_s21 + $0x328] sm:$0xff]  ;;  %v3110_v15 = vld [vmem:[%s2385_s21 + $0xf8] sm:$0xff] }
  0xab   : > { %v788_v29 = vrot.slane %v787_v57, 1  ;;  %4832 = vst [vmem:[#allocation60_spill] sm:$0xff] %v3096_v56  ;;  %v427_v36 = vadd.f32 %v426_v8, %v3083_v54  ;;  %v3102_v52 = vsub.f32 %v2589_v31, %v2984_v39  ;;  %v813_v63 = vadd.f32 %v812_v20, %v667_v51  ;;  %4835 = vst [vmem:[#allocation63_spill] sm:$0xff] %v3110_v15  ;;  %v3122_v20 = vld [vmem:[%s2385_s21 + $0x368] sm:$0xff] }
  0xac   : > { %4828 = vst [vmem:[#allocation56_spill] sm:$0xff] %v3078_v28  ;;  %4831 = vst [vmem:[#allocation59_spill] sm:$0xff] %v3091_v61  ;;  %v485_v44 = vadd.f32 %v484_v22, %v3086_v60  ;;  %v3117_v22 = vsub.f32 %v2581_v25, %v2976_v41  ;;  %v684_v31 = vmul.f32 %v3091_v61, %v3091_v61  ;;  %v3144_v61 = vld [vmem:[%s2385_s21 + $0x138] sm:$0xff] }
  0xad   : > { %v789_v50 = vadd.f32 %v788_v29, %v787_v57  ;;  %v452_v57 = vadd.f32 %v451_v59, %v3071_v40  ;;  %v834_v29 = vadd.f32 %v833_v1, %v668_v4  ;;  %4833 = vst [vmem:[#allocation61_spill] sm:$0xff] %v3102_v52  ;;  %v675_v59 = vmul.f32 %v3078_v28, %v3078_v28 }
  0xae   : > { %4836 = vst [vmem:[#allocation64_spill] sm:$0xff] %v3117_v22  ;;  %4837 = vst [vmem:[#allocation65_spill] sm:$0xff] %v3122_v20  ;;  %v486_v25 = vadd.f32 %v485_v44, %v3110_v15  ;;  %v3136_v28 = vsub.f32 %v2615_v55, %v2984_v39  ;;  %v4844_v55 = vld [vmem:[#allocation8_spill] sm:$0xff]  ;;  %v3158_v15 = vld [vmem:[%s2385_s21 + $0x3a8] sm:$0xff]  ;;  %v3192_v40 = vsub.f32 %v2662_v3, %v2984_v39 }
  0xaf   : > { %v937_v9 = vmul.f32 0.0078125, %v789_v50  ;;  %v3107_v50 = vld [vmem:[%s2385_s21 + $0x220] sm:$0xff]  ;;  %v453_v4 = vadd.f32 %v452_v57, %v3096_v56  ;;  %v835_v60 = vadd.f32 %v834_v29, %v676_v18  ;;  %v683_v18 = vmul.f32 %v3102_v52, %v3102_v52  ;;  %4842 = vst [vmem:[#allocation70_spill] sm:$0xff] %v3144_v61  ;;  %4846 = vst [vmem:[#allocation72_spill] sm:$0xff] %v3158_v15 }
  0xb0   : > { %4834 = vst [vmem:[#allocation62_spill] sm:$0xff] %v3107_v50  ;;  %4840 = vst [vmem:[#allocation68_spill] sm:$0xff] %v3136_v28  ;;  %v814_v29 = vadd.f32 %v813_v63, %v675_v59  ;;  %v3153_v44 = vsub.f32 %v4844_v55, %v2976_v41  ;;  %v692_v59 = vmul.f32 %v3117_v22, %v3117_v22  ;;  %v3172_v22 = vld [vmem:[%s2385_s21 + $0x178] sm:$0xff] }
  0xb1   : > { %v945_v8 = vadd.f32 1e-05, %v937_v9  ;;  %v428_v9 = vadd.f32 %v427_v36, %v3107_v50  ;;  %v836_v63 = vadd.f32 %v835_v60, %v684_v31  ;;  %4850 = vst [vmem:[#allocation74_spill] sm:$0xff] %v3172_v22  ;;  %4854 = vst [vmem:[#allocation76_spill] sm:$0xff] %v3192_v40 }
  0xb2   : > { %4845 = vst [vmem:[#allocation8_spill] sm:$0xff] %v3153_v44  ;;  %v815_v55 = vadd.f32 %v814_v29, %v683_v18  ;;  %v3186_v18 = vld [vmem:[%s2385_s21 + $0x3e8] sm:$0xff] }
  0xb3   : > { %v3113_v1 = vpop.eup %2110  ;;  %2112 = vrsqrt.f32 %v945_v8  ;;  %v691_v8 = vmul.f32 %v3136_v28, %v3136_v28  ;;  %4853 = vst [vmem:[#allocation75_spill] sm:$0xff] %v3186_v18 }
  0xb4   : > { %v3126_v51 = vmul.f32 %v3113_v1, %v2884_v19  ;;  %v3130_v57 = vmul.f32 %v3113_v1, %v2897_v0  ;;  %v3141_v19 = vld [vmem:[%s2385_s21 + $0x260] sm:$0xff]  ;;  %v454_v0 = vadd.f32 %v453_v4, %v3122_v20  ;;  %v487_v4 = vadd.f32 %v486_v25, %v3144_v61 }
  0xb5   : > { %4841 = vst [vmem:[#allocation69_spill] sm:$0xff] %v3141_v19  ;;  %v429_v52 = vadd.f32 %v428_v9, %v3141_v19  ;;  %v4851_v9 = vld [vmem:[#allocation9_spill] sm:$0xff]  ;;  %v837_v61 = vadd.f32 %v836_v63, %v692_v59  ;;  %v816_v19 = vadd.f32 %v815_v55, %v691_v8  ;;  %v3200_v59 = vld [vmem:[%s2385_s21 + $0x1b8] sm:$0xff] }
  0xb6   : > { %4838 = vst [vmem:[#allocation66_spill] sm:$0xff] %v3126_v51  ;;  %4839 = vst [vmem:[#allocation67_spill] sm:$0xff] %v3130_v57  ;;  %v4847_v57 = vld [vmem:[#allocation10_spill] sm:$0xff]  ;;  %v3169_v51 = vld [vmem:[%s2385_s21 + $0x2a0] sm:$0xff]  ;;  %v3180_v25 = vsub.f32 %v4851_v9, %v2976_v41  ;;  %v455_v28 = vadd.f32 %v454_v0, %v3158_v15  ;;  %v488_v56 = vadd.f32 %v487_v4, %v3172_v22 }
  0xb7   : > { %v3164_v20 = vsub.f32 %v4847_v57, %v2984_v39  ;;  %4849 = vst [vmem:[#allocation73_spill] sm:$0xff] %v3169_v51  ;;  %v700_v57 = vmul.f32 %v3153_v44, %v3153_v44  ;;  %v430_v29 = vadd.f32 %v429_v52, %v3169_v51  ;;  %v3197_v44 = vld [vmem:[%s2385_s21 + $0x2e0] sm:$0xff]  ;;  %4856 = vst [vmem:[#allocation78_spill] sm:$0xff] %v3200_v59  ;;  %v4857_v52 = vld [vmem:[#allocation11_spill] sm:$0xff] }
  0xb8   : > { %4852 = vst [vmem:[#allocation9_spill] sm:$0xff] %v3180_v25  ;;  %4855 = vst [vmem:[#allocation77_spill] sm:$0xff] %v3197_v44  ;;  %v3208_v4 = vsub.f32 %v4857_v52, %v2976_v41  ;;  %v708_v3 = vmul.f32 %v3180_v25, %v3180_v25  ;;  %v489_v55 = vadd.f32 %v488_v56, %v3200_v59  ;;  %v4859_v51 = vld [vmem:[#allocation13_spill] sm:$0xff] }
  0xb9   : > { %4848 = vst [vmem:[#allocation10_spill] sm:$0xff] %v3164_v20  ;;  %v699_v9 = vmul.f32 %v3164_v20, %v3164_v20  ;;  %v838_v22 = vadd.f32 %v837_v61, %v700_v57  ;;  %v456_v20 = vadd.f32 %v455_v28, %v3186_v18  ;;  %v431_v8 = vadd.f32 %v430_v29, %v3197_v44  ;;  %v3227_v61 = vld [vmem:[%s2385_s21 + $0x1f8] sm:$0xff]  ;;  %v4875_v44 = vld [vmem:[#allocation18_spill] sm:$0xff] }
  0xba   : > { %4858 = vst [vmem:[#allocation11_spill] sm:$0xff] %v3208_v4  ;;  %v3219_v50 = vsub.f32 %v4859_v51, %v2984_v39  ;;  %v707_v52 = vmul.f32 %v3192_v40, %v3192_v40  ;;  %4862 = vst [vmem:[#allocation80_spill] sm:$0xff] %v3227_v61  ;;  %v3251_v25 = vsub.f32 %v2691_v26, %v2984_v39 }
  0xbb   : > { %v817_v54 = vadd.f32 %v816_v19, %v699_v9  ;;  %v4865_v19 = vld [vmem:[#allocation12_spill] sm:$0xff]  ;;  %v716_v9 = vmul.f32 %v3208_v4, %v3208_v4  ;;  %v839_v59 = vadd.f32 %v838_v22, %v708_v3  ;;  %v432_v40 = vadd.f32 %v431_v8, %v3224_v35  ;;  %v3259_v4 = vld [vmem:[%s2385_s21 + $0x238] sm:$0xff]  ;;  %v4871_v8 = vld [vmem:[#allocation14_spill] sm:$0xff] }
  0xbc   : > { %4860 = vst [vmem:[#allocation13_spill] sm:$0xff] %v3219_v50  ;;  %v3243_v29 = vsub.f32 %v4865_v19, %v2976_v41  ;;  %4867 = vst [vmem:[#allocation83_spill] sm:$0xff] %v3251_v25  ;;  %v715_v18 = vmul.f32 %v3219_v50, %v3219_v50 }
  0xbd   : > { %v3215_v15 = vpop.eup %2112  ;;  %v818_v19 = vadd.f32 %v817_v54, %v707_v52  ;;  %4869 = vst [vmem:[#allocation85_spill] sm:$0xff] %v3259_v4  ;;  %v3272_v54 = vld [vmem:[%s2385_s21 + $0x30] sm:$0xff] }
  0xbe   : > { %v3147_v24 = vpop.permute.xlu1 %1133  ;;  %v3149_v36 = vpop.permute.xlu0 %1123  ;;  %v3231_v28 = vmul.f32 %v3215_v15, %v2954_v2  ;;  %v3235_v56 = vmul.f32 %v3215_v15, %v2964_v21  ;;  %4866 = vst [vmem:[#allocation12_spill] sm:$0xff] %v3243_v29  ;;  %v457_v2 = vrot.slane %v456_v20, 4  ;;  %v490_v21 = vadd.f32 %v489_v55, %v3227_v61  ;;  %4873 = vst [vmem:[#allocation87_spill] sm:$0xff] %v3272_v54  ;;  %v3275_v52 = vld [vmem:[%s2385_s21 + $0x70] sm:$0xff] }
  0xbf   : > { %4843 = vst [vmem:[#allocation71_spill] sm:$0xff] %v3149_v36  ;;  %v3267_v55 = vsub.f32 %v4871_v8, %v2976_v41  ;;  %v724_v26 = vmul.f32 %v3243_v29, %v3243_v29  ;;  %v840_v61 = vadd.f32 %v839_v59, %v716_v9  ;;  %4874 = vst [vmem:[#allocation88_spill] sm:$0xff] %v3275_v52  ;;  %v3286_v59 = vld [vmem:[%s2385_s21 + $0x3a0] sm:$0xff] }
  0xc0   : > { %4863 = vst [vmem:[#allocation81_spill] sm:$0xff] %v3231_v28  ;;  %4864 = vst [vmem:[#allocation82_spill] sm:$0xff] %v3235_v56  ;;  %v3256_v56 = vld [vmem:[%s2385_s21 + $0x360] sm:$0xff]  ;;  %v458_v50 = vadd.f32 %v457_v2, %v456_v20  ;;  %v491_v35 = vadd.f32 %v490_v21, %v3259_v4  ;;  %v723_v8 = vmul.f32 %v3251_v25, %v3251_v25  ;;  %v3289_v20 = vld [vmem:[%s2385_s21 + $0x278] sm:$0xff] }
  0xc1   : > { %4868 = vst [vmem:[#allocation84_spill] sm:$0xff] %v3256_v56  ;;  %4872 = vst [vmem:[#allocation14_spill] sm:$0xff] %v3267_v55  ;;  %v433_v28 = vadd.f32 %v432_v40, %v3256_v56  ;;  %v819_v34 = vadd.f32 %v818_v19, %v715_v18  ;;  %v463_v9 = vadd.f32 %v3275_v52, %v3272_v54  ;;  %v3304_v25 = vld [vmem:[%s2385_s21 + $0xb0] sm:$0xff] }
  0xc2   : > { %v3174_v60 = vpop.permute.xlu1 %1138  ;;  %v3176_v31 = vpop.permute.xlu0 %1128  ;;  %4877 = vst [vmem:[#allocation89_spill] sm:$0xff] %v3286_v59  ;;  %4878 = vst [vmem:[#allocation90_spill] sm:$0xff] %v3289_v20  ;;  %v732_v18 = vmul.f32 %v3267_v55, %v3267_v55  ;;  %v841_v19 = vadd.f32 %v840_v61, %v724_v26  ;;  %v459_v4 = vrot.slane %v458_v50, 2  ;;  %v492_v52 = vadd.f32 %v491_v35, %v3289_v20  ;;  %v3318_v61 = vld [vmem:[%s2385_s21 + $0x2b8] sm:$0xff]  ;;  %v4889_v35 = vld [vmem:[#allocation21_spill] sm:$0xff] }
  0xc3   : > { %4883 = vst [vmem:[#allocation93_spill] sm:$0xff] %v3304_v25  ;;  %v434_v29 = vadd.f32 %v433_v28, %v3286_v59  ;;  %v3310_v54 = vsub.f32 %v2741_v11, %v2984_v39  ;;  %v820_v56 = vadd.f32 %v819_v34, %v723_v8  ;;  %4886 = vst [vmem:[#allocation96_spill] sm:$0xff] %v3318_v61 }
  0xc4   : > { %v464_v26 = vadd.f32 %v463_v9, %v3304_v25  ;;  %v3327_v20 = vsub.f32 %v4889_v35, %v2976_v41  ;;  %v460_v34 = vadd.f32 %v459_v4, %v458_v50  ;;  %v493_v59 = vadd.f32 %v492_v52, %v3318_v61 }
  0xc5   : > { %4884 = vst [vmem:[#allocation94_spill] sm:$0xff] %v3310_v54  ;;  %v3338_v9 = vsub.f32 %v2761_v43, %v2984_v39  ;;  %v739_v35 = vmul.f32 %v3310_v54, %v3310_v54  ;;  %v993_v4 = vmul.f32 %v3215_v15, %v2784_v13  ;;  %v3362_v54 = vld [vmem:[%s2385_s21 + $0x130] sm:$0xff]  ;;  %v4898_v13 = vld [vmem:[#allocation27_spill] sm:$0xff] }
  0xc6   : > { %v3202_v0 = vpop.permute.xlu1 %1148  ;;  %v3204_v63 = vpop.permute.xlu0 %1143  ;;  %4890 = vst [vmem:[#allocation21_spill] sm:$0xff] %v3327_v20 }
  0xc7   : > { %4892 = vst [vmem:[#allocation100_spill] sm:$0xff] %v3338_v9 }
  0xca   : > { %v3237_v51 = vpop.permute.xlu1 %1158  ;;  %v3239_v57 = vpop.permute.xlu0 %1153 }
  0xce   : > { %v3261_v22 = vpop.permute.xlu1 %1168  ;;  %v3263_v3 = vpop.permute.xlu0 %1163 }
  0xcf   : > { %4870 = vst [vmem:[#allocation86_spill] sm:$0xff] %v3261_v22  ;;  %v3281_v22 = vsub.f32 %v4875_v44, %v2984_v39  ;;  %v4881_v44 = vld [vmem:[#allocation17_spill] sm:$0xff] }
  0xd0   : > { %v3299_v21 = vsub.f32 %v4881_v44, %v2976_v41 }
  0xd1   : > { %4876 = vst [vmem:[#allocation18_spill] sm:$0xff] %v3281_v22  ;;  %v731_v44 = vmul.f32 %v3281_v22, %v3281_v22  ;;  %v842_v22 = vadd.f32 %v841_v19, %v732_v18  ;;  %v461_v19 = vrot.slane %v460_v34, 1 }
  0xd2   : > { %v3293_v40 = vpop.permute.xlu1 %1178  ;;  %v3295_v2 = vpop.permute.xlu0 %1173  ;;  %4882 = vst [vmem:[#allocation17_spill] sm:$0xff] %v3299_v21  ;;  %v740_v11 = vmul.f32 %v3299_v21, %v3299_v21  ;;  %v4894_v21 = vld [vmem:[#allocation15_spill] sm:$0xff] }
  0xd3   : > { %4879 = vst [vmem:[#allocation91_spill] sm:$0xff] %v3293_v40  ;;  %4880 = vst [vmem:[#allocation92_spill] sm:$0xff] %v3295_v2  ;;  %v3315_v40 = vld [vmem:[%s2385_s21 + $0x3e0] sm:$0xff]  ;;  %v3334_v2 = vld [vmem:[%s2385_s21 + $0xf0] sm:$0xff]  ;;  %v821_v25 = vadd.f32 %v820_v56, %v731_v44  ;;  %v994_v50 = vmul.f32 %v3113_v1, %v4894_v21  ;;  %v748_v56 = vmul.f32 %v3327_v20, %v3327_v20 }
  0xd4   : > { %4885 = vst [vmem:[#allocation95_spill] sm:$0xff] %v3315_v40  ;;  %v435_v8 = vadd.f32 %v434_v29, %v3315_v40  ;;  %4891 = vst [vmem:[#allocation99_spill] sm:$0xff] %v3334_v2  ;;  %v3351_v29 = vsub.f32 %v2758_v17, %v2976_v41  ;;  %v843_v18 = vadd.f32 %v842_v22, %v740_v11  ;;  %v3375_v11 = vld [vmem:[%s2385_s21 + $0x338] sm:$0xff] }
  0xd5   : > { %v465_v44 = vadd.f32 %v464_v26, %v3334_v2  ;;  %v3366_v17 = vsub.f32 %v2779_v12, %v2976_v41  ;;  %v3370_v40 = vsub.f32 %v4898_v13, %v2984_v39  ;;  %v747_v20 = vmul.f32 %v3338_v9, %v3338_v9  ;;  %4899 = vst [vmem:[#allocation27_spill] sm:$0xff] %v3375_v11 }
  0xd6   : > { %v3321_v55 = vpop.permute.xlu1 %1188  ;;  %v3323_v28 = vpop.permute.xlu0 %1183  ;;  %v436_v21 = vrot.slane %v435_v8, 4  ;;  %v822_v22 = vadd.f32 %v821_v25, %v739_v35  ;;  %v1202_v26 = vmul.f32 %v3149_v36, %v994_v50  ;;  %v756_v13 = vmul.f32 %v3351_v29, %v3351_v29 }
  0xd7   : > { %4887 = vst [vmem:[#allocation97_spill] sm:$0xff] %v3321_v55  ;;  %4888 = vst [vmem:[#allocation98_spill] sm:$0xff] %v3323_v28  ;;  %v3343_v55 = vld [vmem:[%s2385_s21 + $0x2f8] sm:$0xff]  ;;  %v844_v25 = vadd.f32 %v843_v18, %v748_v56  ;;  %v462_v35 = vadd.f32 %v461_v19, %v460_v34  ;;  %v466_v9 = vadd.f32 %v465_v44, %v3362_v54  ;;  %v3405_v19 = vld [vmem:[%s2385_s21 + $0x170] sm:$0xff] }
  0xd8   : > { %4893 = vst [vmem:[#allocation101_spill] sm:$0xff] %v3343_v55  ;;  %v494_v61 = vadd.f32 %v493_v59, %v3343_v55  ;;  %4897 = vst [vmem:[#allocation103_spill] sm:$0xff] %v3366_v17  ;;  %v1201_v59 = vmul.f32 %v3149_v36, %v993_v4  ;;  %v4900_v55 = vld [vmem:[#allocation16_spill] sm:$0xff]  ;;  %v437_v36 = vadd.f32 %v436_v21, %v435_v8  ;;  %v3402_v18 = vld [vmem:[%s2385_s21 + $0x378] sm:$0xff] }
  0xd9   : > { %v1002_v2 = vmul.f32 %v3113_v1, %v4900_v55  ;;  %4903 = vst [vmem:[#allocation16_spill] sm:$0xff] %v3397_v62  ;;  %v755_v34 = vmul.f32 %v3370_v40, %v3370_v40  ;;  %v823_v56 = vadd.f32 %v822_v22, %v747_v20  ;;  %v4905_v44 = vld [vmem:[#allocation29_spill] sm:$0xff]  ;;  %v764_v5 = vmul.f32 %v3366_v17, %v3366_v17  ;;  %v4943_v17 = vld [vmem:[#allocation51_spill] sm:$0xff] }
  0xda   : > { %v3353_v52 = vpop.permute.xlu1 %1198  ;;  %v3355_v43 = vpop.permute.xlu0 %1193  ;;  %v495_v55 = vadd.f32 %v494_v61, %v3375_v11  ;;  %v1009_v21 = vmul.f32 %v3215_v15, %v4905_v44  ;;  %v845_v39 = vadd.f32 %v844_v25, %v756_v13  ;;  %v438_v25 = vrot.slane %v437_v36, 2 }
  0xdb   : > { %4895 = vst [vmem:[#allocation15_spill] sm:$0xff] %v3353_v52  ;;  %4896 = vst [vmem:[#allocation102_spill] sm:$0xff] %v3355_v43  ;;  %v4901_v52 = vld [vmem:[#allocation26_spill] sm:$0xff]  ;;  %v1210_v61 = vmul.f32 %v3176_v31, %v1002_v2  ;;  %v467_v2 = vadd.f32 %v466_v9, %v3405_v19  ;;  %v824_v13 = vadd.f32 %v823_v56, %v755_v34 }
  0xdc   : > { %v1001_v12 = vmul.f32 %v3215_v15, %v4901_v52  ;;  %v4902_v52 = vld [vmem:[#allocation19_spill] sm:$0xff]  ;;  %4904 = vst [vmem:[#allocation26_spill] sm:$0xff] %v3402_v18  ;;  %v1017_v9 = vmul.f32 %v3215_v15, %v2813_v58  ;;  %v846_v44 = vadd.f32 %v845_v39, %v764_v5 }
  0xdd   : > { %v1010_v28 = vmul.f32 %v3113_v1, %v4902_v52  ;;  %v763_v52 = vmul.f32 %v3397_v62, %v3397_v62 }
  0xde   : > { %v3383_v41 = vpop.permute.xlu0 %1331  ;;  %v3391_v43 = vpop.permute.xlu1 %1336  ;;  %v1209_v8 = vmul.f32 %v3176_v31, %v1001_v12  ;;  %v4906_v12 = vld [vmem:[#allocation20_spill] sm:$0xff]  ;;  %v847_v62 = vrot.slane %v846_v44, 4 }
  0xdf   : > { %v1410_v50 = vadd.f32 %v3383_v41, %v1202_v26  ;;  %v1409_v4 = vadd.f32 %v3383_v41, %v1201_v59  ;;  %v3413_v26 = vmul.f32 0.0078125, %v462_v35  ;;  %v1418_v20 = vadd.f32 %v3391_v43, %v1210_v61  ;;  %v3426_v35 = vld [vmem:[%s2385_s21 + $0x1b0] sm:$0xff] }
  0xe0   : > { %v1417_v22 = vadd.f32 %v3391_v43, %v1209_v8  ;;  %v496_v59 = vadd.f32 %v495_v55, %v3402_v18  ;;  %v1218_v61 = vmul.f32 %v3147_v24, %v1010_v28  ;;  %v1217_v55 = vmul.f32 %v3147_v24, %v1009_v21  ;;  %v3433_v8 = vld [vmem:[%s2385_s21 + $0x3b8] sm:$0xff] }
  0xe1   : > { %1569 = vxpose.xlu1.b32.start [1/16] %v1410_v50, 128  ;;  %1537 = vxpose.xlu0.b32.start [1/16] %v1409_v4, 128  ;;  %v1018_v4 = vmul.f32 %v3113_v1, %v4906_v12  ;;  %4907 = vst [vmem:[#allocation19_spill] sm:$0xff] %v3433_v8  ;;  %v3437_v12 = vsub.f32 %v2835_v48, %v3413_v26 }
  0xe2   : > { %v3419_v50 = vpop.permute.xlu0 %1341  ;;  %v3441_v34 = vsub.f32 %v2838_v16, %v3413_v26  ;;  %v468_v21 = vadd.f32 %v467_v2, %v3426_v35  ;;  %v3446_v58 = vpop.permute.xlu1 %1346  ;;  %v825_v39 = vadd.f32 %v824_v13, %v763_v52  ;;  %v497_v48 = vadd.f32 %v496_v59, %v3433_v8  ;;  %v3459_v2 = vld [vmem:[%s2385_s21 + $0x1f0] sm:$0xff] }
  0xe3   : > { %4908 = vst [vmem:[#allocation29_spill] sm:$0xff] %v3437_v12  ;;  %v1426_v28 = vadd.f32 %v3419_v50, %v1218_v61  ;;  %v1425_v56 = vadd.f32 %v3419_v50, %v1217_v55  ;;  %v1226_v16 = vmul.f32 %v3174_v60, %v1018_v4  ;;  %v1225_v18 = vmul.f32 %v3174_v60, %v1017_v9  ;;  %v3456_v55 = vld [vmem:[%s2385_s21 + $0x3f8] sm:$0xff] }
  0xe4   : > { %4909 = vst [vmem:[#allocation20_spill] sm:$0xff] %v3441_v34  ;;  %v1025_v61 = vmul.f32 %v3215_v15, %v2830_v27  ;;  %v3463_v52 = vsub.f32 %v2868_v7, %v3413_v26  ;;  %v654_v59 = vmul.f32 %v3441_v34, %v3441_v34  ;;  %v3479_v7 = vadd.f32 %v468_v21, %v3459_v2 }
  0xe5   : > { %1570 = vxpose.xlu1.b32.cont [2/16] %v1418_v20, 128  ;;  %1538 = vxpose.xlu0.b32.cont [2/16] %v1417_v22, 128  ;;  %v4910_v20 = vld [vmem:[#allocation22_spill] sm:$0xff]  ;;  %v439_v22 = vadd.f32 %v438_v25, %v437_v36  ;;  %v646_v36 = vmul.f32 %v3437_v12, %v3437_v12  ;;  %v1434_v4 = vadd.f32 %v3446_v58, %v1226_v16  ;;  %v4913_v25 = vld [vmem:[#allocation23_spill] sm:$0xff]  ;;  %v4940_v12 = vld [vmem:[#allocation36_spill] sm:$0xff] }
  0xe6   : > { %v1026_v5 = vmul.f32 %v3113_v1, %v4910_v20  ;;  %4911 = vst [vmem:[#allocation22_spill] sm:$0xff] %v3456_v55  ;;  %4912 = vst [vmem:[#allocation104_spill] sm:$0xff] %v3463_v52  ;;  %v1433_v13 = vadd.f32 %v3446_v58, %v1225_v18  ;;  %v3471_v27 = vpop.permute.xlu0 %1351  ;;  %v1034_v9 = vmul.f32 %v3113_v1, %v4913_v25 }
  0xe7   : > { %v1233_v16 = vmul.f32 %v3204_v63, %v1025_v61  ;;  %v1033_v18 = vmul.f32 %v3215_v15, %v2849_v33  ;;  %v440_v34 = vrot.slane %v439_v22, 1  ;;  %v848_v8 = vadd.f32 %v847_v62, %v846_v44  ;;  %v3501_v62 = vpop.permute.xlu1 %1356 }
  0xe8   : > { %v1234_v20 = vmul.f32 %v3204_v63, %v1026_v5  ;;  %v3487_v25 = vsub.f32 %v2902_v42, %v3413_v26  ;;  %v874_v21 = vadd.f32 %v654_v59, %v646_v36  ;;  %v3495_v5 = vsub.f32 %v2922_v14, %v3413_v26  ;;  %v4917_v42 = vld [vmem:[#allocation24_spill] sm:$0xff] }
  0xe9   : > { %1571 = vxpose.xlu1.b32.cont [3/16] %v1426_v28, 128  ;;  %1539 = vxpose.xlu0.b32.cont [3/16] %v1425_v56, 128  ;;  %v826_v28 = vrot.slane %v825_v39, 4  ;;  %v3476_v56 = vadd.f32 %v497_v48, %v3456_v55  ;;  %v662_v48 = vmul.f32 %v3463_v52, %v3463_v52  ;;  %v3499_v33 = vsub.f32 %v2938_v38, %v3413_v26  ;;  %v4927_v55 = vld [vmem:[#allocation32_spill] sm:$0xff] }
  0xea   : > { %4914 = vst [vmem:[#allocation23_spill] sm:$0xff] %v3487_v25  ;;  %4915 = vst [vmem:[#allocation105_spill] sm:$0xff] %v3495_v5  ;;  %v1042_v44 = vmul.f32 %v3113_v1, %v4917_v42  ;;  %v1041_v61 = vmul.f32 %v3215_v15, %v2863_v53  ;;  %v3509_v59 = vsub.f32 %v2960_v37, %v3413_v26 }
  0xeb   : > { %4916 = vst [vmem:[#allocation106_spill] sm:$0xff] %v3499_v33  ;;  %v827_v36 = vadd.f32 %v826_v28, %v825_v39  ;;  %v1242_v14 = vmul.f32 %v3202_v0, %v1034_v9  ;;  %v1241_v38 = vmul.f32 %v3202_v0, %v1033_v18  ;;  %v3515_v52 = vsub.f32 %v2979_v32, %v3413_v26  ;;  %v4922_v32 = vld [vmem:[#allocation25_spill] sm:$0xff]  ;;  %v4923_v18 = vld [vmem:[#allocation28_spill] sm:$0xff] }
  0xec   : > { %4918 = vst [vmem:[#allocation24_spill] sm:$0xff] %v3509_v59  ;;  %v670_v53 = vmul.f32 %v3487_v25, %v3487_v25  ;;  %v875_v39 = vadd.f32 %v874_v21, %v662_v48  ;;  %v1050_v9 = vmul.f32 %v3113_v1, %v4922_v32  ;;  %v1058_v48 = vmul.f32 %v3113_v1, %v4923_v18 }
  0xed   : > { %1572 = vxpose.xlu1.b32.cont [4/16] %v1434_v4, 128  ;;  %1540 = vxpose.xlu0.b32.cont [4/16] %v1433_v13, 128  ;;  %v1442_v4 = vadd.f32 %v3471_v27, %v1234_v20  ;;  %v1441_v13 = vadd.f32 %v3471_v27, %v1233_v16  ;;  %v441_v20 = vadd.f32 %v440_v34, %v439_v22  ;;  %v849_v16 = vrot.slane %v848_v8, 2  ;;  %v3529_v22 = vpop.permute.xlu0 %1361 }
  0xee   : > { %4919 = vst [vmem:[#allocation107_spill] sm:$0xff] %v3515_v52  ;;  %v1450_v28 = vadd.f32 %v3501_v62, %v1242_v14  ;;  %v1449_v37 = vadd.f32 %v3501_v62, %v1241_v38  ;;  %v3527_v34 = vsub.f32 %v3023_v6, %v3413_v26  ;;  %v828_v21 = vrot.slane %v827_v36, 2  ;;  %v4925_v38 = vld [vmem:[#allocation30_spill] sm:$0xff] }
  0xef   : > { %v1249_v6 = vmul.f32 %v3239_v57, %v1041_v61  ;;  %v1049_v42 = vmul.f32 %v3215_v15, %v2878_v46  ;;  %v3543_v14 = vmul.f32 0.0078125, %v441_v20  ;;  %v1066_v32 = vmul.f32 %v3113_v1, %v4925_v38  ;;  %v3557_v20 = vpop.permute.xlu1 %1366 }
  0xf0   : > { %4921 = vst [vmem:[#allocation109_spill] sm:$0xff] %v3527_v34  ;;  %v850_v18 = vadd.f32 %v849_v16, %v848_v8  ;;  %v678_v25 = vmul.f32 %v3495_v5, %v3495_v5  ;;  %v3555_v46 = vmul.f32 %v3113_v1, %v4927_v55  ;;  %4928 = vst [vmem:[#allocation28_spill] sm:$0xff] %v3557_v20  ;;  %v4929_v16 = vld [vmem:[#allocation33_spill] sm:$0xff] }
  0xf1   : > { %1573 = vxpose.xlu1.b32.cont [5/16] %v1442_v4, 128  ;;  %1541 = vxpose.xlu0.b32.cont [5/16] %v1441_v13, 128  ;;  %v3523_v4 = vsub.f32 %v2999_v23, %v3413_v26  ;;  %v3537_v13 = vsub.f32 %v3045_v47, %v3413_v26  ;;  %v1250_v23 = vmul.f32 %v3239_v57, %v1042_v44  ;;  %v4926_v44 = vld [vmem:[#allocation31_spill] sm:$0xff] }
  0xf2   : > { %v876_v47 = vadd.f32 %v875_v39, %v670_v53  ;;  %v1074_v61 = vmul.f32 %v3113_v1, %v4926_v44  ;;  %v1258_v38 = vmul.f32 %v3237_v51, %v1050_v9  ;;  %v1057_v8 = vmul.f32 %v3215_v15, %v2891_v10  ;;  %v4932_v9 = vld [vmem:[#allocation34_spill] sm:$0xff] }
  0xf3   : > { %4920 = vst [vmem:[#allocation108_spill] sm:$0xff] %v3523_v4  ;;  %4924 = vst [vmem:[#allocation25_spill] sm:$0xff] %v3537_v13  ;;  %v3564_v53 = vmul.f32 %v3113_v1, %v4929_v16  ;;  %v829_v39 = vadd.f32 %v828_v21, %v827_v36  ;;  %v3569_v55 = vsub.f32 %v2947_v49, %v3543_v14  ;;  %v851_v44 = vrot.slane %v850_v18, 1 }
  0xf4   : > { %v3577_v10 = vmul.f32 %v3113_v1, %v4932_v9  ;;  %v686_v36 = vmul.f32 %v3499_v33, %v3499_v33  ;;  %v877_v21 = vadd.f32 %v876_v47, %v678_v25  ;;  %v694_v49 = vmul.f32 %v3509_v59, %v3509_v59  ;;  %v4934_v9 = vld [vmem:[#allocation35_spill] sm:$0xff] }
  0xf5   : > { %1574 = vxpose.xlu1.b32.cont [6/16] %v1450_v28, 128  ;;  %1542 = vxpose.xlu0.b32.cont [6/16] %v1449_v37, 128  ;;  %v1458_v28 = vadd.f32 %v3529_v22, %v1250_v23  ;;  %v1457_v37 = vadd.f32 %v3529_v22, %v1249_v6  ;;  %v1257_v23 = vmul.f32 %v3237_v51, %v1049_v42  ;;  %v830_v47 = vrot.slane %v829_v39, 1 }
  0xf6   : > { %4930 = vst [vmem:[#allocation30_spill] sm:$0xff] %v3569_v55  ;;  %v3573_v6 = vsub.f32 %v2950_v30, %v3543_v14  ;;  %v3587_v30 = vsub.f32 %v2971_v45, %v3543_v14  ;;  %v1266_v1 = vmul.f32 %v3263_v3, %v1058_v48  ;;  %v1265_v16 = vmul.f32 %v3263_v3, %v1057_v8 }
  0xf7   : > { %v1465_v42 = vadd.f32 %v3557_v20, %v1257_v23  ;;  %v1065_v25 = vmul.f32 %v3215_v15, %v4934_v9  ;;  %v645_v45 = vmul.f32 %v3569_v55, %v3569_v55  ;;  %v852_v33 = vadd.f32 %v851_v44, %v850_v18  ;;  %v4939_v18 = vld [vmem:[#allocation86_spill] sm:$0xff] }
  0xf8   : > { %4931 = vst [vmem:[#allocation31_spill] sm:$0xff] %v3573_v6  ;;  %4933 = vst [vmem:[#allocation32_spill] sm:$0xff] %v3587_v30  ;;  %v653_v59 = vmul.f32 %v3573_v6, %v3573_v6  ;;  %v702_v48 = vmul.f32 %v3515_v52, %v3515_v52  ;;  %v710_v8 = vmul.f32 %v3523_v4, %v3523_v4  ;;  %v3615_v6 = vpop.permute.xlu1 %1376 }
  0xf9   : > { %1575 = vxpose.xlu1.b32.cont [7/16] %v1458_v28, 128  ;;  %1543 = vxpose.xlu0.b32.cont [7/16] %v1457_v37, 128  ;;  %v1466_v28 = vadd.f32 %v3557_v20, %v1258_v38  ;;  %v3589_v37 = vpop.permute.xlu0 %1371  ;;  %v4935_v38 = vld [vmem:[#allocation40_spill] sm:$0xff]  ;;  %v878_v9 = vadd.f32 %v877_v21, %v686_v36  ;;  %v661_v55 = vmul.f32 %v3587_v30, %v3587_v30  ;;  %v940_v30 = vmul.f32 0.0078125, %v852_v33 }
  0xfa   : > { %v3597_v23 = vsub.f32 %v4935_v38, %v3543_v14  ;;  %v4937_v38 = vld [vmem:[#allocation45_spill] sm:$0xff]  ;;  %v1274_v44 = vmul.f32 %v4939_v18, %v1066_v32  ;;  %v1273_v52 = vmul.f32 %v4939_v18, %v1065_v25  ;;  %v1073_v36 = vmul.f32 %v3215_v15, %v4940_v12  ;;  %v4945_v33 = vld [vmem:[#allocation92_spill] sm:$0xff] }
  0xfb   : > { %v3611_v5 = vsub.f32 %v4937_v38, %v3543_v14  ;;  %v831_v21 = vadd.f32 %v830_v47, %v829_v39  ;;  %v853_v4 = vadd.f32 %v653_v59, %v645_v45  ;;  %v718_v32 = vmul.f32 %v3527_v34, %v3527_v34 }
  0xfc   : > { %4936 = vst [vmem:[#allocation33_spill] sm:$0xff] %v3597_v23  ;;  %v669_v38 = vmul.f32 %v3597_v23, %v3597_v23  ;;  %v879_v25 = vadd.f32 %v878_v9, %v694_v49  ;;  %v3631_v11 = vsub.f32 %v4943_v17, %v3543_v14  ;;  %v1482_v12 = vadd.f32 %v3615_v6, %v1274_v44  ;;  %v4946_v9 = vld [vmem:[#allocation37_spill] sm:$0xff]  ;;  %v3662_v23 = vpop.permute.xlu1 %1386 }
  0xfd   : > { %1576 = vxpose.xlu1.b32.cont [8/16] %v1466_v28, 128  ;;  %1544 = vxpose.xlu0.b32.cont [8/16] %v1465_v42, 128  ;;  %v1474_v28 = vadd.f32 %v3589_v37, %v1266_v1  ;;  %v1473_v42 = vadd.f32 %v3589_v37, %v1265_v16  ;;  %4938 = vst [vmem:[#allocation34_spill] sm:$0xff] %v3611_v5  ;;  %v4941_v1 = vld [vmem:[#allocation48_spill] sm:$0xff]  ;;  %v3640_v59 = vpop.permute.xlu0 %1381  ;;  %v948_v34 = vadd.f32 1e-05, %v940_v30  ;;  %v4951_v30 = vld [vmem:[#allocation91_spill] sm:$0xff] }
  0xfe   : > { %v3623_v16 = vsub.f32 %v4941_v1, %v3543_v14  ;;  %4944 = vst [vmem:[#allocation40_spill] sm:$0xff] %v3631_v11  ;;  %v1481_v39 = vadd.f32 %v3615_v6, %v1273_v52  ;;  %v677_v47 = vmul.f32 %v3611_v5, %v3611_v5  ;;  %v1282_v45 = vmul.f32 %v4945_v33, %v1074_v61  ;;  %v4947_v52 = vld [vmem:[#allocation57_spill] sm:$0xff]  ;;  %v4949_v61 = vld [vmem:[#allocation62_spill] sm:$0xff] }
  0xff   : > { %v1281_v49 = vmul.f32 %v4945_v33, %v1073_v36  ;;  %v1081_v17 = vmul.f32 %v3215_v15, %v4946_v9  ;;  %v939_v1 = vmul.f32 0.0078125, %v831_v21  ;;  %v3648_v44 = vsub.f32 %v4947_v52, %v3543_v14 }
 0x100   : > { %4942 = vst [vmem:[#allocation35_spill] sm:$0xff] %v3623_v16  ;;  %v880_v5 = vadd.f32 %v879_v25, %v702_v48  ;;  %v3654_v36 = vsub.f32 %v4949_v61, %v3543_v14  ;;  %v693_v9 = vmul.f32 %v3631_v11, %v3631_v11  ;;  %v1290_v48 = vmul.f32 %v4951_v30, %v3555_v46  ;;  %v4952_v25 = vld [vmem:[#allocation38_spill] sm:$0xff] }
 0x101   : > { %1577 = vxpose.xlu1.b32.cont [9/16] %v1474_v28, 128  ;;  %1545 = vxpose.xlu0.b32.cont [9/16] %v1473_v42, 128  ;;  %v854_v28 = vadd.f32 %v853_v4, %v661_v55  ;;  %v3638_v42 = vld [vmem:[%s2385_s21 + $0x230] sm:$0xff]  ;;  %4948 = vst [vmem:[#allocation45_spill] sm:$0xff] %v3648_v44  ;;  %v685_v4 = vmul.f32 %v3623_v16, %v3623_v16  ;;  %v947_v61 = vadd.f32 1e-05, %v939_v1  ;;  %2114 = vrsqrt.f32 %v948_v34  ;;  %v4958_v34 = vld [vmem:[#allocation73_spill] sm:$0xff] }
 0x102   : > { %4950 = vst [vmem:[#allocation86_spill] sm:$0xff] %v3654_v36  ;;  %v470_v21 = vadd.f32 %v3479_v7, %v3638_v42  ;;  %v3670_v7 = vld [vmem:[%s2385_s21 + $0x270] sm:$0xff]  ;;  %v881_v46 = vadd.f32 %v880_v5, %v710_v8  ;;  %v499_v1 = vrot.slane %v3476_v56, 4  ;;  %v3692_v8 = vsub.f32 %v4958_v34, %v3543_v14  ;;  %v3710_v34 = vpop.permute.xlu1 %1396 }
 0x103   : > { %v855_v55 = vadd.f32 %v854_v28, %v669_v38  ;;  %v1289_v38 = vmul.f32 %v4951_v30, %v1081_v17  ;;  %v1089_v28 = vmul.f32 %v3215_v15, %v4952_v25  ;;  %4953 = vst [vmem:[#allocation36_spill] sm:$0xff] %v3670_v7  ;;  %v709_v17 = vmul.f32 %v3654_v36, %v3654_v36  ;;  %v3681_v25 = vpop.permute.xlu0 %1391  ;;  %v4956_v16 = vld [vmem:[#allocation98_spill] sm:$0xff] }
 0x104   : > { %v471_v11 = vadd.f32 %v470_v21, %v3670_v7  ;;  %2116 = vrsqrt.f32 %v947_v61  ;;  %4959 = vst [vmem:[#allocation51_spill] sm:$0xff] %v3692_v8  ;;  %v726_v61 = vmul.f32 %v3537_v13, %v3537_v13  ;;  %4963 = vst [vmem:[#allocation57_spill] sm:$0xff] %v3710_v34  ;;  %v4981_v7 = vld [vmem:[#allocation84_spill] sm:$0xff] }
 0x105   : > { %1578 = vxpose.xlu1.b32.cont [10/16] %v1482_v12, 128  ;;  %1546 = vxpose.xlu0.b32.cont [10/16] %v1481_v39, 128  ;;  %v1490_v12 = vadd.f32 %v3640_v59, %v1282_v45  ;;  %v1489_v39 = vadd.f32 %v3640_v59, %v1281_v49  ;;  %v856_v52 = vadd.f32 %v855_v55, %v677_v47  ;;  %v4954_v45 = vld [vmem:[#allocation69_spill] sm:$0xff] }
 0x106   : > { %v3674_v49 = vsub.f32 %v4954_v45, %v3543_v14  ;;  %v701_v47 = vmul.f32 %v3648_v44, %v3648_v44  ;;  %v1298_v44 = vmul.f32 %v4956_v16, %v3564_v53 }
 0x107   : > { %v857_v55 = vadd.f32 %v856_v52, %v685_v4  ;;  %v4957_v4 = vld [vmem:[#allocation39_spill] sm:$0xff]  ;;  %v3695_v52 = vld [vmem:[%s2385_s21 + $0x2b0] sm:$0xff] }
 0x108   : > { %4955 = vst [vmem:[#allocation48_spill] sm:$0xff] %v3674_v49  ;;  %v1097_v5 = vmul.f32 %v3215_v15, %v4957_v4  ;;  %4960 = vst [vmem:[#allocation92_spill] sm:$0xff] %v3695_v52  ;;  %v717_v21 = vmul.f32 %v3674_v49, %v3674_v49  ;;  %v1506_v53 = vadd.f32 %v3681_v25, %v1298_v44  ;;  %v4961_v15 = vld [vmem:[#allocation55_spill] sm:$0xff] }
 0x109   : > { %1579 = vxpose.xlu1.b32.cont [11/16] %v1490_v12, 128  ;;  %1547 = vxpose.xlu0.b32.cont [11/16] %v1489_v39, 128  ;;  %v1498_v12 = vadd.f32 %v3662_v23, %v1290_v48  ;;  %v1497_v39 = vadd.f32 %v3662_v23, %v1289_v38  ;;  %v858_v45 = vadd.f32 %v857_v55, %v693_v9 }
 0x10a   : > { %v1297_v9 = vmul.f32 %v4956_v16, %v1089_v28  ;;  %v3703_v38 = vsub.f32 %v4961_v15, %v3413_v26  ;;  %v882_v55 = vadd.f32 %v881_v46, %v718_v32  ;;  %v472_v28 = vadd.f32 %v471_v11, %v3695_v52  ;;  %v3719_v15 = vld [vmem:[%s2385_s21 + $0x2f0] sm:$0xff]  ;;  %v4967_v32 = vld [vmem:[#allocation97_spill] sm:$0xff]  ;;  %v4980_v52 = vld [vmem:[#allocation15_spill] sm:$0xff] }
 0x10b   : > { %v859_v48 = vadd.f32 %v858_v45, %v701_v47  ;;  %v4964_v47 = vld [vmem:[#allocation77_spill] sm:$0xff]  ;;  %v725_v45 = vmul.f32 %v3692_v8, %v3692_v8  ;;  %4966 = vst [vmem:[#allocation91_spill] sm:$0xff] %v3719_v15  ;;  %v1306_v46 = vmul.f32 %v4967_v32, %v3577_v10  ;;  %v3733_v13 = vpop.eup %2114  ;;  %v3735_v10 = vpop.permute.xlu0 %1401 }
 0x10c   : > { %4962 = vst [vmem:[#allocation37_spill] sm:$0xff] %v3703_v38  ;;  %v3714_v44 = vsub.f32 %v4964_v47, %v3543_v14  ;;  %v473_v8 = vadd.f32 %v472_v28, %v3719_v15  ;;  %4970 = vst [vmem:[#allocation69_spill] sm:$0xff] %v3735_v10  ;;  %v3761_v15 = vpop.permute.xlu1 %1406 }
 0x10d   : > { %1580 = vxpose.xlu1.b32.cont [12/16] %v1498_v12, 128  ;;  %1548 = vxpose.xlu0.b32.cont [12/16] %v1497_v39, 128  ;;  %v1505_v12 = vadd.f32 %v3681_v25, %v1297_v9  ;;  %v860_v4 = vadd.f32 %v859_v48, %v709_v17  ;;  %v500_v39 = vadd.f32 %v499_v1, %v3476_v56  ;;  %v4968_v17 = vld [vmem:[#allocation60_spill] sm:$0xff] }
 0x10e   : > { %4965 = vst [vmem:[#allocation62_spill] sm:$0xff] %v3714_v44  ;;  %v1305_v56 = vmul.f32 %v4967_v32, %v1097_v5  ;;  %v3726_v1 = vsub.f32 %v4968_v17, %v3413_v26  ;;  %v734_v9 = vmul.f32 %v3703_v38, %v3703_v38  ;;  %v883_v48 = vadd.f32 %v882_v55, %v726_v61  ;;  %v4971_v5 = vld [vmem:[#allocation79_spill] sm:$0xff]  ;;  %v3744_v61 = vld [vmem:[%s2385_s21 + $0x330] sm:$0xff]  ;;  %v3750_v49 = vpop.eup %2116 }
 0x10f   : > { %v861_v11 = vadd.f32 %v860_v4, %v717_v21  ;;  %v1514_v47 = vadd.f32 %v3710_v34, %v1306_v46  ;;  %v3739_v21 = vsub.f32 %v4971_v5, %v3543_v14  ;;  %v733_v4 = vmul.f32 %v3714_v44, %v3714_v44  ;;  %4973 = vst [vmem:[#allocation39_spill] sm:$0xff] %v3744_v61  ;;  %v4974_v55 = vld [vmem:[#allocation66_spill] sm:$0xff]  ;;  %v4977_v5 = vld [vmem:[#allocation65_spill] sm:$0xff] }
 0x110   : > { %4969 = vst [vmem:[#allocation38_spill] sm:$0xff] %v3726_v1  ;;  %v4975_v46 = vld [vmem:[#allocation102_spill] sm:$0xff]  ;;  %v3754_v36 = vsub.f32 %v4977_v5, %v3413_v26  ;;  %v3767_v5 = vsub.f32 %v4981_v7, %v3543_v14  ;;  %v4987_v7 = vld [vmem:[#allocation72_spill] sm:$0xff] }
 0x111   : > { %1581 = vxpose.xlu1.b32.cont [13/16] %v1506_v53, 128  ;;  %1549 = vxpose.xlu0.b32.cont [13/16] %v1505_v12, 128  ;;  %v1513_v53 = vadd.f32 %v3710_v34, %v1305_v56  ;;  %v501_v12 = vrot.slane %v500_v39, 2  ;;  %4972 = vst [vmem:[#allocation98_spill] sm:$0xff] %v3739_v21  ;;  %v862_v17 = vadd.f32 %v861_v11, %v725_v45  ;;  %v4976_v56 = vld [vmem:[#allocation81_spill] sm:$0xff] }
 0x112   : > { %v1314_v28 = vmul.f32 %v4975_v46, %v4974_v55  ;;  %v1313_v38 = vmul.f32 %v4975_v46, %v4976_v56  ;;  %4978 = vst [vmem:[#allocation73_spill] sm:$0xff] %v3754_v36  ;;  %v742_v45 = vmul.f32 %v3726_v1, %v3726_v1  ;;  %v884_v11 = vadd.f32 %v883_v48, %v734_v9  ;;  %v4979_v56 = vld [vmem:[#allocation67_spill] sm:$0xff]  ;;  %v3772_v48 = vld [vmem:[%s2385_s21 + $0x370] sm:$0xff] }
 0x113   : > { %v502_v44 = vadd.f32 %v501_v12, %v500_v39  ;;  %v474_v55 = vadd.f32 %v473_v8, %v3744_v61  ;;  %v1322_v46 = vmul.f32 %v4980_v52, %v4979_v56  ;;  %4982 = vst [vmem:[#allocation55_spill] sm:$0xff] %v3767_v5  ;;  %v741_v1 = vmul.f32 %v3739_v21, %v3739_v21  ;;  %v4985_v39 = vld [vmem:[#allocation41_spill] sm:$0xff] }
 0x114   : > { %v863_v9 = vadd.f32 %v862_v17, %v733_v4  ;;  %4983 = vst [vmem:[#allocation77_spill] sm:$0xff] %v3772_v48  ;;  %v996_v12 = vmul.f32 %v3733_v13, %v4985_v39  ;;  %v3782_v61 = vsub.f32 %v4987_v7, %v3413_v26  ;;  %v750_v4 = vmul.f32 %v3754_v36, %v3754_v36  ;;  %v3798_v36 = vld [vmem:[%s2385_s21 + $0x3b0] sm:$0xff] }
 0x115   : > { %1582 = vxpose.xlu1.b32.cont [14/16] %v1514_v47, 128  ;;  %1550 = vxpose.xlu0.b32.cont [14/16] %v1513_v53, 128  ;;  %v1522_v47 = vadd.f32 %v3735_v10, %v1314_v28  ;;  %v1521_v53 = vadd.f32 %v3735_v10, %v1313_v38  ;;  %v4984_v38 = vld [vmem:[#allocation82_spill] sm:$0xff]  ;;  %v4986_v28 = vld [vmem:[#allocation43_spill] sm:$0xff]  ;;  %v885_v17 = vadd.f32 %v884_v11, %v742_v45  ;;  %v503_v21 = vrot.slane %v502_v44, 1 }
 0x116   : > { %v1321_v8 = vmul.f32 %v4980_v52, %v4984_v38  ;;  %v995_v56 = vmul.f32 %v3750_v49, %v4986_v28  ;;  %4988 = vst [vmem:[#allocation97_spill] sm:$0xff] %v3782_v61  ;;  %v475_v38 = vadd.f32 %v474_v55, %v3772_v48  ;;  %v4989_v52 = vld [vmem:[#allocation42_spill] sm:$0xff]  ;;  %v4990_v28 = vld [vmem:[#allocation89_spill] sm:$0xff]  ;;  %v749_v7 = vmul.f32 %v3767_v5, %v3767_v5  ;;  %v4993_v55 = vld [vmem:[#allocation44_spill] sm:$0xff] }
 0x117   : > { %v1004_v39 = vmul.f32 %v3733_v13, %v4989_v52  ;;  %v3793_v10 = vsub.f32 %v4990_v28, %v3543_v14  ;;  %v864_v34 = vadd.f32 %v863_v9, %v741_v1  ;;  %v1003_v52 = vmul.f32 %v3750_v49, %v4993_v55  ;;  %v4996_v48 = vld [vmem:[#allocation46_spill] sm:$0xff]  ;;  %v4997_v55 = vld [vmem:[#allocation95_spill] sm:$0xff] }
 0x118   : > { %v758_v5 = vmul.f32 %v3782_v61, %v3782_v61  ;;  %v886_v1 = vadd.f32 %v885_v17, %v750_v4  ;;  %v3822_v61 = vld [vmem:[%s2385_s21 + $0x3f0] sm:$0xff]  ;;  %s4159_s21 = scalar_lea.vmem [#allocation5], %s2032_s18  ;;  %s2040_s18 = sshll.u32 %s2230_s15, 14 }
 0x119   : > { %1583 = vxpose.xlu1.b32.cont [15/16] %v1522_v47, 128  ;;  %1551 = vxpose.xlu0.b32.cont [15/16] %v1521_v53, 128  ;;  %v1530_v47 = vadd.f32 %v3761_v15, %v1322_v46  ;;  %v1529_v53 = vadd.f32 %v3761_v15, %v1321_v8  ;;  %4991 = vst [vmem:[#allocation60_spill] sm:$0xff] %v3793_v10  ;;  %v4992_v46 = vld [vmem:[#allocation71_spill] sm:$0xff]  ;;  %s1937_s29 = sshll.u32 %s4159_s21, 4  ;;  %s4538_s5 = scalar_lea.hbm %s4594_s3, %s2040_s18  ;;  %s4540_s29 = int_to_ptr.vmem [resolvable:$true] %s1937_s29 }
 0x11a   : > { %v1204_v45 = vmul.f32 %v4992_v46, %v996_v12  ;;  %v1203_v11 = vmul.f32 %v4992_v46, %v995_v56  ;;  %v4994_v8 = vld [vmem:[#allocation75_spill] sm:$0xff]  ;;  %v476_v12 = vadd.f32 %v475_v38, %v3798_v36  ;;  %v1012_v56 = vmul.f32 %v3733_v13, %v4996_v48  ;;  %v5000_v48 = vld [vmem:[#allocation49_spill] sm:$0xff]  ;;  %s1922_s15 = scalar_lea.sflag [#allocation4], %s2379_s11  ;;  %s2156_s7 = scalar_lea.vmem %s4540_s29, 16384 }
 0x11b   : > { %v3806_v28 = vsub.f32 %v4994_v8, %v3413_v26  ;;  %v3817_v46 = vsub.f32 %v4997_v55, %v3543_v14  ;;  %v757_v26 = vmul.f32 %v3793_v10, %v3793_v10  ;;  %v865_v8 = vadd.f32 %v864_v34, %v749_v7  ;;  %p2157_p8 = scmp.ne.s32.totalorder %s4540_s29, %s2156_s7  ;;  %p2163_p6 = scmp.lt.s32.totalorder %s4540_s29, %s2161_s6 }
 0x11c   : > { %v1412_v9 = vadd.f32 %v3383_v41, %v1204_v45  ;;  %v1212_v4 = vmul.f32 %v3176_v31, %v1004_v39  ;;  %v1020_v38 = vmul.f32 %v3733_v13, %v5000_v48  ;;  %v887_v45 = vadd.f32 %v886_v1, %v758_v5  ;;  %p2164_p13 = scmp.lt.s32.totalorder %s2162_s8, %s2156_s7 }
 0x11d   : > { %1584 = vxpose.xlu1.b32.end [16/16] %v1530_v47, 128  ;;  %1552 = vxpose.xlu0.b32.end [16/16] %v1529_v53, 128  ;;  %4995 = vst [vmem:[#allocation79_spill] sm:$0xff] %v3806_v28  ;;  %v1411_v47 = vadd.f32 %v3383_v41, %v1203_v11  ;;  %v504_v53 = vadd.f32 %v503_v21, %v502_v44  ;;  %4998 = vst [vmem:[#allocation66_spill] sm:$0xff] %v3817_v46  ;;  %v4999_v21 = vld [vmem:[#allocation47_spill] sm:$0xff]  ;;  %p2158_p11 = pnand %p2157_p8, %p5133_p9 }
 0x11e   : > { %v1211_v44 = vmul.f32 %v3176_v31, %v1003_v52  ;;  %v1011_v17 = vmul.f32 %v3750_v49, %v4999_v21  ;;  %v766_v14 = vmul.f32 %v3806_v28, %v3806_v28  ;;  %v1420_v34 = vadd.f32 %v3391_v43, %v1212_v4  ;;  %v5002_v4 = vld [vmem:[#allocation54_spill] sm:$0xff]  ;;  %p2165_p2 = por %p2164_p13, %p2163_p6 }
 0x11f   : > { %v3834_v11 = vmul.f32 0.0078125, %v504_v53  ;;  %v477_v39 = vadd.f32 %v476_v12, %v3822_v61  ;;  %v1220_v52 = vmul.f32 %v3147_v24, %v1012_v56  ;;  %v765_v55 = vmul.f32 %v3817_v46, %v3817_v46  ;;  %v5003_v56 = vld [vmem:[#allocation52_spill] sm:$0xff]  ;;  %p2159_p0 = pneg %p2158_p11 }
 0x120   : > { %v1419_v7 = vadd.f32 %v3391_v43, %v1211_v44  ;;  %v866_v21 = vadd.f32 %v865_v8, %v757_v26  ;;  %v1219_v5 = vmul.f32 %v3147_v24, %v1011_v17  ;;  %v1028_v53 = vmul.f32 %v3733_v13, %v5002_v4 }
 0x121   : > { %1633 = vxpose.xlu1.b32.start [1/16] %v1412_v9, 128  ;;  %1601 = vxpose.xlu0.b32.start [1/16] %v1411_v47, 128  ;;  %v5001_v9 = vld [vmem:[#allocation50_spill] sm:$0xff]  ;;  %v1428_v1 = vadd.f32 %v3419_v50, %v1220_v52  ;;  %v888_v44 = vadd.f32 %v887_v45, %v766_v14  ;;  %v3849_v48 = vsub.f32 %v5003_v56, %v3834_v11  ;;  %v478_v26 = vrot.slane %v477_v39, 4  ;;  %p2166_p5 = pnand %p2165_p2, %p2159_p0 }
 0x122   : > { %v1019_v47 = vmul.f32 %v3750_v49, %v5001_v9  ;;  %v1427_v12 = vadd.f32 %v3419_v50, %v1219_v5  ;;  %v5005_v9 = vld [vmem:[#allocation53_spill] sm:$0xff]  ;;  %v1228_v8 = vmul.f32 %v3174_v60, %v1020_v38  ;;  %v867_v52 = vadd.f32 %v866_v21, %v765_v55  ;;  %v5008_v5 = vld [vmem:[#allocation59_spill] sm:$0xff] }
 0x123   : > { %5004 = vst [vmem:[#allocation81_spill] sm:$0xff] %v3849_v48  ;;  %v3853_v46 = vsub.f32 %v5005_v9, %v3834_v11  ;;  %v1036_v4 = vmul.f32 %v3733_v13, %v5008_v5  ;;  %v889_v56 = vrot.slane %v888_v44, 4  ;;  %v5009_v9 = vld [vmem:[#allocation58_spill] sm:$0xff]  ;;  %v648_v38 = vmul.f32 %v3849_v48, %v3849_v48 }
 0x124   : > { %v1227_v17 = vmul.f32 %v3174_v60, %v1019_v47  ;;  %v1436_v14 = vadd.f32 %v3446_v58, %v1228_v8  ;;  %v3865_v28 = vsub.f32 %v5009_v9, %v3834_v11  ;;  %v479_v55 = vadd.f32 %v478_v26, %v477_v39  ;;  %v5012_v9 = vld [vmem:[#allocation64_spill] sm:$0xff]  ;;  %v5013_v39 = vld [vmem:[#allocation63_spill] sm:$0xff] }
 0x125   : > { %1634 = vxpose.xlu1.b32.cont [2/16] %v1420_v34, 128  ;;  %1602 = vxpose.xlu0.b32.cont [2/16] %v1419_v7, 128  ;;  %5006 = vst [vmem:[#allocation65_spill] sm:$0xff] %v3853_v46  ;;  %v5007_v34 = vld [vmem:[#allocation56_spill] sm:$0xff]  ;;  %v656_v47 = vmul.f32 %v3853_v46, %v3853_v46  ;;  %v1236_v21 = vmul.f32 %v3204_v63, %v1028_v53 }
 0x126   : > { %v1027_v7 = vmul.f32 %v3750_v49, %v5007_v34  ;;  %v1435_v45 = vadd.f32 %v3446_v58, %v1227_v17  ;;  %5010 = vst [vmem:[#allocation67_spill] sm:$0xff] %v3865_v28  ;;  %v868_v17 = vrot.slane %v867_v52, 4  ;;  %v1044_v48 = vmul.f32 %v3733_v13, %v5012_v9 }
 0x127   : > { %v1444_v34 = vadd.f32 %v3471_v27, %v1236_v21  ;;  %v890_v10 = vadd.f32 %v889_v56, %v888_v44  ;;  %v3881_v26 = vsub.f32 %v5013_v39, %v3834_v11  ;;  %v664_v53 = vmul.f32 %v3865_v28, %v3865_v28  ;;  %v5015_v21 = vld [vmem:[#allocation68_spill] sm:$0xff] }
 0x128   : > { %v869_v46 = vadd.f32 %v868_v17, %v867_v52  ;;  %v1252_v9 = vmul.f32 %v3239_v57, %v1044_v48  ;;  %v5018_v17 = vld [vmem:[#allocation8_spill] sm:$0xff] }
 0x129   : > { %1635 = vxpose.xlu1.b32.cont [3/16] %v1428_v1, 128  ;;  %1603 = vxpose.xlu0.b32.cont [3/16] %v1427_v12, 128  ;;  %v1235_v1 = vmul.f32 %v3204_v63, %v1027_v7  ;;  %v5011_v12 = vld [vmem:[#allocation61_spill] sm:$0xff]  ;;  %5014 = vst [vmem:[#allocation84_spill] sm:$0xff] %v3881_v26  ;;  %v916_v7 = vadd.f32 %v656_v47, %v648_v38  ;;  %v891_v39 = vrot.slane %v890_v10, 2  ;;  %v5016_v38 = vld [vmem:[#allocation70_spill] sm:$0xff] }
 0x12a   : > { %v1035_v8 = vmul.f32 %v3750_v49, %v5011_v12  ;;  %v480_v12 = vrot.slane %v479_v55, 2  ;;  %v3894_v47 = vsub.f32 %v5016_v38, %v3834_v11  ;;  %v1460_v48 = vadd.f32 %v3529_v22, %v1252_v9  ;;  %v5020_v38 = vld [vmem:[#allocation9_spill] sm:$0xff]  ;;  %v5023_v9 = vld [vmem:[#allocation76_spill] sm:$0xff] }
 0x12b   : > { %v1443_v5 = vadd.f32 %v3471_v27, %v1235_v1  ;;  %v1043_v1 = vmul.f32 %v3750_v49, %v5015_v21 }
 0x12c   : > { %5017 = vst [vmem:[#allocation82_spill] sm:$0xff] %v3894_v47  ;;  %v481_v28 = vadd.f32 %v480_v12, %v479_v55  ;;  %v5021_v55 = vld [vmem:[#allocation74_spill] sm:$0xff]  ;;  %v680_v12 = vmul.f32 %v3894_v47, %v3894_v47 }
 0x12d   : > { %1636 = vxpose.xlu1.b32.cont [4/16] %v1436_v14, 128  ;;  %1604 = vxpose.xlu0.b32.cont [4/16] %v1435_v45, 128  ;;  %v1244_v14 = vmul.f32 %v3202_v0, %v1036_v4  ;;  %v1243_v45 = vmul.f32 %v3202_v0, %v1035_v8  ;;  %v672_v4 = vmul.f32 %v3881_v26, %v3881_v26 }
 0x12e   : > { %v917_v8 = vadd.f32 %v916_v7, %v664_v53  ;;  %v1251_v52 = vmul.f32 %v3239_v57, %v1043_v1  ;;  %v1060_v26 = vmul.f32 %v3733_v13, %v5020_v38  ;;  %v892_v53 = vadd.f32 %v891_v39, %v890_v10  ;;  %v5024_v38 = vld [vmem:[#allocation11_spill] sm:$0xff] }
 0x12f   : > { %v1452_v44 = vadd.f32 %v3501_v62, %v1244_v14  ;;  %v1451_v56 = vadd.f32 %v3501_v62, %v1243_v45  ;;  %v870_v45 = vrot.slane %v869_v46, 2  ;;  %v3909_v7 = vsub.f32 %v5021_v55, %v3834_v11 }
 0x130   : > { %v1459_v21 = vadd.f32 %v3529_v22, %v1251_v52  ;;  %v918_v1 = vadd.f32 %v917_v8, %v672_v4  ;;  %v1059_v52 = vmul.f32 %v3750_v49, %v5023_v9  ;;  %v1068_v55 = vmul.f32 %v3733_v13, %v5024_v38  ;;  %v5025_v4 = vld [vmem:[#allocation78_spill] sm:$0xff] }
 0x131   : > { %1637 = vxpose.xlu1.b32.cont [5/16] %v1444_v34, 128  ;;  %1605 = vxpose.xlu0.b32.cont [5/16] %v1443_v5, 128  ;;  %v1052_v34 = vmul.f32 %v3733_v13, %v5018_v17  ;;  %v5019_v5 = vld [vmem:[#allocation10_spill] sm:$0xff]  ;;  %5022 = vst [vmem:[#allocation41_spill] sm:$0xff] %v3909_v7  ;;  %v482_v17 = vrot.slane %v481_v28, 1  ;;  %v893_v47 = vrot.slane %v892_v53, 1  ;;  %v3923_v8 = vsub.f32 %v5025_v4, %v3834_v11 }
 0x132   : > { %v1051_v14 = vmul.f32 %v3750_v49, %v5019_v5  ;;  %v871_v5 = vadd.f32 %v870_v45, %v869_v46  ;;  %v1268_v46 = vmul.f32 %v3263_v3, %v1060_v26  ;;  %v1267_v45 = vmul.f32 %v3263_v3, %v1059_v52 }
 0x133   : > { %5026 = vst [vmem:[#allocation43_spill] sm:$0xff] %v3923_v8  ;;  %v483_v9 = vadd.f32 %v482_v17, %v481_v28  ;;  %v5029_v28 = vld [vmem:[#allocation80_spill] sm:$0xff]  ;;  %v696_v26 = vmul.f32 %v3923_v8, %v3923_v8  ;;  %v1276_v52 = vmul.f32 %v4939_v18, %v1068_v55  ;;  %v5033_v55 = vld [vmem:[#allocation85_spill] sm:$0xff] }
 0x134   : > { %v1476_v4 = vadd.f32 %v3589_v37, %v1268_v46 }
 0x135   : > { %1638 = vxpose.xlu1.b32.cont [6/16] %v1452_v44, 128  ;;  %1606 = vxpose.xlu0.b32.cont [6/16] %v1451_v56, 128  ;;  %v1260_v44 = vmul.f32 %v3237_v51, %v1052_v34  ;;  %v1259_v56 = vmul.f32 %v3237_v51, %v1051_v14  ;;  %v688_v34 = vmul.f32 %v3909_v7, %v3909_v7  ;;  %v3941_v17 = vmul.f32 0.0078125, %v483_v9 }
 0x136   : > { %v919_v14 = vadd.f32 %v918_v1, %v680_v12  ;;  %v894_v7 = vadd.f32 %v893_v47, %v892_v53  ;;  %v3937_v12 = vsub.f32 %v5029_v28, %v3834_v11  ;;  %v5032_v53 = vld [vmem:[#allocation14_spill] sm:$0xff]  ;;  %v3954_v9 = vsub.f32 %v5033_v55, %v3834_v11  ;;  %v5040_v55 = vld [vmem:[#allocation93_spill] sm:$0xff] }
 0x137   : > { %v1468_v10 = vadd.f32 %v3557_v20, %v1260_v44  ;;  %v1467_v39 = vadd.f32 %v3557_v20, %v1259_v56  ;;  %v872_v44 = vrot.slane %v871_v5, 1  ;;  %v5028_v56 = vld [vmem:[#allocation12_spill] sm:$0xff]  ;;  %v1475_v20 = vadd.f32 %v3589_v37, %v1267_v45 }
 0x138   : > { %v1076_v38 = vmul.f32 %v3733_v13, %v5028_v56  ;;  %5030 = vst [vmem:[#allocation72_spill] sm:$0xff] %v3937_v12  ;;  %v920_v1 = vadd.f32 %v919_v14, %v688_v34  ;;  %v1084_v45 = vmul.f32 %v3733_v13, %v5032_v53  ;;  %v1484_v56 = vadd.f32 %v3615_v6, %v1276_v52  ;;  %v5038_v52 = vld [vmem:[#allocation18_spill] sm:$0xff] }
 0x139   : > { %1639 = vxpose.xlu1.b32.cont [7/16] %v1460_v48, 128  ;;  %1607 = vxpose.xlu0.b32.cont [7/16] %v1459_v21, 128  ;;  %v5027_v48 = vld [vmem:[#allocation13_spill] sm:$0xff]  ;;  %v942_v14 = vmul.f32 0.0078125, %v894_v7  ;;  %5034 = vst [vmem:[#allocation42_spill] sm:$0xff] %v3954_v9  ;;  %v1083_v7 = vmul.f32 %v3750_v49, %v5038_v52 }
 0x13a   : > { %v1067_v21 = vmul.f32 %v3750_v49, %v5027_v48  ;;  %v873_v48 = vadd.f32 %v872_v44, %v871_v5  ;;  %v1284_v47 = vmul.f32 %v4945_v33, %v1076_v38  ;;  %v921_v5 = vadd.f32 %v920_v1, %v696_v26  ;;  %v5036_v38 = vld [vmem:[#allocation88_spill] sm:$0xff] }
 0x13b   : > { %v1292_v1 = vmul.f32 %v4951_v30, %v1084_v45 }
 0x13c   : > { %v941_v53 = vmul.f32 0.0078125, %v873_v48  ;;  %v1492_v26 = vadd.f32 %v3640_v59, %v1284_v47  ;;  %v712_v48 = vmul.f32 %v3954_v9, %v3954_v9 }
 0x13d   : > { %1640 = vxpose.xlu1.b32.cont [8/16] %v1468_v10, 128  ;;  %1608 = vxpose.xlu0.b32.cont [8/16] %v1467_v39, 128  ;;  %v1275_v10 = vmul.f32 %v4939_v18, %v1067_v21  ;;  %v5031_v39 = vld [vmem:[#allocation83_spill] sm:$0xff]  ;;  %v704_v21 = vmul.f32 %v3937_v12, %v3937_v12  ;;  %v5041_v12 = vld [vmem:[#allocation90_spill] sm:$0xff] }
 0x13e   : > { %v1075_v46 = vmul.f32 %v3750_v49, %v5031_v39  ;;  %v3980_v52 = vsub.f32 %v5041_v12, %v3834_v11  ;;  %v949_v9 = vadd.f32 1e-05, %v941_v53 }
 0x13f   : > { %v1483_v34 = vadd.f32 %v3615_v6, %v1275_v10  ;;  %v5039_v10 = vld [vmem:[#allocation17_spill] sm:$0xff] }
 0x140   : > { %v1283_v28 = vmul.f32 %v4945_v33, %v1075_v46  ;;  %v1092_v39 = vmul.f32 %v3733_v13, %v5039_v10  ;;  %v950_v46 = vadd.f32 1e-05, %v942_v14  ;;  %5042 = vst [vmem:[#allocation44_spill] sm:$0xff] %v3980_v52  ;;  %v1291_v14 = vmul.f32 %v4951_v30, %v1083_v7 }
 0x141   : > { %1641 = vxpose.xlu1.b32.cont [9/16] %v1476_v4, 128  ;;  %1609 = vxpose.xlu0.b32.cont [9/16] %v1475_v20, 128  ;;  %v5035_v20 = vld [vmem:[#allocation87_spill] sm:$0xff]  ;;  %v3964_v4 = vsub.f32 %v5036_v38, %v3941_v17  ;;  %v720_v53 = vmul.f32 %v3980_v52, %v3980_v52 }
 0x142   : > { %v3960_v44 = vsub.f32 %v5035_v20, %v3941_v17  ;;  %v3975_v20 = vsub.f32 %v5040_v55, %v3941_v17  ;;  %v1491_v38 = vadd.f32 %v3640_v59, %v1283_v28  ;;  %v5044_v28 = vld [vmem:[#allocation94_spill] sm:$0xff]  ;;  %v5045_v55 = vld [vmem:[#allocation21_spill] sm:$0xff]  ;;  %v1499_v7 = vadd.f32 %v3662_v23, %v1291_v14  ;;  %v5050_v14 = vld [vmem:[#allocation100_spill] sm:$0xff] }
 0x143   : > { %5037 = vst [vmem:[#allocation89_spill] sm:$0xff] %v3964_v4  ;;  %v655_v10 = vmul.f32 %v3964_v4, %v3964_v4  ;;  %v1091_v12 = vmul.f32 %v3750_v49, %v5044_v28  ;;  %v1100_v8 = vmul.f32 %v3733_v13, %v5045_v55  ;;  %2118 = vrsqrt.f32 %v950_v46  ;;  %v5047_v28 = vld [vmem:[#allocation96_spill] sm:$0xff] }
 0x144   : > { %v647_v45 = vmul.f32 %v3960_v44, %v3960_v44  ;;  %v4007_v4 = vsub.f32 %v5047_v28, %v3834_v11  ;;  %v1300_v55 = vmul.f32 %v4956_v16, %v1092_v39  ;;  %v1099_v28 = vmul.f32 %v3750_v49, %v5050_v14 }
 0x145   : > { %1642 = vxpose.xlu1.b32.cont [10/16] %v1484_v56, 128  ;;  %1610 = vxpose.xlu0.b32.cont [10/16] %v1483_v34, 128  ;;  %v922_v56 = vadd.f32 %v921_v5, %v704_v21  ;;  %v5043_v34 = vld [vmem:[#allocation99_spill] sm:$0xff]  ;;  %v1500_v21 = vadd.f32 %v3662_v23, %v1292_v1  ;;  %v4000_v5 = vsub.f32 %v3362_v54, %v3941_v17  ;;  %2120 = vrsqrt.f32 %v949_v9 }
 0x146   : > { %v3986_v47 = vsub.f32 %v5043_v34, %v3941_v17  ;;  %v663_v34 = vmul.f32 %v3975_v20, %v3975_v20  ;;  %5048 = vst [vmem:[#allocation46_spill] sm:$0xff] %v4007_v4  ;;  %v4013_v1 = vsub.f32 %v3405_v19, %v3941_v17  ;;  %v1299_v46 = vmul.f32 %v4956_v16, %v1091_v12 }
 0x147   : > { %5046 = vst [vmem:[#allocation75_spill] sm:$0xff] %v4000_v5  ;;  %v679_v19 = vmul.f32 %v4000_v5, %v4000_v5  ;;  %v728_v9 = vmul.f32 %v4007_v4, %v4007_v4  ;;  %v1107_v14 = vmul.f32 %v3750_v49, %v3370_v40 }
 0x148   : > { %5049 = vst [vmem:[#allocation95_spill] sm:$0xff] %v4013_v1  ;;  %v671_v54 = vmul.f32 %v3986_v47, %v3986_v47  ;;  %v1507_v39 = vadd.f32 %v3681_v25, %v1299_v46  ;;  %v1108_v46 = vmul.f32 %v3733_v13, %v3351_v29 }
 0x149   : > { %1643 = vxpose.xlu1.b32.cont [11/16] %v1492_v26, 128  ;;  %1611 = vxpose.xlu0.b32.cont [11/16] %v1491_v38, 128  ;;  %v923_v26 = vadd.f32 %v922_v56, %v712_v48  ;;  %v895_v38 = vadd.f32 %v655_v10, %v647_v45  ;;  %v4023_v48 = vsub.f32 %v3426_v35, %v3941_v17  ;;  %v5052_v10 = vld [vmem:[#allocation101_spill] sm:$0xff] }
 0x14a   : > { %v1508_v45 = vadd.f32 %v3681_v25, %v1300_v55  ;;  %v4031_v12 = vsub.f32 %v5052_v10, %v3834_v11  ;;  %v4037_v35 = vsub.f32 %v3459_v2, %v3941_v17  ;;  %v1307_v55 = vmul.f32 %v4967_v32, %v1099_v28 }
 0x14b   : > { %5051 = vst [vmem:[#allocation47_spill] sm:$0xff] %v4023_v48  ;;  %v896_v56 = vadd.f32 %v895_v38, %v663_v34  ;;  %v1308_v38 = vmul.f32 %v4967_v32, %v1100_v8  ;;  %v4049_v2 = vsub.f32 %v3638_v42, %v3941_v17 }
 0x14c   : > { %5053 = vst [vmem:[#allocation49_spill] sm:$0xff] %v4031_v12  ;;  %5054 = vst [vmem:[#allocation50_spill] sm:$0xff] %v4037_v35  ;;  %v736_v40 = vmul.f32 %v4031_v12, %v4031_v12  ;;  %v703_v10 = vmul.f32 %v4037_v35, %v4037_v35 }
 0x14d   : > { %1644 = vxpose.xlu1.b32.cont [12/16] %v1500_v21, 128  ;;  %1612 = vxpose.xlu0.b32.cont [12/16] %v1499_v7, 128  ;;  %v924_v21 = vadd.f32 %v923_v26, %v720_v53  ;;  %v687_v7 = vmul.f32 %v4013_v1, %v4013_v1  ;;  %v897_v34 = vadd.f32 %v896_v56, %v671_v54  ;;  %v5056_v54 = vld [vmem:[#allocation57_spill] sm:$0xff]  ;;  %v5057_v56 = vld [vmem:[#allocation27_spill] sm:$0xff] }
 0x14e   : > { %5055 = vst [vmem:[#allocation54_spill] sm:$0xff] %v4049_v2  ;;  %v695_v53 = vmul.f32 %v4023_v48, %v4023_v48  ;;  %v1516_v8 = vadd.f32 %v5056_v54, %v1308_v38  ;;  %v1515_v28 = vadd.f32 %v5056_v54, %v1307_v55  ;;  %v4057_v29 = vsub.f32 %v5057_v56, %v3834_v11  ;;  %v5061_v38 = vld [vmem:[#allocation102_spill] sm:$0xff]  ;;  %v5062_v56 = vld [vmem:[#allocation103_spill] sm:$0xff]  ;;  %v5063_v48 = vld [vmem:[#allocation16_spill] sm:$0xff] }
 0x14f   : > { %v898_v26 = vadd.f32 %v897_v34, %v679_v19  ;;  %v4067_v34 = vpop.eup %2118  ;;  %v1316_v55 = vmul.f32 %v5061_v38, %v1108_v46  ;;  %v1315_v4 = vmul.f32 %v5061_v38, %v1107_v14  ;;  %v1116_v52 = vmul.f32 %v3733_v13, %v5062_v56  ;;  %v5066_v46 = vld [vmem:[#allocation69_spill] sm:$0xff]  ;;  %v5067_v13 = vld [vmem:[#allocation26_spill] sm:$0xff]  ;;  %v5072_v1 = vld [vmem:[#allocation39_spill] sm:$0xff] }
 0x150   : > { %5058 = vst [vmem:[#allocation52_spill] sm:$0xff] %v4057_v29  ;;  %v4081_v12 = vpop.eup %2120  ;;  %v4087_v56 = vsub.f32 %v5067_v13, %v3834_v11  ;;  %v4103_v5 = vsub.f32 %v5072_v1, %v3941_v17 }
 0x151   : > { %1645 = vxpose.xlu1.b32.cont [13/16] %v1508_v45, 128  ;;  %1613 = vxpose.xlu0.b32.cont [13/16] %v1507_v39, 128  ;;  %v925_v45 = vadd.f32 %v924_v21, %v728_v9  ;;  %v5059_v39 = vld [vmem:[#allocation36_spill] sm:$0xff]  ;;  %v899_v19 = vadd.f32 %v898_v26, %v687_v7  ;;  %v1115_v9 = vmul.f32 %v3750_v49, %v5063_v48 }
 0x152   : > { %v4063_v42 = vsub.f32 %v5059_v39, %v3941_v17  ;;  %v5064_v21 = vld [vmem:[#allocation92_spill] sm:$0xff]  ;;  %v711_v7 = vmul.f32 %v4049_v2, %v4049_v2  ;;  %v1524_v14 = vadd.f32 %v5066_v46, %v1316_v55  ;;  %v1523_v35 = vadd.f32 %v5066_v46, %v1315_v4  ;;  %5068 = vst [vmem:[#allocation59_spill] sm:$0xff] %v4087_v56  ;;  %v5071_v2 = vld [vmem:[#allocation29_spill] sm:$0xff] }
 0x153   : > { %v4077_v39 = vsub.f32 %v5064_v21, %v3941_v17  ;;  %v900_v26 = vadd.f32 %v899_v19, %v695_v53  ;;  %v744_v49 = vmul.f32 %v4057_v29, %v4057_v29  ;;  %v926_v48 = vadd.f32 %v925_v45, %v736_v40  ;;  %v5070_v21 = vld [vmem:[#allocation15_spill] sm:$0xff]  ;;  %v5073_v40 = vld [vmem:[#allocation30_spill] sm:$0xff] }
 0x154   : > { %5060 = vst [vmem:[#allocation53_spill] sm:$0xff] %v4063_v42  ;;  %v719_v53 = vmul.f32 %v4063_v42, %v4063_v42  ;;  %v1324_v55 = vmul.f32 %v5070_v21, %v1116_v52  ;;  %v1323_v4 = vmul.f32 %v5070_v21, %v1115_v9  ;;  %v998_v13 = vmul.f32 %v4067_v34, %v5071_v2  ;;  %v5079_v42 = vld [vmem:[#allocation31_spill] sm:$0xff] }
 0x155   : > { %1646 = vxpose.xlu1.b32.cont [14/16] %v1516_v8, 128  ;;  %1614 = vxpose.xlu0.b32.cont [14/16] %v1515_v28, 128  ;;  %5065 = vst [vmem:[#allocation56_spill] sm:$0xff] %v4077_v39  ;;  %v5069_v8 = vld [vmem:[#allocation91_spill] sm:$0xff]  ;;  %v901_v19 = vadd.f32 %v900_v26, %v703_v10  ;;  %v997_v45 = vmul.f32 %v4081_v12, %v5073_v40 }
 0x156   : > { %v4093_v28 = vsub.f32 %v5069_v8, %v3941_v17  ;;  %v727_v8 = vmul.f32 %v4077_v39, %v4077_v39  ;;  %v1532_v52 = vadd.f32 %v3761_v15, %v1324_v55  ;;  %v1531_v9 = vadd.f32 %v3761_v15, %v1323_v4  ;;  %v5074_v26 = vld [vmem:[#allocation19_spill] sm:$0xff]  ;;  %v5078_v39 = vld [vmem:[#allocation20_spill] sm:$0xff] }
 0x157   : > { %v902_v10 = vadd.f32 %v901_v19, %v711_v7  ;;  %v4113_v2 = vsub.f32 %v5074_v26, %v3834_v11  ;;  %v752_v1 = vmul.f32 %v4087_v56, %v4087_v56  ;;  %v5077_v19 = vld [vmem:[#allocation71_spill] sm:$0xff]  ;;  %v1006_v4 = vmul.f32 %v4067_v34, %v5078_v39 }
 0x158   : > { %v735_v40 = vmul.f32 %v4093_v28, %v4093_v28  ;;  %v1206_v55 = vmul.f32 %v5077_v19, %v998_v13  ;;  %v1005_v26 = vmul.f32 %v4081_v12, %v5079_v42  ;;  %v4130_v56 = vsub.f32 %v3798_v36, %v3941_v17 }
 0x159   : > { %1647 = vxpose.xlu1.b32.cont [15/16] %v1524_v14, 128  ;;  %1615 = vxpose.xlu0.b32.cont [15/16] %v1523_v35, 128  ;;  %5075 = vst [vmem:[#allocation58_spill] sm:$0xff] %v4113_v2  ;;  %v927_v14 = vadd.f32 %v926_v48, %v744_v49  ;;  %v5076_v35 = vld [vmem:[#allocation77_spill] sm:$0xff]  ;;  %v903_v7 = vadd.f32 %v902_v10, %v719_v53  ;;  %v5080_v10 = vld [vmem:[#allocation22_spill] sm:$0xff] }
 0x15a   : > { %v4119_v29 = vsub.f32 %v5076_v35, %v3941_v17  ;;  %v1205_v49 = vmul.f32 %v5077_v19, %v997_v45  ;;  %v743_v48 = vmul.f32 %v4103_v5, %v4103_v5  ;;  %v1414_v13 = vadd.f32 %v3383_v41, %v1206_v55  ;;  %v5082_v55 = vld [vmem:[#allocation32_spill] sm:$0xff] }
 0x15b   : > { %v904_v53 = vadd.f32 %v903_v7, %v727_v8  ;;  %v4138_v39 = vsub.f32 %v5080_v10, %v3834_v11  ;;  %v760_v42 = vmul.f32 %v4113_v2, %v4113_v2  ;;  %v1214_v35 = vmul.f32 %v3176_v31, %v1006_v4  ;;  %v5081_v8 = vld [vmem:[#allocation104_spill] sm:$0xff] }
 0x15c   : > { %v1413_v36 = vadd.f32 %v3383_v41, %v1205_v49  ;;  %v751_v45 = vmul.f32 %v4119_v29, %v4119_v29  ;;  %v1014_v7 = vmul.f32 %v4067_v34, %v5081_v8  ;;  %v1013_v11 = vmul.f32 %v4081_v12, %v5082_v55 }
 0x15d   : > { %1648 = vxpose.xlu1.b32.end [16/16] %v1532_v52, 128  ;;  %1616 = vxpose.xlu0.b32.end [16/16] %v1531_v9, 128  ;;  %v928_v52 = vadd.f32 %v927_v14, %v752_v1  ;;  %v905_v9 = vadd.f32 %v904_v53, %v735_v40  ;;  %v4152_v10 = vsub.f32 %v3822_v61, %v3941_v17 }
 0x15e   : > { %v1213_v14 = vmul.f32 %v3176_v31, %v1005_v26  ;;  %v759_v40 = vmul.f32 %v4130_v56, %v4130_v56  ;;  %v768_v61 = vmul.f32 %v4138_v39, %v4138_v39  ;;  %v1422_v17 = vadd.f32 %v3391_v43, %v1214_v35 }
 0x15f   : > { %v906_v4 = vadd.f32 %v905_v9, %v743_v48  ;;  %v929_v49 = vadd.f32 %v928_v52, %v760_v42  ;;  %v1222_v48 = vmul.f32 %v3147_v24, %v1014_v7  ;;  %v1221_v55 = vmul.f32 %v3147_v24, %v1013_v11 }
 0x160   : > { %v1421_v26 = vadd.f32 %v3391_v43, %v1213_v14  ;;  %v5085_v14 = vld [vmem:[#allocation105_spill] sm:$0xff] }
 0x161   : > { %1697 = vxpose.xlu1.b32.start [1/16] %v1414_v13, 128  ;;  %v1585_v2 = vpop.trf.xlu1  ;;  %1665 = vxpose.xlu0.b32.start [1/16] %v1413_v36, 128  ;;  %v1553_v1 = vpop.trf.xlu0  ;;  %v907_v53 = vadd.f32 %v906_v4, %v751_v45  ;;  %v5083_v13 = vld [vmem:[#allocation23_spill] sm:$0xff]  ;;  %v1430_v52 = vadd.f32 %v3419_v50, %v1222_v48  ;;  %v1429_v45 = vadd.f32 %v3419_v50, %v1221_v55 }
 0x162   : > { %1809 = vst [vmem:[%s4159_s21 + $0x80] sm:$0xff] %v1585_v2  ;;  %1793 = vst [vmem:[%s4159_s21] sm:$0xff] %v1553_v1  ;;  %v1022_v36 = vmul.f32 %v4067_v34, %v5083_v13  ;;  %v767_v2 = vmul.f32 %v4152_v10, %v4152_v10  ;;  %v5084_v1 = vld [vmem:[#allocation33_spill] sm:$0xff]  ;;  %v930_v7 = vadd.f32 %v929_v49, %v768_v61 }
 0x163   : > { %v1021_v35 = vmul.f32 %v4081_v12, %v5084_v1  ;;  %v908_v42 = vadd.f32 %v907_v53, %v759_v40  ;;  %v1030_v4 = vmul.f32 %v4067_v34, %v5085_v14  ;;  %v5086_v53 = vld [vmem:[#allocation34_spill] sm:$0xff] }
 0x164   : > { %v1230_v13 = vmul.f32 %v3174_v60, %v1022_v36  ;;  %v931_v48 = vrot.slane %v930_v7, 4 }
 0x165   : > { %1698 = vxpose.xlu1.b32.cont [2/16] %v1422_v17, 128  ;;  %v1586_v9 = vpop.trf.xlu1  ;;  %1666 = vxpose.xlu0.b32.cont [2/16] %v1421_v26, 128  ;;  %v1554_v8 = vpop.trf.xlu0  ;;  %v909_v17 = vadd.f32 %v908_v42, %v767_v2  ;;  %v1229_v40 = vmul.f32 %v3174_v60, %v1021_v35  ;;  %v5087_v2 = vld [vmem:[#allocation106_spill] sm:$0xff]  ;;  %v1238_v35 = vmul.f32 %v3204_v63, %v1030_v4 }
 0x166   : > { %1810 = vst [vmem:[%s4159_s21 + $0x88] sm:$0xff] %v1586_v9  ;;  %1794 = vst [vmem:[%s4159_s21 + $0x8] sm:$0xff] %v1554_v8  ;;  %v1029_v9 = vmul.f32 %v4081_v12, %v5086_v53  ;;  %v1438_v61 = vadd.f32 %v3446_v58, %v1230_v13  ;;  %v1038_v8 = vmul.f32 %v4067_v34, %v5087_v2  ;;  %v5089_v13 = vld [vmem:[#allocation24_spill] sm:$0xff] }
 0x167   : > { %v1437_v49 = vadd.f32 %v3446_v58, %v1229_v40  ;;  %v910_v55 = vrot.slane %v909_v17, 4  ;;  %v1446_v14 = vadd.f32 %v3471_v27, %v1238_v35  ;;  %v1046_v40 = vmul.f32 %v4067_v34, %v5089_v13  ;;  %v5090_v2 = vld [vmem:[#allocation40_spill] sm:$0xff] }
 0x168   : > { %v1237_v42 = vmul.f32 %v3204_v63, %v1029_v9 }
 0x169   : > { %1699 = vxpose.xlu1.b32.cont [3/16] %v1430_v52, 128  ;;  %v1587_v26 = vpop.trf.xlu1  ;;  %1667 = vxpose.xlu0.b32.cont [3/16] %v1429_v45, 128  ;;  %v1555_v11 = vpop.trf.xlu0  ;;  %v5088_v52 = vld [vmem:[#allocation35_spill] sm:$0xff]  ;;  %v911_v53 = vadd.f32 %v910_v55, %v909_v17  ;;  %v1254_v55 = vmul.f32 %v3239_v57, %v1046_v40 }
 0x16a   : > { %1811 = vst [vmem:[%s4159_s21 + $0x90] sm:$0xff] %v1587_v26  ;;  %1795 = vst [vmem:[%s4159_s21 + $0x10] sm:$0xff] %v1555_v11  ;;  %v1037_v45 = vmul.f32 %v4081_v12, %v5088_v52  ;;  %v1445_v26 = vadd.f32 %v3471_v27, %v1237_v42  ;;  %v932_v11 = vadd.f32 %v931_v48, %v930_v7  ;;  %v5091_v52 = vld [vmem:[#allocation107_spill] sm:$0xff] }
 0x16b   : > { %v1462_v13 = vadd.f32 %v3529_v22, %v1254_v55 }
 0x16c   : > { %v933_v17 = vrot.slane %v932_v11, 2 }
 0x16d   : > { %1700 = vxpose.xlu1.b32.cont [4/16] %v1438_v61, 128  ;;  %v1588_v36 = vpop.trf.xlu1  ;;  %1668 = vxpose.xlu0.b32.cont [4/16] %v1437_v49, 128  ;;  %v1556_v1 = vpop.trf.xlu0  ;;  %v1246_v61 = vmul.f32 %v3202_v0, %v1038_v8  ;;  %v1245_v49 = vmul.f32 %v3202_v0, %v1037_v45  ;;  %v1054_v45 = vmul.f32 %v4067_v34, %v5091_v52  ;;  %v5094_v52 = vld [vmem:[#allocation86_spill] sm:$0xff] }
 0x16e   : > { %1812 = vst [vmem:[%s4159_s21 + $0x98] sm:$0xff] %v1588_v36  ;;  %1796 = vst [vmem:[%s4159_s21 + $0x18] sm:$0xff] %v1556_v1  ;;  %v1045_v36 = vmul.f32 %v4081_v12, %v5090_v2  ;;  %v912_v1 = vrot.slane %v911_v53, 2 }
 0x16f   : > { %v1454_v7 = vadd.f32 %v3501_v62, %v1246_v61  ;;  %v1453_v48 = vadd.f32 %v3501_v62, %v1245_v49 }
 0x170   : > { %v1253_v42 = vmul.f32 %v3239_v57, %v1045_v36  ;;  %v913_v49 = vadd.f32 %v912_v1, %v911_v53  ;;  %v5096_v1 = vld [vmem:[#allocation109_spill] sm:$0xff] }
 0x171   : > { %1701 = vxpose.xlu1.b32.cont [5/16] %v1446_v14, 128  ;;  %v1589_v4 = vpop.trf.xlu1  ;;  %1669 = vxpose.xlu0.b32.cont [5/16] %v1445_v26, 128  ;;  %v1557_v9 = vpop.trf.xlu0  ;;  %v5092_v14 = vld [vmem:[#allocation45_spill] sm:$0xff] }
 0x172   : > { %1813 = vst [vmem:[%s4159_s21 + $0xa0] sm:$0xff] %v1589_v4  ;;  %1797 = vst [vmem:[%s4159_s21 + $0x20] sm:$0xff] %v1557_v9  ;;  %v1053_v26 = vmul.f32 %v4081_v12, %v5092_v14  ;;  %v1461_v40 = vadd.f32 %v3529_v22, %v1253_v42  ;;  %v934_v4 = vadd.f32 %v933_v17, %v932_v11  ;;  %v5093_v9 = vld [vmem:[#allocation108_spill] sm:$0xff]  ;;  %v914_v42 = vrot.slane %v913_v49, 1 }
 0x173   : > { %v1062_v61 = vmul.f32 %v4067_v34, %v5093_v9  ;;  %v5095_v11 = vld [vmem:[#allocation28_spill] sm:$0xff] }
 0x174   : > { %v935_v53 = vrot.slane %v934_v4, 1 }
 0x175   : > { %1702 = vxpose.xlu1.b32.cont [6/16] %v1454_v7, 128  ;;  %v1590_v35 = vpop.trf.xlu1  ;;  %1670 = vxpose.xlu0.b32.cont [6/16] %v1453_v48, 128  ;;  %v1558_v8 = vpop.trf.xlu0  ;;  %v1262_v7 = vmul.f32 %v3237_v51, %v1054_v45  ;;  %v1261_v48 = vmul.f32 %v3237_v51, %v1053_v26  ;;  %v1270_v26 = vmul.f32 %v3263_v3, %v1062_v61 }
 0x176   : > { %1814 = vst [vmem:[%s4159_s21 + $0xa8] sm:$0xff] %v1590_v35  ;;  %1798 = vst [vmem:[%s4159_s21 + $0x28] sm:$0xff] %v1558_v8  ;;  %v1061_v35 = vmul.f32 %v4081_v12, %v5094_v52  ;;  %v1070_v8 = vmul.f32 %v4067_v34, %v5096_v1 }
 0x177   : > { %v1470_v17 = vadd.f32 %v5095_v11, %v1262_v7  ;;  %v1469_v55 = vadd.f32 %v5095_v11, %v1261_v48  ;;  %v936_v7 = vadd.f32 %v935_v53, %v934_v4  ;;  %v5098_v48 = vld [vmem:[#allocation25_spill] sm:$0xff] }
 0x178   : > { %v1078_v52 = vmul.f32 %v4067_v34, %v5098_v48 }
 0x179   : > { %1703 = vxpose.xlu1.b32.cont [7/16] %v1462_v13, 128  ;;  %v1591_v2 = vpop.trf.xlu1  ;;  %1671 = vxpose.xlu0.b32.cont [7/16] %v1461_v40, 128  ;;  %v1559_v36 = vpop.trf.xlu0  ;;  %v1269_v13 = vmul.f32 %v3263_v3, %v1061_v35  ;;  %v5097_v40 = vld [vmem:[#allocation48_spill] sm:$0xff] }
 0x17a   : > { %1815 = vst [vmem:[%s4159_s21 + $0xb0] sm:$0xff] %v1591_v2  ;;  %1799 = vst [vmem:[%s4159_s21 + $0x30] sm:$0xff] %v1559_v36  ;;  %v1069_v9 = vmul.f32 %v4081_v12, %v5097_v40  ;;  %v1478_v2 = vadd.f32 %v3589_v37, %v1270_v26  ;;  %v5099_v40 = vld [vmem:[#allocation51_spill] sm:$0xff] }
 0x17b   : > { %v1477_v36 = vadd.f32 %v3589_v37, %v1269_v13 }
 0x17c   : > { %v1277_v1 = vmul.f32 %v4939_v18, %v1069_v9  ;;  %v1286_v9 = vmul.f32 %v4945_v33, %v1078_v52 }
 0x17d   : > { %1704 = vxpose.xlu1.b32.cont [8/16] %v1470_v17, 128  ;;  %v1592_v45 = vpop.trf.xlu1  ;;  %1672 = vxpose.xlu0.b32.cont [8/16] %v1469_v55, 128  ;;  %v1560_v14 = vpop.trf.xlu0  ;;  %v915_v17 = vadd.f32 %v914_v42, %v913_v49  ;;  %v1278_v55 = vmul.f32 %v4939_v18, %v1070_v8  ;;  %v944_v49 = vmul.f32 0.0078125, %v936_v7  ;;  %v5100_v42 = vld [vmem:[#allocation37_spill] sm:$0xff] }
 0x17e   : > { %1816 = vst [vmem:[%s4159_s21 + $0xb8] sm:$0xff] %v1592_v45  ;;  %1800 = vst [vmem:[%s4159_s21 + $0x38] sm:$0xff] %v1560_v14  ;;  %v1077_v45 = vmul.f32 %v4081_v12, %v5099_v40  ;;  %v1485_v53 = vadd.f32 %v3615_v6, %v1277_v1  ;;  %v1086_v14 = vmul.f32 %v4067_v34, %v5100_v42 }
 0x17f   : > { %v1486_v4 = vadd.f32 %v3615_v6, %v1278_v55  ;;  %v943_v26 = vmul.f32 0.0078125, %v915_v17  ;;  %v1494_v7 = vadd.f32 %v3640_v59, %v1286_v9  ;;  %v952_v17 = vadd.f32 1e-05, %v944_v49 }
 0x181   : > { %1705 = vxpose.xlu1.b32.cont [9/16] %v1478_v2, 128  ;;  %v1593_v61 = vpop.trf.xlu1  ;;  %1673 = vxpose.xlu0.b32.cont [9/16] %v1477_v36, 128  ;;  %v1561_v35 = vpop.trf.xlu0  ;;  %v1285_v2 = vmul.f32 %v4945_v33, %v1077_v45  ;;  %v5101_v36 = vld [vmem:[#allocation62_spill] sm:$0xff]  ;;  %v951_v1 = vadd.f32 1e-05, %v943_v26  ;;  %v1294_v45 = vmul.f32 %v4951_v30, %v1086_v14  ;;  %2122 = vrsqrt.f32 %v952_v17  ;;  %v5104_v26 = vld [vmem:[#allocation73_spill] sm:$0xff] }
 0x182   : > { %1817 = vst [vmem:[%s4159_s21 + $0xc0] sm:$0xff] %v1593_v61  ;;  %1801 = vst [vmem:[%s4159_s21 + $0x40] sm:$0xff] %v1561_v35  ;;  %v1085_v48 = vmul.f32 %v4081_v12, %v5101_v36  ;;  %v5102_v35 = vld [vmem:[#allocation38_spill] sm:$0xff] }
 0x183   : > { %v1493_v61 = vadd.f32 %v3640_v59, %v1285_v2  ;;  %v1094_v55 = vmul.f32 %v4067_v34, %v5102_v35  ;;  %v1502_v49 = vadd.f32 %v3662_v23, %v1294_v45  ;;  %2124 = vrsqrt.f32 %v951_v1 }
 0x185   : > { %1706 = vxpose.xlu1.b32.cont [10/16] %v1486_v4, 128  ;;  %v1594_v8 = vpop.trf.xlu1  ;;  %1674 = vxpose.xlu0.b32.cont [10/16] %v1485_v53, 128  ;;  %v1562_v13 = vpop.trf.xlu0  ;;  %v1293_v4 = vmul.f32 %v4951_v30, %v1085_v48  ;;  %v5103_v53 = vld [vmem:[#allocation98_spill] sm:$0xff]  ;;  %v1302_v2 = vmul.f32 %v4956_v16, %v1094_v55  ;;  %v5105_v48 = vld [vmem:[#allocation55_spill] sm:$0xff] }
 0x186   : > { %1818 = vst [vmem:[%s4159_s21 + $0xc8] sm:$0xff] %v1594_v8  ;;  %1802 = vst [vmem:[%s4159_s21 + $0x48] sm:$0xff] %v1562_v13  ;;  %v1093_v42 = vmul.f32 %v4081_v12, %v5103_v53  ;;  %v1102_v13 = vmul.f32 %v4067_v34, %v5104_v26 }
 0x187   : > { %v1501_v8 = vadd.f32 %v3662_v23, %v1293_v4  ;;  %v5107_v4 = vld [vmem:[#allocation60_spill] sm:$0xff] }
 0x188   : > { %v1301_v36 = vmul.f32 %v4956_v16, %v1093_v42  ;;  %v1310_v35 = vmul.f32 %v4967_v32, %v1102_v13  ;;  %v1109_v53 = vmul.f32 %v4081_v12, %v5107_v4 }
 0x189   : > { %1707 = vxpose.xlu1.b32.cont [11/16] %v1494_v7, 128  ;;  %v1595_v52 = vpop.trf.xlu1  ;;  %1675 = vxpose.xlu0.b32.cont [11/16] %v1493_v61, 128  ;;  %v1563_v40 = vpop.trf.xlu0  ;;  %v1101_v7 = vmul.f32 %v4081_v12, %v5105_v48  ;;  %v1510_v61 = vadd.f32 %v3681_v25, %v1302_v2  ;;  %v5109_v48 = vld [vmem:[#allocation66_spill] sm:$0xff] }
 0x18a   : > { %1819 = vst [vmem:[%s4159_s21 + $0xd0] sm:$0xff] %v1595_v52  ;;  %1803 = vst [vmem:[%s4159_s21 + $0x50] sm:$0xff] %v1563_v40  ;;  %v1509_v17 = vadd.f32 %v3681_v25, %v1301_v36  ;;  %v5106_v40 = vld [vmem:[#allocation97_spill] sm:$0xff]  ;;  %v1518_v42 = vadd.f32 %v5056_v54, %v1310_v35  ;;  %v1317_v36 = vmul.f32 %v5061_v38, %v1109_v53 }
 0x18b   : > { %v1309_v55 = vmul.f32 %v4967_v32, %v1101_v7  ;;  %v1110_v45 = vmul.f32 %v4067_v34, %v5106_v40  ;;  %v4291_v13 = vpop.eup %2122  ;;  %v1117_v7 = vmul.f32 %v4081_v12, %v5109_v48  ;;  %v5110_v40 = vld [vmem:[#allocation81_spill] sm:$0xff] }
 0x18c   : > { %v1000_v12 = vmul.f32 %v4291_v13, %v5110_v40  ;;  %v5114_v40 = vld [vmem:[#allocation84_spill] sm:$0xff] }
 0x18d   : > { %1708 = vxpose.xlu1.b32.cont [12/16] %v1502_v49, 128  ;;  %v1596_v14 = vpop.trf.xlu1  ;;  %1676 = vxpose.xlu0.b32.cont [12/16] %v1501_v8, 128  ;;  %v1564_v9 = vpop.trf.xlu0  ;;  %v1517_v49 = vadd.f32 %v5056_v54, %v1309_v55  ;;  %v5108_v8 = vld [vmem:[#allocation79_spill] sm:$0xff]  ;;  %v1318_v2 = vmul.f32 %v5061_v38, %v1110_v45  ;;  %v1325_v55 = vmul.f32 %v5070_v21, %v1117_v7 }
 0x18e   : > { %1820 = vst [vmem:[%s4159_s21 + $0xd8] sm:$0xff] %v1596_v14  ;;  %1804 = vst [vmem:[%s4159_s21 + $0x58] sm:$0xff] %v1564_v9  ;;  %v1118_v26 = vmul.f32 %v4067_v34, %v5108_v8  ;;  %v5113_v7 = vld [vmem:[#allocation67_spill] sm:$0xff] }
 0x18f   : > { %v1526_v34 = vadd.f32 %v5066_v46, %v1318_v2  ;;  %v1533_v53 = vadd.f32 %v3761_v15, %v1325_v55 }
 0x190   : > { %v1326_v35 = vmul.f32 %v5070_v21, %v1118_v26 }
 0x191   : > { %1709 = vxpose.xlu1.b32.cont [13/16] %v1510_v61, 128  ;;  %v1597_v1 = vpop.trf.xlu1  ;;  %1677 = vxpose.xlu0.b32.cont [13/16] %v1509_v17, 128  ;;  %v1565_v52 = vpop.trf.xlu0  ;;  %v1525_v17 = vadd.f32 %v5066_v46, %v1317_v36 }
 0x192   : > { %1821 = vst [vmem:[%s4159_s21 + $0xe0] sm:$0xff] %v1597_v1  ;;  %1805 = vst [vmem:[%s4159_s21 + $0x60] sm:$0xff] %v1565_v52  ;;  %v4297_v61 = vpop.eup %2124  ;;  %v1534_v4 = vadd.f32 %v3761_v15, %v1326_v35 }
 0x193   : > { %v999_v45 = vmul.f32 %v4297_v61, %v3960_v44  ;;  %v5112_v44 = vld [vmem:[#allocation89_spill] sm:$0xff] }
 0x194   : > { %v1007_v2 = vmul.f32 %v4297_v61, %v5112_v44 }
 0x195   : > { %1710 = vxpose.xlu1.b32.cont [14/16] %v1518_v42, 128  ;;  %v1598_v14 = vpop.trf.xlu1  ;;  %1678 = vxpose.xlu0.b32.cont [14/16] %v1517_v49, 128  ;;  %v1566_v9 = vpop.trf.xlu0  ;;  %v5111_v42 = vld [vmem:[#allocation65_spill] sm:$0xff] }
 0x196   : > { %1822 = vst [vmem:[%s4159_s21 + $0xe8] sm:$0xff] %v1598_v14  ;;  %1806 = vst [vmem:[%s4159_s21 + $0x68] sm:$0xff] %v1566_v9  ;;  %v1008_v49 = vmul.f32 %v4291_v13, %v5111_v42  ;;  %v1208_v14 = vmul.f32 %v5077_v19, %v1000_v12  ;;  %v1207_v9 = vmul.f32 %v5077_v19, %v999_v45 }
 0x197   : > { %v1215_v19 = vmul.f32 %v3176_v31, %v1007_v2  ;;  %v1024_v12 = vmul.f32 %v4291_v13, %v5114_v40 }
 0x198   : > { %v1416_v36 = vadd.f32 %v3383_v41, %v1208_v14  ;;  %v1415_v48 = vadd.f32 %v3383_v41, %v1207_v9 }
 0x199   : > { %1711 = vxpose.xlu1.b32.cont [15/16] %v1526_v34, 128  ;;  %v1599_v1 = vpop.trf.xlu1  ;;  %1679 = vxpose.xlu0.b32.cont [15/16] %v1525_v17, 128  ;;  %v1567_v52 = vpop.trf.xlu0  ;;  %v1016_v34 = vmul.f32 %v4291_v13, %v5113_v7  ;;  %v1423_v55 = vadd.f32 %v3391_v43, %v1215_v19  ;;  %v1232_v9 = vmul.f32 %v3174_v60, %v1024_v12 }
 0x19a   : > { %1823 = vst [vmem:[%s4159_s21 + $0xf0] sm:$0xff] %v1599_v1  ;;  %1807 = vst [vmem:[%s4159_s21 + $0x70] sm:$0xff] %v1567_v52  ;;  %v1216_v1 = vmul.f32 %v3176_v31, %v1008_v49  ;;  %v1015_v52 = vmul.f32 %v4297_v61, %v3975_v20  ;;  %v1023_v20 = vmul.f32 %v4297_v61, %v3986_v47  ;;  %v5115_v49 = vld [vmem:[#allocation82_spill] sm:$0xff]  ;;  %v5116_v47 = vld [vmem:[#allocation75_spill] sm:$0xff] }
 0x19b   : > { %v1031_v44 = vmul.f32 %v4297_v61, %v5116_v47 }
 0x19c   : > { %v1424_v41 = vadd.f32 %v3391_v43, %v1216_v1  ;;  %v1223_v31 = vmul.f32 %v3147_v24, %v1015_v52  ;;  %v5119_v52 = vld [vmem:[#allocation43_spill] sm:$0xff] }
 0x19d   : > { %1712 = vxpose.xlu1.b32.end [16/16] %v1534_v4, 128  ;;  %v1600_v8 = vpop.trf.xlu1  ;;  %1680 = vxpose.xlu0.b32.end [16/16] %v1533_v53, 128  ;;  %v1568_v26 = vpop.trf.xlu0  ;;  %v1224_v53 = vmul.f32 %v3147_v24, %v1016_v34  ;;  %v1231_v24 = vmul.f32 %v3174_v60, %v1023_v20  ;;  %v1239_v60 = vmul.f32 %v3204_v63, %v1031_v44 }
 0x19e   : > { %1824 = vst [vmem:[%s4159_s21 + $0xf8] sm:$0xff] %v1600_v8  ;;  %1808 = vst [vmem:[%s4159_s21 + $0x78] sm:$0xff] %v1568_v26  ;;  %v1431_v42 = vadd.f32 %v3419_v50, %v1223_v31  ;;  %v1032_v8 = vmul.f32 %v4291_v13, %v5115_v49  ;;  %v5121_v49 = vld [vmem:[#allocation72_spill] sm:$0xff] }
 0x19f   : > { %v1432_v43 = vadd.f32 %v3419_v50, %v1224_v53  ;;  %v1440_v50 = vadd.f32 %v3446_v58, %v1232_v9  ;;  %v1439_v2 = vadd.f32 %v3446_v58, %v1231_v24  ;;  %v1447_v19 = vadd.f32 %v3471_v27, %v1239_v60  ;;  %v5123_v9 = vld [vmem:[#allocation42_spill] sm:$0xff] }
 0x1a0   : > { %v1064_v24 = vmul.f32 %v4291_v13, %v5123_v9 }
 0x1a1   : > { %1761 = vxpose.xlu1.b32.start [1/16] %v1416_v36, 128  ;;  %v1649_v17 = vpop.trf.xlu1  ;;  %1729 = vxpose.xlu0.b32.start [1/16] %v1415_v48, 128  ;;  %v1617_v35 = vpop.trf.xlu0  ;;  %v5117_v36 = vld [vmem:[#allocation41_spill] sm:$0xff] }
 0x1a2   : > { %1841 = vst [vmem:[%s4159_s21 + $0x180] sm:$0xff] %v1649_v17  ;;  %1825 = vst [vmem:[%s4159_s21 + $0x100] sm:$0xff] %v1617_v35  ;;  %v1040_v48 = vmul.f32 %v4291_v13, %v5117_v36  ;;  %v1240_v17 = vmul.f32 %v3204_v63, %v1032_v8  ;;  %v5118_v35 = vld [vmem:[#allocation95_spill] sm:$0xff]  ;;  %v5122_v8 = vld [vmem:[#allocation50_spill] sm:$0xff] }
 0x1a3   : > { %v1039_v1 = vmul.f32 %v4297_v61, %v5118_v35  ;;  %v1272_v35 = vmul.f32 %v3263_v3, %v1064_v24  ;;  %v5131_v24 = vld [vmem:[#allocation59_spill] sm:$0xff] }
 0x1a4   : > { %v1448_v58 = vadd.f32 %v3471_v27, %v1240_v17  ;;  %v1248_v12 = vmul.f32 %v3202_v0, %v1040_v48 }
 0x1a5   : > { %1762 = vxpose.xlu1.b32.cont [2/16] %v1424_v41, 128  ;;  %v1650_v45 = vpop.trf.xlu1  ;;  %1730 = vxpose.xlu0.b32.cont [2/16] %v1423_v55, 128  ;;  %v1618_v4 = vpop.trf.xlu0  ;;  %v1048_v41 = vmul.f32 %v4291_v13, %v5119_v52  ;;  %v1247_v63 = vmul.f32 %v3202_v0, %v1039_v1  ;;  %v1056_v0 = vmul.f32 %v4291_v13, %v5121_v49  ;;  %v5126_v1 = vld [vmem:[#allocation53_spill] sm:$0xff]  ;;  %v5127_v52 = vld [vmem:[#allocation46_spill] sm:$0xff] }
 0x1a6   : > { %1842 = vst [vmem:[%s4159_s21 + $0x188] sm:$0xff] %v1650_v45  ;;  %1826 = vst [vmem:[%s4159_s21 + $0x108] sm:$0xff] %v1618_v4  ;;  %v5120_v45 = vld [vmem:[#allocation47_spill] sm:$0xff]  ;;  %v1456_v27 = vadd.f32 %v3501_v62, %v1248_v12 }
 0x1a7   : > { %v1047_v4 = vmul.f32 %v4297_v61, %v5120_v45  ;;  %v1455_v53 = vadd.f32 %v3501_v62, %v1247_v63  ;;  %v1256_v31 = vmul.f32 %v3239_v57, %v1048_v41  ;;  %v1264_v44 = vmul.f32 %v3237_v51, %v1056_v0  ;;  %v5128_v63 = vld [vmem:[#allocation56_spill] sm:$0xff] }
 0x1a8   : > { %v1080_v41 = vmul.f32 %v4291_v13, %v5127_v52  ;;  %v1079_v45 = vmul.f32 %v4297_v61, %v5128_v63  ;;  %v5130_v0 = vld [vmem:[#allocation52_spill] sm:$0xff] }
 0x1a9   : > { %1763 = vxpose.xlu1.b32.cont [3/16] %v1432_v43, 128  ;;  %v1651_v26 = vpop.trf.xlu1  ;;  %1731 = vxpose.xlu0.b32.cont [3/16] %v1431_v42, 128  ;;  %v1619_v14 = vpop.trf.xlu0  ;;  %v1255_v42 = vmul.f32 %v3239_v57, %v1047_v4  ;;  %v1464_v62 = vadd.f32 %v3529_v22, %v1256_v31 }
 0x1aa   : > { %1843 = vst [vmem:[%s4159_s21 + $0x190] sm:$0xff] %v1651_v26  ;;  %1827 = vst [vmem:[%s4159_s21 + $0x110] sm:$0xff] %v1619_v14  ;;  %v1055_v26 = vmul.f32 %v4297_v61, %v5122_v8  ;;  %v1096_v8 = vmul.f32 %v4291_v13, %v5130_v0 }
 0x1ab   : > { %v1463_v14 = vadd.f32 %v3529_v22, %v1255_v42  ;;  %v1472_v22 = vadd.f32 %v5095_v11, %v1264_v44  ;;  %v1087_v42 = vmul.f32 %v4297_v61, %v4093_v28  ;;  %v1095_v28 = vmul.f32 %v4297_v61, %v4103_v5 }
 0x1ac   : > { %v1103_v5 = vmul.f32 %v4297_v61, %v4119_v29  ;;  %v1111_v29 = vmul.f32 %v4297_v61, %v4130_v56  ;;  %v1119_v56 = vmul.f32 %v4297_v61, %v4152_v10 }
 0x1ad   : > { %1764 = vxpose.xlu1.b32.cont [4/16] %v1440_v50, 128  ;;  %v1652_v7 = vpop.trf.xlu1  ;;  %1732 = vxpose.xlu0.b32.cont [4/16] %v1439_v2, 128  ;;  %v1620_v34 = vpop.trf.xlu0  ;;  %v1263_v50 = vmul.f32 %v3237_v51, %v1055_v26  ;;  %v5124_v2 = vld [vmem:[#allocation54_spill] sm:$0xff] }
 0x1ae   : > { %1844 = vst [vmem:[%s4159_s21 + $0x198] sm:$0xff] %v1652_v7  ;;  %1828 = vst [vmem:[%s4159_s21 + $0x118] sm:$0xff] %v1620_v34  ;;  %v1063_v36 = vmul.f32 %v4297_v61, %v5124_v2  ;;  %v5125_v7 = vld [vmem:[#allocation44_spill] sm:$0xff] }
 0x1af   : > { %v1471_v48 = vadd.f32 %v5095_v11, %v1263_v50  ;;  %v1072_v34 = vmul.f32 %v4291_v13, %v5125_v7  ;;  %v1480_v11 = vadd.f32 %v3589_v37, %v1272_v35  ;;  %v1304_v50 = vmul.f32 %v4956_v16, %v1096_v8 }
 0x1b0   : > { %v1271_v51 = vmul.f32 %v3263_v3, %v1063_v36  ;;  %v1311_v7 = vmul.f32 %v4967_v32, %v1103_v5 }
 0x1b1   : > { %1765 = vxpose.xlu1.b32.cont [5/16] %v1448_v58, 128  ;;  %v1653_v55 = vpop.trf.xlu1  ;;  %1733 = vxpose.xlu0.b32.cont [5/16] %v1447_v19, 128  ;;  %v1621_v40 = vpop.trf.xlu0  ;;  %v1071_v58 = vmul.f32 %v4297_v61, %v5126_v1  ;;  %v1280_v12 = vmul.f32 %v4939_v18, %v1072_v34  ;;  %v5132_v34 = vld [vmem:[#allocation58_spill] sm:$0xff]  ;;  %v1319_v1 = vmul.f32 %v5061_v38, %v1111_v29 }
 0x1b2   : > { %1845 = vst [vmem:[%s4159_s21 + $0x1a0] sm:$0xff] %v1653_v55  ;;  %1829 = vst [vmem:[%s4159_s21 + $0x120] sm:$0xff] %v1621_v40  ;;  %v1479_v19 = vadd.f32 %v3589_v37, %v1271_v51 }
 0x1b3   : > { %v1279_v3 = vmul.f32 %v4939_v18, %v1071_v58  ;;  %v1488_v37 = vadd.f32 %v3615_v6, %v1280_v12  ;;  %v1287_v18 = vmul.f32 %v4945_v33, %v1079_v45 }
 0x1b5   : > { %1766 = vxpose.xlu1.b32.cont [6/16] %v1456_v27, 128  ;;  %v1654_v20 = vpop.trf.xlu1  ;;  %1734 = vxpose.xlu0.b32.cont [6/16] %v1455_v53, 128  ;;  %v1622_v43 = vpop.trf.xlu0  ;;  %v1487_v4 = vadd.f32 %v3615_v6, %v1279_v3  ;;  %v5129_v27 = vld [vmem:[#allocation49_spill] sm:$0xff]  ;;  %v1495_v49 = vadd.f32 %v3640_v59, %v1287_v18 }
 0x1b6   : > { %1846 = vst [vmem:[%s4159_s21 + $0x1a8] sm:$0xff] %v1654_v20  ;;  %1830 = vst [vmem:[%s4159_s21 + $0x128] sm:$0xff] %v1622_v43  ;;  %v1088_v53 = vmul.f32 %v4291_v13, %v5129_v27  ;;  %v1288_v43 = vmul.f32 %v4945_v33, %v1080_v41  ;;  %v1295_v33 = vmul.f32 %v4951_v30, %v1087_v42 }
 0x1b8   : > { %v1496_v6 = vadd.f32 %v3640_v59, %v1288_v43  ;;  %v1503_v9 = vadd.f32 %v3662_v23, %v1295_v33 }
 0x1b9   : > { %1767 = vxpose.xlu1.b32.cont [7/16] %v1464_v62, 128  ;;  %v1655_v47 = vpop.trf.xlu1  ;;  %1735 = vxpose.xlu0.b32.cont [7/16] %v1463_v14, 128  ;;  %v1623_v57 = vpop.trf.xlu0  ;;  %v1296_v14 = vmul.f32 %v4951_v30, %v1088_v53  ;;  %v1303_v30 = vmul.f32 %v4956_v16, %v1095_v28  ;;  %v1112_v16 = vmul.f32 %v4291_v13, %v5132_v34 }
 0x1ba   : > { %1847 = vst [vmem:[%s4159_s21 + $0x1b0] sm:$0xff] %v1655_v47  ;;  %1831 = vst [vmem:[%s4159_s21 + $0x130] sm:$0xff] %v1623_v57  ;;  %v1104_v47 = vmul.f32 %v4291_v13, %v5131_v24 }
 0x1bb   : > { %v1504_v59 = vadd.f32 %v3662_v23, %v1296_v14  ;;  %v1512_v23 = vadd.f32 %v3681_v25, %v1304_v50  ;;  %v1511_v2 = vadd.f32 %v3681_v25, %v1303_v30  ;;  %v1320_v51 = vmul.f32 %v5061_v38, %v1112_v16 }
 0x1bc   : > { %v1312_v36 = vmul.f32 %v4967_v32, %v1104_v47  ;;  %v1327_v38 = vmul.f32 %v5070_v21, %v1119_v56 }
 0x1bd   : > { %1768 = vxpose.xlu1.b32.cont [8/16] %v1472_v22, 128  ;;  %v1656_v17 = vpop.trf.xlu1  ;;  %1736 = vxpose.xlu0.b32.cont [8/16] %v1471_v48, 128  ;;  %v1624_v60 = vpop.trf.xlu0 }
 0x1be   : > { %1848 = vst [vmem:[%s4159_s21 + $0x1b8] sm:$0xff] %v1656_v17  ;;  %1832 = vst [vmem:[%s4159_s21 + $0x138] sm:$0xff] %v1624_v60  ;;  %v1520_v25 = vadd.f32 %v5056_v54, %v1312_v36  ;;  %v1519_v17 = vadd.f32 %v5056_v54, %v1311_v7  ;;  %v1120_v60 = vmul.f32 %v4291_v13, %v4138_v39 }
 0x1bf   : > { %v1528_v54 = vadd.f32 %v5066_v46, %v1320_v51  ;;  %v1527_v39 = vadd.f32 %v5066_v46, %v1319_v1  ;;  %v1535_v61 = vadd.f32 %v3761_v15, %v1327_v38 }
 0x1c1   : > { %1769 = vxpose.xlu1.b32.cont [9/16] %v1480_v11, 128  ;;  %v1657_v55 = vpop.trf.xlu1  ;;  %1737 = vxpose.xlu0.b32.cont [9/16] %v1479_v19, 128  ;;  %v1625_v40 = vpop.trf.xlu0  ;;  %v1328_v11 = vmul.f32 %v5070_v21, %v1120_v60 }
 0x1c2   : > { %1849 = vst [vmem:[%s4159_s21 + $0x1c0] sm:$0xff] %v1657_v55  ;;  %1833 = vst [vmem:[%s4159_s21 + $0x140] sm:$0xff] %v1625_v40 }
 0x1c3   : > { %v1536_v10 = vadd.f32 %v3761_v15, %v1328_v11 }
 0x1c5   : > { %1770 = vxpose.xlu1.b32.cont [10/16] %v1488_v37, 128  ;;  %v1658_v31 = vpop.trf.xlu1  ;;  %1738 = vxpose.xlu0.b32.cont [10/16] %v1487_v4, 128  ;;  %v1626_v20 = vpop.trf.xlu0 }
 0x1c6   : > { %1850 = vst [vmem:[%s4159_s21 + $0x1c8] sm:$0xff] %v1658_v31  ;;  %1834 = vst [vmem:[%s4159_s21 + $0x148] sm:$0xff] %v1626_v20 }
 0x1c9   : > { %1771 = vxpose.xlu1.b32.cont [11/16] %v1496_v6, 128  ;;  %v1659_v26 = vpop.trf.xlu1  ;;  %1739 = vxpose.xlu0.b32.cont [11/16] %v1495_v49, 128  ;;  %v1627_v62 = vpop.trf.xlu0 }
 0x1ca   : > { %1851 = vst [vmem:[%s4159_s21 + $0x1d0] sm:$0xff] %v1659_v26  ;;  %1835 = vst [vmem:[%s4159_s21 + $0x150] sm:$0xff] %v1627_v62 }
 0x1cd   : > { %1772 = vxpose.xlu1.b32.cont [12/16] %v1504_v59, 128  ;;  %v1660_v57 = vpop.trf.xlu1  ;;  %1740 = vxpose.xlu0.b32.cont [12/16] %v1503_v9, 128  ;;  %v1628_v44 = vpop.trf.xlu0 }
 0x1ce   : > { %1852 = vst [vmem:[%s4159_s21 + $0x1d8] sm:$0xff] %v1660_v57  ;;  %1836 = vst [vmem:[%s4159_s21 + $0x158] sm:$0xff] %v1628_v44 }
 0x1d1   : > { %1773 = vxpose.xlu1.b32.cont [13/16] %v1512_v23, 128  ;;  %v1661_v22 = vpop.trf.xlu1  ;;  %1741 = vxpose.xlu0.b32.cont [13/16] %v1511_v2, 128  ;;  %v1629_v48 = vpop.trf.xlu0 }
 0x1d2   : > { %1853 = vst [vmem:[%s4159_s21 + $0x1e0] sm:$0xff] %v1661_v22  ;;  %1837 = vst [vmem:[%s4159_s21 + $0x160] sm:$0xff] %v1629_v48 }
 0x1d5   : > { %1774 = vxpose.xlu1.b32.cont [14/16] %v1520_v25, 128  ;;  %v1662_v35 = vpop.trf.xlu1  ;;  %1742 = vxpose.xlu0.b32.cont [14/16] %v1519_v17, 128  ;;  %v1630_v32 = vpop.trf.xlu0 }
 0x1d6   : > { %1854 = vst [vmem:[%s4159_s21 + $0x1e8] sm:$0xff] %v1662_v35  ;;  %1838 = vst [vmem:[%s4159_s21 + $0x168] sm:$0xff] %v1630_v32 }
 0x1d9   : > { %1775 = vxpose.xlu1.b32.cont [15/16] %v1528_v54, 128  ;;  %v1663_v13 = vpop.trf.xlu1  ;;  %1743 = vxpose.xlu0.b32.cont [15/16] %v1527_v39, 128  ;;  %v1631_v58 = vpop.trf.xlu0 }
 0x1da   : > { %1855 = vst [vmem:[%s4159_s21 + $0x1f0] sm:$0xff] %v1663_v13  ;;  %1839 = vst [vmem:[%s4159_s21 + $0x170] sm:$0xff] %v1631_v58 }
 0x1dd   : > { %1776 = vxpose.xlu1.b32.end [16/16] %v1536_v10, 128  ;;  %v1664_v46 = vpop.trf.xlu1  ;;  %1744 = vxpose.xlu0.b32.end [16/16] %v1535_v61, 128  ;;  %v1632_v19 = vpop.trf.xlu0 }
 0x1de   : > { %1856 = vst [vmem:[%s4159_s21 + $0x1f8] sm:$0xff] %v1664_v46  ;;  %1840 = vst [vmem:[%s4159_s21 + $0x178] sm:$0xff] %v1632_v19 }
 0x1e1   : > { %v1713_v52 = vpop.trf.xlu1  ;;  %v1681_v21 = vpop.trf.xlu0 }
 0x1e2   : > { %1873 = vst [vmem:[%s4159_s21 + $0x280] sm:$0xff] %v1713_v52  ;;  %1857 = vst [vmem:[%s4159_s21 + $0x200] sm:$0xff] %v1681_v21 }
 0x1e5   : > { %v1714_v41 = vpop.trf.xlu1  ;;  %v1682_v55 = vpop.trf.xlu0 }
 0x1e6   : > { %1874 = vst [vmem:[%s4159_s21 + $0x288] sm:$0xff] %v1714_v41  ;;  %1858 = vst [vmem:[%s4159_s21 + $0x208] sm:$0xff] %v1682_v55 }
 0x1e9   : > { %v1715_v15 = vpop.trf.xlu1  ;;  %v1683_v40 = vpop.trf.xlu0 }
 0x1ea   : > { %1875 = vst [vmem:[%s4159_s21 + $0x290] sm:$0xff] %v1715_v15  ;;  %1859 = vst [vmem:[%s4159_s21 + $0x210] sm:$0xff] %v1683_v40 }
 0x1ed   : > { %v1716_v12 = vpop.trf.xlu1  ;;  %v1684_v3 = vpop.trf.xlu0 }
 0x1ee   : > { %1876 = vst [vmem:[%s4159_s21 + $0x298] sm:$0xff] %v1716_v12  ;;  %1860 = vst [vmem:[%s4159_s21 + $0x218] sm:$0xff] %v1684_v3 }
 0x1f1   : > { %v1717_v63 = vpop.trf.xlu1  ;;  %v1685_v45 = vpop.trf.xlu0 }
 0x1f2   : > { %1877 = vst [vmem:[%s4159_s21 + $0x2a0] sm:$0xff] %v1717_v63  ;;  %1861 = vst [vmem:[%s4159_s21 + $0x220] sm:$0xff] %v1685_v45 }
 0x1f5   : > { %v1718_v37 = vpop.trf.xlu1  ;;  %v1686_v4 = vpop.trf.xlu0 }
 0x1f6   : > { %1878 = vst [vmem:[%s4159_s21 + $0x2a8] sm:$0xff] %v1718_v37  ;;  %1862 = vst [vmem:[%s4159_s21 + $0x228] sm:$0xff] %v1686_v4 }
 0x1f9   : > { %v1719_v27 = vpop.trf.xlu1  ;;  %v1687_v53 = vpop.trf.xlu0 }
 0x1fa   : > { %1879 = vst [vmem:[%s4159_s21 + $0x2b0] sm:$0xff] %v1719_v27  ;;  %1863 = vst [vmem:[%s4159_s21 + $0x230] sm:$0xff] %v1687_v53 }
 0x1fd   : > { %v1720_v31 = vpop.trf.xlu1  ;;  %v1688_v20 = vpop.trf.xlu0 }
 0x1fe   : > { %1880 = vst [vmem:[%s4159_s21 + $0x2b8] sm:$0xff] %v1720_v31  ;;  %1864 = vst [vmem:[%s4159_s21 + $0x238] sm:$0xff] %v1688_v20 }
 0x201   : > { %v1721_v43 = vpop.trf.xlu1  ;;  %v1689_v18 = vpop.trf.xlu0 }
 0x202   : > { %1881 = vst [vmem:[%s4159_s21 + $0x2c0] sm:$0xff] %v1721_v43  ;;  %1865 = vst [vmem:[%s4159_s21 + $0x240] sm:$0xff] %v1689_v18 }
 0x205   : > { %v1722_v42 = vpop.trf.xlu1  ;;  %v1690_v6 = vpop.trf.xlu0 }
 0x206   : > { %1882 = vst [vmem:[%s4159_s21 + $0x2c8] sm:$0xff] %v1722_v42  ;;  %1866 = vst [vmem:[%s4159_s21 + $0x248] sm:$0xff] %v1690_v6 }
 0x209   : > { %v1723_v49 = vpop.trf.xlu1  ;;  %v1691_v0 = vpop.trf.xlu0 }
 0x20a   : > { %1883 = vst [vmem:[%s4159_s21 + $0x2d0] sm:$0xff] %v1723_v49  ;;  %1867 = vst [vmem:[%s4159_s21 + $0x250] sm:$0xff] %v1691_v0 }
 0x20d   : > { %v1724_v8 = vpop.trf.xlu1  ;;  %v1692_v26 = vpop.trf.xlu0 }
 0x20e   : > { %1884 = vst [vmem:[%s4159_s21 + $0x2d8] sm:$0xff] %v1724_v8  ;;  %1868 = vst [vmem:[%s4159_s21 + $0x258] sm:$0xff] %v1692_v26 }
 0x211   : > { %v1725_v62 = vpop.trf.xlu1  ;;  %v1693_v14 = vpop.trf.xlu0 }
 0x212   : > { %1885 = vst [vmem:[%s4159_s21 + $0x2e0] sm:$0xff] %v1725_v62  ;;  %1869 = vst [vmem:[%s4159_s21 + $0x260] sm:$0xff] %v1693_v14 }
 0x215   : > { %v1726_v33 = vpop.trf.xlu1  ;;  %v1694_v28 = vpop.trf.xlu0 }
 0x216   : > { %1886 = vst [vmem:[%s4159_s21 + $0x2e8] sm:$0xff] %v1726_v33  ;;  %1870 = vst [vmem:[%s4159_s21 + $0x268] sm:$0xff] %v1694_v28 }
 0x219   : > { %v1727_v59 = vpop.trf.xlu1  ;;  %v1695_v9 = vpop.trf.xlu0 }
 0x21a   : > { %1887 = vst [vmem:[%s4159_s21 + $0x2f0] sm:$0xff] %v1727_v59  ;;  %1871 = vst [vmem:[%s4159_s21 + $0x270] sm:$0xff] %v1695_v9 }
 0x21d   : > { %v1728_v24 = vpop.trf.xlu1  ;;  %v1696_v47 = vpop.trf.xlu0 }
 0x21e   : > { %1888 = vst [vmem:[%s4159_s21 + $0x2f8] sm:$0xff] %v1728_v24  ;;  %1872 = vst [vmem:[%s4159_s21 + $0x278] sm:$0xff] %v1696_v47 }
 0x221   : > { %v1777_v57 = vpop.trf.xlu1  ;;  %v1745_v44 = vpop.trf.xlu0 }
 0x222   : > { %1905 = vst [vmem:[%s4159_s21 + $0x380] sm:$0xff] %v1777_v57  ;;  %1889 = vst [vmem:[%s4159_s21 + $0x300] sm:$0xff] %v1745_v44 }
 0x225   : > { %v1778_v50 = vpop.trf.xlu1  ;;  %v1746_v30 = vpop.trf.xlu0 }
 0x226   : > { %1906 = vst [vmem:[%s4159_s21 + $0x388] sm:$0xff] %v1778_v50  ;;  %1890 = vst [vmem:[%s4159_s21 + $0x308] sm:$0xff] %v1746_v30 }
 0x229   : > { %v1779_v5 = vpop.trf.xlu1  ;;  %v1747_v23 = vpop.trf.xlu0 }
 0x22a   : > { %1907 = vst [vmem:[%s4159_s21 + $0x390] sm:$0xff] %v1779_v5  ;;  %1891 = vst [vmem:[%s4159_s21 + $0x310] sm:$0xff] %v1747_v23 }
 0x22d   : > { %v1780_v2 = vpop.trf.xlu1  ;;  %v1748_v36 = vpop.trf.xlu0 }
 0x22e   : > { %1908 = vst [vmem:[%s4159_s21 + $0x398] sm:$0xff] %v1780_v2  ;;  %1892 = vst [vmem:[%s4159_s21 + $0x318] sm:$0xff] %v1748_v36 }
 0x231   : > { %v1781_v22 = vpop.trf.xlu1  ;;  %v1749_v48 = vpop.trf.xlu0 }
 0x232   : > { %1909 = vst [vmem:[%s4159_s21 + $0x3a0] sm:$0xff] %v1781_v22  ;;  %1893 = vst [vmem:[%s4159_s21 + $0x320] sm:$0xff] %v1749_v48 }
 0x235   : > { %v1782_v7 = vpop.trf.xlu1  ;;  %v1750_v34 = vpop.trf.xlu0 }
 0x236   : > { %1910 = vst [vmem:[%s4159_s21 + $0x3a8] sm:$0xff] %v1782_v7  ;;  %1894 = vst [vmem:[%s4159_s21 + $0x328] sm:$0xff] %v1750_v34 }
 0x239   : > { %v1783_v16 = vpop.trf.xlu1  ;;  %v1751_v29 = vpop.trf.xlu0 }
 0x23a   : > { %1911 = vst [vmem:[%s4159_s21 + $0x3b0] sm:$0xff] %v1783_v16  ;;  %1895 = vst [vmem:[%s4159_s21 + $0x330] sm:$0xff] %v1751_v29 }
 0x23d   : > { %v1784_v25 = vpop.trf.xlu1  ;;  %v1752_v17 = vpop.trf.xlu0 }
 0x23e   : > { %1912 = vst [vmem:[%s4159_s21 + $0x3b8] sm:$0xff] %v1784_v25  ;;  %1896 = vst [vmem:[%s4159_s21 + $0x338] sm:$0xff] %v1752_v17 }
 0x241   : > { %v1785_v60 = vpop.trf.xlu1  ;;  %v1753_v35 = vpop.trf.xlu0 }
 0x242   : > { %1913 = vst [vmem:[%s4159_s21 + $0x3c0] sm:$0xff] %v1785_v60  ;;  %1897 = vst [vmem:[%s4159_s21 + $0x340] sm:$0xff] %v1753_v35 }
 0x245   : > { %v1786_v32 = vpop.trf.xlu1  ;;  %v1754_v51 = vpop.trf.xlu0 }
 0x246   : > { %1914 = vst [vmem:[%s4159_s21 + $0x3c8] sm:$0xff] %v1786_v32  ;;  %1898 = vst [vmem:[%s4159_s21 + $0x348] sm:$0xff] %v1754_v51 }
 0x249   : > { %v1787_v1 = vpop.trf.xlu1  ;;  %v1755_v56 = vpop.trf.xlu0 }
 0x24a   : > { %1915 = vst [vmem:[%s4159_s21 + $0x3d0] sm:$0xff] %v1787_v1  ;;  %1899 = vst [vmem:[%s4159_s21 + $0x350] sm:$0xff] %v1755_v56 }
 0x24d   : > { %v1788_v54 = vpop.trf.xlu1  ;;  %v1756_v39 = vpop.trf.xlu0 }
 0x24e   : > { %1916 = vst [vmem:[%s4159_s21 + $0x3d8] sm:$0xff] %v1788_v54  ;;  %1900 = vst [vmem:[%s4159_s21 + $0x358] sm:$0xff] %v1756_v39 }
 0x251   : > { %v1789_v13 = vpop.trf.xlu1  ;;  %v1757_v58 = vpop.trf.xlu0 }
 0x252   : > { %1917 = vst [vmem:[%s4159_s21 + $0x3e0] sm:$0xff] %v1789_v13  ;;  %1901 = vst [vmem:[%s4159_s21 + $0x360] sm:$0xff] %v1757_v58 }
 0x255   : > { %v1790_v11 = vpop.trf.xlu1  ;;  %v1758_v38 = vpop.trf.xlu0 }
 0x256   : > { %1918 = vst [vmem:[%s4159_s21 + $0x3e8] sm:$0xff] %v1790_v11  ;;  %1902 = vst [vmem:[%s4159_s21 + $0x368] sm:$0xff] %v1758_v38 }
 0x259   : > { %v1791_v10 = vpop.trf.xlu1  ;;  %v1759_v61 = vpop.trf.xlu0 }
 0x25a   : > { %1919 = vst [vmem:[%s4159_s21 + $0x3f0] sm:$0xff] %v1791_v10  ;;  %1903 = vst [vmem:[%s4159_s21 + $0x370] sm:$0xff] %v1759_v61 }
 0x25d   : > { %v1792_v46 = vpop.trf.xlu1  ;;  %v1760_v19 = vpop.trf.xlu0 }
 0x25e   : > { %1920 = vst [vmem:[%s4159_s21 + $0x3f8] sm:$0xff] %v1792_v46  ;;  %1904 = vst [vmem:[%s4159_s21 + $0x378] sm:$0xff] %v1760_v19 }
 0x25f   : > { %2169 = shalt.err (!%p2166_p5)
}
 0x260   : > { %s2170_s9 = scalar_lea.hbm %s4538_s5, 16384  ;;  %s2174_s23 = scalar_lea.hbm %s4594_s3, 32768 }
 0x261   : > { %p2171_p4 = scmp.ne.s32.totalorder %s4538_s5, %s2170_s9  ;;  %p2175_p12 = scmp.lt.u32.totalorder %s4538_s5, %s4594_s3 }
 0x262   : > { %p2176_p1 = scmp.lt.u32.totalorder %s2174_s23, %s2170_s9  ;;  %p2178_p8 = scmp.lt.u32.totalorder %s2170_s9, %s4538_s5 }
 0x263   : > { %p2172_p7 = pnand %p2171_p4, %p5133_p9 }
 0x264   : > { %p2177_p3 = por %p2176_p1, %p2175_p12 }
 0x265   : > { %p2173_p10 = pneg %p2172_p7 }
 0x266   : > { %p2179_p11 = por %p2178_p8, %p2177_p3 }
 0x268   : > { %p2180_p0 = pnand %p2179_p11, %p2173_p10 }
 0x26a   : > { %2183 = shalt.err (!%p2180_p0)
}
 0x26b   : > { %s2245_s21 = smov 128   ;;  %s2246_s18 = smov 8  }
 0x26c   : > { %2043 = dma.vmem_to_hbm [thread:$0]  (%p5133_p9), %s4540_s29, 16384, %s4538_s5, %s1922_s15, %s2245_s21, %s2245_s21, %s2246_s18  }
 0x26d PF: > { %s1952_s30 = sand.u32 1, %s2218_s12   ;;  %p5134_p6 = scmp.ne.s32.totalorder %s4777_s27, 0 }
 0x26e   : > { %p5135_p13 = scmp.ge.s32.totalorder %s2238_s17, 2  ;;  %s1953_s4 = scalar_lea.sflag [#allocation4], %s1952_s30 }
 0x270   : > { %p2050_p2 = pnand %p5135_p13, %p5134_p6 }
 0x272   : > { %2213 = dma.done.wait (!%p2050_p2), %s1953_s4, 16384  }
 0x273   : > { %2215 = vsyncadd (!%p2050_p2), %s1953_s4, 4294950912  ;;  %s19_s17 = sadd.s32 1, %s2238_s17   ;;  %s5136_s12 = smov %s2222_s13 }
 0x274   : > { %p16_p5 = scmp.ge.s32.totalorder %s19_s17, 4   ;;  %s5137_s13 = smov %s2226_s14 }
 0x275   : > { %s5138_s14 = smov %s2323_s26  ;;  %s5139_s15 = smov %s2234_s16 }
 0x276   : > { %s5140_s16 = smov %s5142_s20  ;;  %18 = sbr.rel (!%p16_p5) target bundleno = 6 (0x6), region = 77 }
 0x27d   :  { %1958 = vsyncpa [#allocation3], 1 }
 0x27e   :  { %1960 = vsyncpa [#allocation3 + $0x1], 1 }
 0x27f   :  { %1961 = vsyncpa [#allocation4], 1 }
 0x280   :  { %1963 = vsyncpa [#allocation4 + $0x1], 1 }

</bundles_post_ra>
